<compile_context>
chip_gen: v5e
topology: v5e:2x2
jax: 0.10.0
libtpu: 0.0.40
codegen_flags: <defaults>
</compile_context>

<pallas_src>
import functools

import jax
import jax.numpy as jnp
from jax.experimental import pallas as pl
from jax.experimental.pallas import tpu as pltpu


# ----------------------------- Pallas kernels -----------------------------

def _layernorm_f32(x, g, b, eps):
    mu = jnp.mean(x, axis=-1, keepdims=True)
    xc = x - mu
    var = jnp.mean(xc * xc, axis=-1, keepdims=True)
    return xc * jax.lax.rsqrt(var + eps) * g + b


def _patch_embed_kernel(p_ref, w_ref, b_ref, pos_ref, o_ref):
    x = p_ref[0]                                                      # (N, PD) bf16
    y = jnp.dot(x, w_ref[...], preferred_element_type=jnp.float32)    # bf16 @ bf16 -> f32
    o_ref[0] = (y + b_ref[...] + pos_ref[...]).astype(o_ref.dtype)


def _attention_core(qkv_b, wo_b, bo, heads, dh, D, scale, mask):
    """Per-head softmax, head outputs concatenated on lanes, single fused O-proj."""
    # TODO(synk): for heads>=8 / long S switch to a batched (heads,S,dh) layout with
    # lax.fori_loop + q/KV tiling (online softmax) to bound vreg live ranges and VMEM.
    head_outs = []
    for hh in range(heads):
        q = qkv_b[:, hh * dh:(hh + 1) * dh]
        k = qkv_b[:, D + hh * dh:D + (hh + 1) * dh]
        v = qkv_b[:, 2 * D + hh * dh:2 * D + (hh + 1) * dh]
        s = jax.lax.dot_general(q, k, (((1,), (1,)), ((), ())),
                                preferred_element_type=jnp.float32) * scale
        if mask is not None:
            s = s + mask
        m = jnp.max(s, axis=-1, keepdims=True)
        p = jnp.exp(s - m)
        l = jnp.sum(p, axis=-1, keepdims=True)
        oh = jnp.dot(p.astype(jnp.bfloat16), v, preferred_element_type=jnp.float32)
        oh = oh * pl.reciprocal(l, approx=True)
        head_outs.append(oh.astype(jnp.bfloat16))
    attn = jnp.concatenate(head_outs, axis=-1)                        # (S, D) bf16
    # Single MXU-friendly K=D O-projection (replaces per-head K=dh partials).
    return jnp.dot(attn, wo_b, preferred_element_type=jnp.float32) + bo


def _self_attn_block_kernel(x_ref, g_ref, b_ref, wqkv_ref, bqkv_ref, wo_ref, bo_ref,
                            o_ref, *, heads, causal, eps):
    x = x_ref[0].astype(jnp.float32)                                  # (S, D)
    S, D = x.shape
    dh = D // heads
    scale = 1.0 / float(dh) ** 0.5

    h = _layernorm_f32(x, g_ref[...], b_ref[...], eps)

    # Fused QKV projection: one (S, D) @ (D, 3D) bf16 matmul with f32 accumulation.
    qkv = jnp.dot(h.astype(jnp.bfloat16), wqkv_ref[...],
                  preferred_element_type=jnp.float32) + bqkv_ref[...]
    qkv_b = qkv.astype(jnp.bfloat16)

    # Causal mask built ONCE (hoisted out of the per-head loop).
    mask = None
    if causal:
        qi = jax.lax.broadcasted_iota(jnp.int32, (S, S), 0)
        ki = jax.lax.broadcasted_iota(jnp.int32, (S, S), 1)
        mask = jnp.where(ki <= qi, jnp.float32(0.0), jnp.float32(-1e30))

    out = _attention_core(qkv_b, wo_ref[...], bo_ref[...], heads, dh, D, scale, mask)
    o_ref[0] = (x + out).astype(o_ref.dtype)                          # fused residual


def _cross_attn_block_kernel(x_ref, mem_ref, g_ref, b_ref, wq_ref, bq_ref,
                             wkv_ref, bkv_ref, wo_ref, bo_ref, o_ref, *, heads, eps):
    x = x_ref[0].astype(jnp.float32)                                  # (T, D)
    mem = mem_ref[0]                                                  # (N, D) bf16
    T, D = x.shape
    dh = D // heads
    scale = 1.0 / float(dh) ** 0.5

    h = _layernorm_f32(x, g_ref[...], b_ref[...], eps)

    q = jnp.dot(h.astype(jnp.bfloat16), wq_ref[...],
                preferred_element_type=jnp.float32) + bq_ref[...]      # (T, D)
    kv = jnp.dot(mem, wkv_ref[...],
                 preferred_element_type=jnp.float32) + bkv_ref[...]    # (N, 2D)
    q_b = q.astype(jnp.bfloat16)
    kv_b = kv.astype(jnp.bfloat16)
    wo_b = wo_ref[...]

    head_outs = []
    for hh in range(heads):
        qh = q_b[:, hh * dh:(hh + 1) * dh]
        kh = kv_b[:, hh * dh:(hh + 1) * dh]
        vh = kv_b[:, D + hh * dh:D + (hh + 1) * dh]
        s = jax.lax.dot_general(qh, kh, (((1,), (1,)), ((), ())),
                                preferred_element_type=jnp.float32) * scale
        m = jnp.max(s, axis=-1, keepdims=True)
        p = jnp.exp(s - m)
        l = jnp.sum(p, axis=-1, keepdims=True)
        oh = jnp.dot(p.astype(jnp.bfloat16), vh, preferred_element_type=jnp.float32)
        oh = oh * pl.reciprocal(l, approx=True)
        head_outs.append(oh.astype(jnp.bfloat16))
    attn = jnp.concatenate(head_outs, axis=-1)                         # (T, D) bf16
    out = jnp.dot(attn, wo_b, preferred_element_type=jnp.float32) + bo_ref[...]

    o_ref[0] = (x + out).astype(o_ref.dtype)                           # fused residual


def _mlp_block_kernel(x_ref, g_ref, b_ref, w1_ref, b1_ref, w2_ref, b2_ref,
                      *rest, eps, fuse_out_ln):
    if fuse_out_ln:
        g2_ref, b2o_ref, o_ref = rest
    else:
        (o_ref,) = rest
    x = x_ref[...].astype(jnp.float32)                                 # (tm, D)
    h = _layernorm_f32(x, g_ref[...], b_ref[...], eps)
    h1 = jnp.dot(h.astype(jnp.bfloat16), w1_ref[...],
                 preferred_element_type=jnp.float32) + b1_ref[...]
    # TODO(synk): PyTorch nn.GELU defaults to exact erf; tanh approximation used here
    # (erf lowering in Mosaic is avoided for portability).
    h1 = jax.nn.gelu(h1)
    h2 = jnp.dot(h1.astype(jnp.bfloat16), w2_ref[...],
                 preferred_element_type=jnp.float32) + b2_ref[...]
    y = x + h2                                                         # fused residual
    if fuse_out_ln:
        # Final encoder LayerNorm fused into the last MLP block's epilogue.
        y = _layernorm_f32(y, g2_ref[...], b2o_ref[...], eps)
    o_ref[...] = y.astype(o_ref.dtype)


def _ln_lm_head_kernel(x_ref, g_ref, b_ref, w_ref, bh_ref, o_ref, h_scratch, *, eps):
    # LayerNorm of the row tile computed once (j == 0), reused for every vocab tile.
    @pl.when(pl.program_id(1) == 0)
    def _():
        x = x_ref[...].astype(jnp.float32)                             # (tm, D)
        h_scratch[...] = _layernorm_f32(x, g_ref[...], b_ref[...], eps).astype(jnp.bfloat16)
    y = jnp.dot(h_scratch[...], w_ref[...],
                preferred_element_type=jnp.float32) + bh_ref[...]
    o_ref[...] = y.astype(o_ref.dtype)


# ----------------------------- pallas_call wrappers -----------------------------

_VMEM_LIMIT = 48 * 1024 * 1024   # explicit; conservative for v7x (64 MiB physical)


def _cp(semantics):
    return pltpu.CompilerParams(dimension_semantics=semantics,
                                vmem_limit_bytes=_VMEM_LIMIT)


def _ln2d(ln):
    return ln["g"].reshape(1, -1), ln["b"].reshape(1, -1)


def _row_tile(M, cap=512):
    # Largest row tile (multiple of 8 when possible) up to `cap` that divides M.
    if M <= cap:
        return M
    tm = cap - (cap % 8)
    while tm > 8 and M % tm != 0:
        tm -= 8
    return tm if (tm >= 8 and M % tm == 0) else M


def patch_embed(patches, w, b, pos):
    # TODO(synk): fold the NCHW patchify into this kernel's index_map to avoid the
    # pre-materialized (B, N, PD) tensor (extra HBM round trip).
    B, N, PD = patches.shape
    D = w.shape[1]
    return pl.pallas_call(
        _patch_embed_kernel,
        out_shape=jax.ShapeDtypeStruct((B, N, D), jnp.bfloat16),
        grid=(B,),
        in_specs=[
            pl.BlockSpec((1, N, PD), lambda b_: (b_, 0, 0)),
            pl.BlockSpec((PD, D), lambda b_: (0, 0)),
            pl.BlockSpec((1, D), lambda b_: (0, 0)),
            pl.BlockSpec((N, D), lambda b_: (0, 0)),
        ],
        out_specs=pl.BlockSpec((1, N, D), lambda b_: (b_, 0, 0)),
        compiler_params=_cp(("parallel",)),
    )(patches, w, b.reshape(1, D), pos)


def self_attn_block(x, ln, attn, heads, causal):
    # TODO(synk): for long S add a query-tile grid axis (+ KV tiling with online softmax)
    # so the working set fits v7x's 64 MiB VMEM and both TensorCores get >B grid steps.
    B, S, D = x.shape
    g, be = _ln2d(ln)
    return pl.pallas_call(
        functools.partial(_self_attn_block_kernel, heads=heads, causal=causal, eps=1e-5),
        out_shape=jax.ShapeDtypeStruct((B, S, D), x.dtype),
        grid=(B,),
        in_specs=[
            pl.BlockSpec((1, S, D), lambda b_: (b_, 0, 0)),
            pl.BlockSpec((1, D), lambda b_: (0, 0)),
            pl.BlockSpec((1, D), lambda b_: (0, 0)),
            pl.BlockSpec((D, 3 * D), lambda b_: (0, 0)),
            pl.BlockSpec((1, 3 * D), lambda b_: (0, 0)),
            pl.BlockSpec((D, D), lambda b_: (0, 0)),
            pl.BlockSpec((1, D), lambda b_: (0, 0)),
        ],
        out_specs=pl.BlockSpec((1, S, D), lambda b_: (b_, 0, 0)),
        compiler_params=_cp(("parallel",)),
    )(x, g, be, attn["wqkv"], attn["bqkv"].reshape(1, 3 * D),
      attn["wo"], attn["bo"].reshape(1, D))


def cross_attn_block(x, mem, ln, attn, heads):
    B, T, D = x.shape
    _, N, _ = mem.shape
    g, be = _ln2d(ln)
    return pl.pallas_call(
        functools.partial(_cross_attn_block_kernel, heads=heads, eps=1e-5),
        out_shape=jax.ShapeDtypeStruct((B, T, D), x.dtype),
        grid=(B,),
        in_specs=[
            pl.BlockSpec((1, T, D), lambda b_: (b_, 0, 0)),
            pl.BlockSpec((1, N, D), lambda b_: (b_, 0, 0)),
            pl.BlockSpec((1, D), lambda b_: (0, 0)),
            pl.BlockSpec((1, D), lambda b_: (0, 0)),
            pl.BlockSpec((D, D), lambda b_: (0, 0)),
            pl.BlockSpec((1, D), lambda b_: (0, 0)),
            pl.BlockSpec((D, 2 * D), lambda b_: (0, 0)),
            pl.BlockSpec((1, 2 * D), lambda b_: (0, 0)),
            pl.BlockSpec((D, D), lambda b_: (0, 0)),
            pl.BlockSpec((1, D), lambda b_: (0, 0)),
        ],
        out_specs=pl.BlockSpec((1, T, D), lambda b_: (b_, 0, 0)),
        compiler_params=_cp(("parallel",)),
    )(x, mem, g, be, attn["wq"], attn["bq"].reshape(1, D),
      attn["wkv"], attn["bkv"].reshape(1, 2 * D),
      attn["wo"], attn["bo"].reshape(1, D))


def mlp_block(x, ln, mlp, out_ln=None, out_dtype=None):
    B, S, D = x.shape
    M = B * S
    tm = _row_tile(M)
    Hd = mlp["w1"].shape[1]
    g, be = _ln2d(ln)
    fuse = out_ln is not None
    args = [x.reshape(M, D), g, be, mlp["w1"], mlp["b1"].reshape(1, Hd),
            mlp["w2"], mlp["b2"].reshape(1, D)]
    in_specs = [
        pl.BlockSpec((tm, D), lambda i: (i, 0)),
        pl.BlockSpec((1, D), lambda i: (0, 0)),
        pl.BlockSpec((1, D), lambda i: (0, 0)),
        pl.BlockSpec((D, Hd), lambda i: (0, 0)),
        pl.BlockSpec((1, Hd), lambda i: (0, 0)),
        pl.BlockSpec((Hd, D), lambda i: (0, 0)),
        pl.BlockSpec((1, D), lambda i: (0, 0)),
    ]
    if fuse:
        g2, b2o = _ln2d(out_ln)
        args += [g2, b2o]
        in_specs += [pl.BlockSpec((1, D), lambda i: (0, 0)),
                     pl.BlockSpec((1, D), lambda i: (0, 0))]
    dt = out_dtype if out_dtype is not None else x.dtype
    y = pl.pallas_call(
        functools.partial(_mlp_block_kernel, eps=1e-5, fuse_out_ln=fuse),
        out_shape=jax.ShapeDtypeStruct((M, D), dt),
        grid=(M // tm,),
        in_specs=in_specs,
        out_specs=pl.BlockSpec((tm, D), lambda i: (i, 0)),
        compiler_params=_cp(("parallel",)),
    )(*args)
    return y.reshape(B, S, D)


def ln_lm_head(x, ln, head, vocab):
    B, T, D = x.shape
    M = B * T
    tm = _row_tile(M)
    Vp = head["w"].shape[1]                      # already padded to a multiple of 128
    tn = min(Vp, 2048)
    if Vp % tn != 0:
        tn = Vp
    g, be = _ln2d(ln)
    y = pl.pallas_call(
        functools.partial(_ln_lm_head_kernel, eps=1e-5),
        out_shape=jax.ShapeDtypeStruct((M, Vp), jnp.float32),
        grid=(M // tm, Vp // tn),
        in_specs=[
            pl.BlockSpec((tm, D), lambda i, j: (i, 0)),
            pl.BlockSpec((1, D), lambda i, j: (0, 0)),
            pl.BlockSpec((1, D), lambda i, j: (0, 0)),
            pl.BlockSpec((D, tn), lambda i, j: (0, j)),
            pl.BlockSpec((1, tn), lambda i, j: (0, j)),
        ],
        out_specs=pl.BlockSpec((tm, tn), lambda i, j: (i, j)),
        scratch_shapes=[pltpu.VMEM((tm, D), jnp.bfloat16)],
        compiler_params=_cp(("parallel", "arbitrary")),
    )(x.reshape(M, D), g, be, head["w"], head["b"].reshape(1, Vp))
    return y[:, :vocab].reshape(B, T, vocab)


# ----------------------------- Parameter init -----------------------------
# Matmul weights stored bf16 (MXU-native, half the DMA bytes); biases/LN params f32.

def _init_w(key, fan_in, fan_out):
    w = jax.random.normal(key, (fan_in, fan_out), jnp.float32) / jnp.sqrt(
        jnp.float32(fan_in))
    return w.astype(jnp.bfloat16)


def _init_ln(dim):
    return {"g": jnp.ones((dim,), jnp.float32), "b": jnp.zeros((dim,), jnp.float32)}


def _init_fused_attn(key, dim):
    k1, k2 = jax.random.split(key)
    return {"wqkv": _init_w(k1, dim, 3 * dim), "bqkv": jnp.zeros((3 * dim,), jnp.float32),
            "wo": _init_w(k2, dim, dim), "bo": jnp.zeros((dim,), jnp.float32)}


def _init_cross_attn(key, dim):
    k1, k2, k3 = jax.random.split(key, 3)
    return {"wq": _init_w(k1, dim, dim), "bq": jnp.zeros((dim,), jnp.float32),
            "wkv": _init_w(k2, dim, 2 * dim), "bkv": jnp.zeros((2 * dim,), jnp.float32),
            "wo": _init_w(k3, dim, dim), "bo": jnp.zeros((dim,), jnp.float32)}


def _init_mlp(key, dim, hidden):
    k1, k2 = jax.random.split(key)
    return {"w1": _init_w(k1, dim, hidden), "b1": jnp.zeros((hidden,), jnp.float32),
            "w2": _init_w(k2, hidden, dim), "b2": jnp.zeros((dim,), jnp.float32)}


def init_cruller_params(key, cfg):
    D, mlp = cfg["dim"], cfg["mlp_dim"]
    keys = jax.random.split(key, 8)

    # Image encoder (ViT-style, timm-like)
    patch_dim = cfg["in_chans"] * cfg["patch"] * cfg["patch"]
    enc_blocks = []
    for bk in jax.random.split(keys[1], cfg["enc_layers"]):
        k1, k2 = jax.random.split(bk)
        enc_blocks.append({"ln1": _init_ln(D), "attn": _init_fused_attn(k1, D),
                           "ln2": _init_ln(D), "mlp": _init_mlp(k2, D, mlp)})
    encoder = {
        "patch_proj": {"w": _init_w(keys[0], patch_dim, D),
                       "b": jnp.zeros((D,), jnp.float32)},
        "pos": 0.02 * jax.random.normal(keys[2], (cfg["n_patches"], D), jnp.float32),
        "blocks": enc_blocks,
        "ln_f": _init_ln(D),
    }

    # Text decoder (HF-style causal decoder w/ cross-attention)
    dec_blocks = []
    for bk in jax.random.split(keys[4], cfg["dec_layers"]):
        k1, k2, k3 = jax.random.split(bk, 3)
        dec_blocks.append({"ln1": _init_ln(D), "self_attn": _init_fused_attn(k1, D),
                           "ln2": _init_ln(D), "cross_attn": _init_cross_attn(k2, D),
                           "ln3": _init_ln(D), "mlp": _init_mlp(k3, D, mlp)})
    # lm_head padded to a 128-multiple vocab for lane-dense stores (padded logits are
    # sliced away after the kernel).
    V = cfg["vocab"]
    Vp = 128 * pl.cdiv(V, 128)
    decoder = {
        "tok_emb": 0.02 * jax.random.normal(keys[3], (V, D), jnp.float32),
        "pos": 0.02 * jax.random.normal(keys[5], (cfg["seq_len"], D), jnp.float32),
        "blocks": dec_blocks,
        "ln_f": _init_ln(D),
        "lm_head": {"w": _init_w(keys[6], D, Vp),
                    "b": jnp.zeros((Vp,), jnp.float32)},
    }
    return {"image_encoder": encoder, "text_decoder": decoder}


# ----------------------------- Model forward -----------------------------

def _patchify(img, patch):
    # NCHW -> (B, N_patches, C*ph*pw); matches stride=patch conv patch-embed unfold.
    B, C, H, W = img.shape
    x = img.astype(jnp.bfloat16)             # bf16 patchify: half the pre-kernel DMA
    x = x.reshape(B, C, H // patch, patch, W // patch, patch)
    x = x.transpose(0, 2, 4, 1, 3, 5)
    return x.reshape(B, (H // patch) * (W // patch), C * patch * patch)


def image_encoder_forward(params, image, cfg):
    patches = _patchify(image, cfg["patch"])                       # (B, N, patch_dim)
    x = patch_embed(patches, params["patch_proj"]["w"], params["patch_proj"]["b"],
                    params["pos"])                                 # proj + pos fused, bf16
    n_blocks = len(params["blocks"])
    for li, blk in enumerate(params["blocks"]):
        x = self_attn_block(x, blk["ln1"], blk["attn"], cfg["heads"], causal=False)
        last = li == n_blocks - 1
        # Final encoder LayerNorm fused into the last MLP block; output f32 for the
        # returned encoder_hidden_states.
        x = mlp_block(x, blk["ln2"], blk["mlp"],
                      out_ln=params["ln_f"] if last else None,
                      out_dtype=jnp.float32 if last else None)
    return x                                                       # (B, N, D) f32


def text_decoder_forward(params, token_ids, encoder_hidden_states, cfg):
    B, T = token_ids.shape
    # TODO(synk): for large T/vocab gather tok_emb rows inside a kernel via scalar prefetch.
    x = jnp.take(params["tok_emb"], token_ids, axis=0) + params["pos"][None, :T, :]
    x = x.astype(jnp.bfloat16)                                     # bf16 residual stream
    mem = encoder_hidden_states.astype(jnp.bfloat16)               # cast once for KV path
    for blk in params["blocks"]:
        x = self_attn_block(x, blk["ln1"], blk["self_attn"], cfg["heads"], causal=True)
        x = cross_attn_block(x, mem, blk["ln2"], blk["cross_attn"], cfg["heads"])
        x = mlp_block(x, blk["ln3"], blk["mlp"])
    return ln_lm_head(x, params["ln_f"], params["lm_head"], cfg["vocab"])


def cruller_forward(params, image_input, text_input, cfg):
    encoder_output = image_encoder_forward(params["image_encoder"], image_input, cfg)
    logits = text_decoder_forward(params["text_decoder"], text_input,
                                  encoder_output, cfg)
    # return_dict=True analogue of the HF decoder output.
    return {"logits": logits, "encoder_hidden_states": encoder_output}


# ----------------------------- Driver -----------------------------

if __name__ == "__main__":
    cfg = dict(
        in_chans=3, img_size=16, patch=8, n_patches=4,
        dim=32, heads=4, mlp_dim=128,
        enc_layers=2, dec_layers=2,
        vocab=64, seq_len=8,
    )
    B = 2

    root = jax.random.PRNGKey(0)
    k_params, k_img, k_txt = jax.random.split(root, 3)

    params = init_cruller_params(k_params, cfg)
    image_input = jax.random.normal(
        k_img, (B, cfg["in_chans"], cfg["img_size"], cfg["img_size"]), jnp.float32)
    text_input = jax.random.randint(
        k_txt, (B, cfg["seq_len"]), 0, cfg["vocab"], dtype=jnp.int32)

    fwd = jax.jit(functools.partial(cruller_forward, cfg=cfg))
    out = fwd(params, image_input, text_input)
    jax.block_until_ready(out)

    assert out["logits"].shape == (B, cfg["seq_len"], cfg["vocab"])
    assert out["encoder_hidden_states"].shape == (B, cfg["n_patches"], cfg["dim"])
    assert bool(jnp.all(jnp.isfinite(out["logits"])))
    assert bool(jnp.all(jnp.isfinite(out["encoder_hidden_states"])))
    print("KERNEL_OK")
</pallas_src>

<mosaic_0001>
module attributes {stable_mosaic.version = 11 : i64} {
  func.func @_mlp_block_kernel(%arg0: i32, %arg1: memref<8x32xbf16, #tpu.memory_space<vmem>>, %arg2: memref<1x32xf32, #tpu.memory_space<vmem>>, %arg3: memref<1x32xf32, #tpu.memory_space<vmem>>, %arg4: memref<32x128xbf16, #tpu.memory_space<vmem>>, %arg5: memref<1x128xf32, #tpu.memory_space<vmem>>, %arg6: memref<128x32xbf16, #tpu.memory_space<vmem>>, %arg7: memref<1x32xf32, #tpu.memory_space<vmem>>, %arg8: memref<8x32xbf16, #tpu.memory_space<vmem>>) attributes {dimension_semantics = [#tpu.dimension_semantics<parallel>], iteration_bounds = array<i64: 1>, scalar_prefetch = 0 : i64, scratch_operands = 0 : i64, tpu.core_type = #tpu.core_type<tc>, window_params = [{transform_indices = @transform_0, window_bounds = array<i64: 8, 32>}, {pipeline_mode = #tpu.pipeline_mode<synchronous>, transform_indices = @transform_1, window_bounds = array<i64: 1, 32>}, {pipeline_mode = #tpu.pipeline_mode<synchronous>, transform_indices = @transform_2, window_bounds = array<i64: 1, 32>}, {pipeline_mode = #tpu.pipeline_mode<synchronous>, transform_indices = @transform_3, window_bounds = array<i64: 32, 128>}, {pipeline_mode = #tpu.pipeline_mode<synchronous>, transform_indices = @transform_4, window_bounds = array<i64: 1, 128>}, {pipeline_mode = #tpu.pipeline_mode<synchronous>, transform_indices = @transform_5, window_bounds = array<i64: 128, 32>}, {pipeline_mode = #tpu.pipeline_mode<synchronous>, transform_indices = @transform_6, window_bounds = array<i64: 1, 32>}, {transform_indices = @transform_7, window_bounds = array<i64: 8, 32>}]} {
    %c0 = arith.constant 0 : index
    %c0_0 = arith.constant 0 : index
    %0 = vector.load %arg1[%c0, %c0_0] : memref<8x32xbf16, #tpu.memory_space<vmem>>, vector<8x32xbf16>
    %1 = arith.extf %0 : vector<8x32xbf16> to vector<8x32xf32>
    %c0_1 = arith.constant 0 : index
    %c0_2 = arith.constant 0 : index
    %2 = vector.load %arg2[%c0_1, %c0_2] : memref<1x32xf32, #tpu.memory_space<vmem>>, vector<1x32xf32>
    %c0_3 = arith.constant 0 : index
    %c0_4 = arith.constant 0 : index
    %3 = vector.load %arg3[%c0_3, %c0_4] : memref<1x32xf32, #tpu.memory_space<vmem>>, vector<1x32xf32>
    %cst = arith.constant dense<0.000000e+00> : vector<8xf32>
    %4 = vector.multi_reduction <add>, %1, %cst [1] : vector<8x32xf32> to vector<8xf32>
    %5 = vector.shape_cast %4 : vector<8xf32> to vector<8x1xf32>
    %cst_5 = arith.constant 3.200000e+01 : f32
    %6 = vector.broadcast %cst_5 : f32 to vector<8x1xf32>
    %7 = arith.divf %5, %6 : vector<8x1xf32>
    %8 = vector.broadcast %7 : vector<8x1xf32> to vector<8x32xf32>
    %9 = arith.subf %1, %8 : vector<8x32xf32>
    %10 = arith.mulf %9, %9 : vector<8x32xf32>
    %cst_6 = arith.constant dense<0.000000e+00> : vector<8xf32>
    %11 = vector.multi_reduction <add>, %10, %cst_6 [1] : vector<8x32xf32> to vector<8xf32>
    %12 = vector.shape_cast %11 : vector<8xf32> to vector<8x1xf32>
    %cst_7 = arith.constant 3.200000e+01 : f32
    %13 = vector.broadcast %cst_7 : f32 to vector<8x1xf32>
    %14 = arith.divf %12, %13 : vector<8x1xf32>
    %cst_8 = arith.constant 9.99999974E-6 : f32
    %15 = vector.broadcast %cst_8 : f32 to vector<8x1xf32>
    %16 = arith.addf %14, %15 : vector<8x1xf32>
    %17 = math.rsqrt %16 : vector<8x1xf32>
    %18 = vector.broadcast %17 : vector<8x1xf32> to vector<8x32xf32>
    %19 = arith.mulf %9, %18 : vector<8x32xf32>
    %20 = vector.broadcast %2 : vector<1x32xf32> to vector<8x32xf32>
    %21 = arith.mulf %19, %20 : vector<8x32xf32>
    %22 = vector.broadcast %3 : vector<1x32xf32> to vector<8x32xf32>
    %23 = arith.addf %21, %22 : vector<8x32xf32>
    %24 = arith.truncf %23 : vector<8x32xf32> to vector<8x32xbf16>
    %c0_9 = arith.constant 0 : index
    %c0_10 = arith.constant 0 : index
    %25 = vector.load %arg4[%c0_9, %c0_10] : memref<32x128xbf16, #tpu.memory_space<vmem>>, vector<32x128xbf16>
    %cst_11 = arith.constant dense<0.000000e+00> : vector<8x128xf32>
    %26 = tpu.matmul %24, %25, %cst_11 {dimension_numbers = #tpu.dot_dimension_numbers<[1], [0], [0], [1], [0, 0, 1, 1], [], []>} : vector<8x32xbf16>, vector<32x128xbf16>, vector<8x128xf32> -> vector<8x128xf32>
    %c0_12 = arith.constant 0 : index
    %c0_13 = arith.constant 0 : index
    %27 = vector.load %arg5[%c0_12, %c0_13] : memref<1x128xf32, #tpu.memory_space<vmem>>, vector<1x128xf32>
    %28 = vector.broadcast %27 : vector<1x128xf32> to vector<8x128xf32>
    %29 = arith.addf %26, %28 : vector<8x128xf32>
    %30 = arith.mulf %29, %29 : vector<8x128xf32>
    %31 = arith.mulf %29, %30 : vector<8x128xf32>
    %cst_14 = arith.constant 4.471500e-02 : f32
    %32 = vector.broadcast %cst_14 : f32 to vector<8x128xf32>
    %33 = arith.mulf %32, %31 : vector<8x128xf32>
    %34 = arith.addf %29, %33 : vector<8x128xf32>
    %cst_15 = arith.constant 0.797884583 : f32
    %35 = vector.broadcast %cst_15 : f32 to vector<8x128xf32>
    %36 = arith.mulf %35, %34 : vector<8x128xf32>
    %37 = math.tanh %36 : vector<8x128xf32>
    %cst_16 = arith.constant 1.000000e+00 : f32
    %38 = vector.broadcast %cst_16 : f32 to vector<8x128xf32>
    %39 = arith.addf %38, %37 : vector<8x128xf32>
    %cst_17 = arith.constant 5.000000e-01 : f32
    %40 = vector.broadcast %cst_17 : f32 to vector<8x128xf32>
    %41 = arith.mulf %40, %39 : vector<8x128xf32>
    %42 = arith.mulf %29, %41 : vector<8x128xf32>
    %43 = arith.truncf %42 : vector<8x128xf32> to vector<8x128xbf16>
    %c0_18 = arith.constant 0 : index
    %c0_19 = arith.constant 0 : index
    %44 = vector.load %arg6[%c0_18, %c0_19] : memref<128x32xbf16, #tpu.memory_space<vmem>>, vector<128x32xbf16>
    %cst_20 = arith.constant dense<0.000000e+00> : vector<8x32xf32>
    %45 = tpu.matmul %43, %44, %cst_20 {dimension_numbers = #tpu.dot_dimension_numbers<[1], [0], [0], [1], [0, 0, 1, 1], [], []>} : vector<8x128xbf16>, vector<128x32xbf16>, vector<8x32xf32> -> vector<8x32xf32>
    %c0_21 = arith.constant 0 : index
    %c0_22 = arith.constant 0 : index
    %46 = vector.load %arg7[%c0_21, %c0_22] : memref<1x32xf32, #tpu.memory_space<vmem>>, vector<1x32xf32>
    %47 = vector.broadcast %46 : vector<1x32xf32> to vector<8x32xf32>
    %48 = arith.addf %45, %47 : vector<8x32xf32>
    %49 = arith.addf %1, %48 : vector<8x32xf32>
    %50 = arith.truncf %49 : vector<8x32xf32> to vector<8x32xbf16>
    %c0_23 = arith.constant 0 : index
    %c0_24 = arith.constant 0 : index
    %51 = vector.load %arg8[%c0_23, %c0_24] : memref<8x32xbf16, #tpu.memory_space<vmem>>, vector<8x32xbf16>
    tpu.vector_store %arg8[%c0_23, %c0_24], %50 {strides = array<i32>} : memref<8x32xbf16, #tpu.memory_space<vmem>>, vector<8x32xbf16>,
    return
  }
  func.func @transform_0(%arg0: i32) -> (i32, i32) {
    %c0_i32 = arith.constant 0 : i32
    %c0_i32_0 = arith.constant 0 : i32
    return %arg0, %c0_i32 : i32, i32
  }
  func.func @transform_1(%arg0: i32) -> (i32, i32) {
    %c0_i32 = arith.constant 0 : i32
    %c0_i32_0 = arith.constant 0 : i32
    %c0_i32_1 = arith.constant 0 : i32
    return %c0_i32, %c0_i32_0 : i32, i32
  }
  func.func @transform_2(%arg0: i32) -> (i32, i32) {
    %c0_i32 = arith.constant 0 : i32
    %c0_i32_0 = arith.constant 0 : i32
    %c0_i32_1 = arith.constant 0 : i32
    return %c0_i32, %c0_i32_0 : i32, i32
  }
  func.func @transform_3(%arg0: i32) -> (i32, i32) {
    %c0_i32 = arith.constant 0 : i32
    %c0_i32_0 = arith.constant 0 : i32
    %c0_i32_1 = arith.constant 0 : i32
    return %c0_i32, %c0_i32_0 : i32, i32
  }
  func.func @transform_4(%arg0: i32) -> (i32, i32) {
    %c0_i32 = arith.constant 0 : i32
    %c0_i32_0 = arith.constant 0 : i32
    %c0_i32_1 = arith.constant 0 : i32
    return %c0_i32, %c0_i32_0 : i32, i32
  }
  func.func @transform_5(%arg0: i32) -> (i32, i32) {
    %c0_i32 = arith.constant 0 : i32
    %c0_i32_0 = arith.constant 0 : i32
    %c0_i32_1 = arith.constant 0 : i32
    return %c0_i32, %c0_i32_0 : i32, i32
  }
  func.func @transform_6(%arg0: i32) -> (i32, i32) {
    %c0_i32 = arith.constant 0 : i32
    %c0_i32_0 = arith.constant 0 : i32
    %c0_i32_1 = arith.constant 0 : i32
    return %c0_i32, %c0_i32_0 : i32, i32
  }
  func.func @transform_7(%arg0: i32) -> (i32, i32) {
    %c0_i32 = arith.constant 0 : i32
    %c0_i32_0 = arith.constant 0 : i32
    return %arg0, %c0_i32 : i32, i32
  }
}

module attributes {stable_mosaic.version = 11 : i64} {
  func.func @_self_attn_block_kernel(%arg0: i32, %arg1: memref<1x4x32xbf16, #tpu.memory_space<vmem>>, %arg2: memref<1x32xf32, #tpu.memory_space<vmem>>, %arg3: memref<1x32xf32, #tpu.memory_space<vmem>>, %arg4: memref<32x96xbf16, #tpu.memory_space<vmem>>, %arg5: memref<1x96xf32, #tpu.memory_space<vmem>>, %arg6: memref<32x32xbf16, #tpu.memory_space<vmem>>, %arg7: memref<1x32xf32, #tpu.memory_space<vmem>>, %arg8: memref<1x4x32xbf16, #tpu.memory_space<vmem>>) attributes {dimension_semantics = [#tpu.dimension_semantics<parallel>], iteration_bounds = array<i64: 2>, scalar_prefetch = 0 : i64, scratch_operands = 0 : i64, tpu.core_type = #tpu.core_type<tc>, window_params = [{transform_indices = @transform_0, window_bounds = array<i64: 1, 4, 32>}, {pipeline_mode = #tpu.pipeline_mode<synchronous>, transform_indices = @transform_1, window_bounds = array<i64: 1, 32>}, {pipeline_mode = #tpu.pipeline_mode<synchronous>, transform_indices = @transform_2, window_bounds = array<i64: 1, 32>}, {pipeline_mode = #tpu.pipeline_mode<synchronous>, transform_indices = @transform_3, window_bounds = array<i64: 32, 96>}, {pipeline_mode = #tpu.pipeline_mode<synchronous>, transform_indices = @transform_4, window_bounds = array<i64: 1, 96>}, {pipeline_mode = #tpu.pipeline_mode<synchronous>, transform_indices = @transform_5, window_bounds = array<i64: 32, 32>}, {pipeline_mode = #tpu.pipeline_mode<synchronous>, transform_indices = @transform_6, window_bounds = array<i64: 1, 32>}, {transform_indices = @transform_7, window_bounds = array<i64: 1, 4, 32>}]} {
    %c0 = arith.constant 0 : index
    %c0_0 = arith.constant 0 : index
    %c0_1 = arith.constant 0 : index
    %0 = vector.load %arg1[%c0, %c0_0, %c0_1] : memref<1x4x32xbf16, #tpu.memory_space<vmem>>, vector<1x4x32xbf16>
    %1 = vector.shape_cast %0 : vector<1x4x32xbf16> to vector<4x32xbf16>
    %2 = arith.extf %1 : vector<4x32xbf16> to vector<4x32xf32>
    %c0_2 = arith.constant 0 : index
    %c0_3 = arith.constant 0 : index
    %3 = vector.load %arg2[%c0_2, %c0_3] : memref<1x32xf32, #tpu.memory_space<vmem>>, vector<1x32xf32>
    %c0_4 = arith.constant 0 : index
    %c0_5 = arith.constant 0 : index
    %4 = vector.load %arg3[%c0_4, %c0_5] : memref<1x32xf32, #tpu.memory_space<vmem>>, vector<1x32xf32>
    %cst = arith.constant dense<0.000000e+00> : vector<4xf32>
    %5 = vector.multi_reduction <add>, %2, %cst [1] : vector<4x32xf32> to vector<4xf32>
    %6 = vector.shape_cast %5 : vector<4xf32> to vector<4x1xf32>
    %cst_6 = arith.constant 3.200000e+01 : f32
    %7 = vector.broadcast %cst_6 : f32 to vector<4x1xf32>
    %8 = arith.divf %6, %7 : vector<4x1xf32>
    %9 = vector.broadcast %8 : vector<4x1xf32> to vector<4x32xf32>
    %10 = arith.subf %2, %9 : vector<4x32xf32>
    %11 = arith.mulf %10, %10 : vector<4x32xf32>
    %cst_7 = arith.constant dense<0.000000e+00> : vector<4xf32>
    %12 = vector.multi_reduction <add>, %11, %cst_7 [1] : vector<4x32xf32> to vector<4xf32>
    %13 = vector.shape_cast %12 : vector<4xf32> to vector<4x1xf32>
    %cst_8 = arith.constant 3.200000e+01 : f32
    %14 = vector.broadcast %cst_8 : f32 to vector<4x1xf32>
    %15 = arith.divf %13, %14 : vector<4x1xf32>
    %cst_9 = arith.constant 9.99999974E-6 : f32
    %16 = vector.broadcast %cst_9 : f32 to vector<4x1xf32>
    %17 = arith.addf %15, %16 : vector<4x1xf32>
    %18 = math.rsqrt %17 : vector<4x1xf32>
    %19 = vector.broadcast %18 : vector<4x1xf32> to vector<4x32xf32>
    %20 = arith.mulf %10, %19 : vector<4x32xf32>
    %21 = vector.broadcast %3 : vector<1x32xf32> to vector<4x32xf32>
    %22 = arith.mulf %20, %21 : vector<4x32xf32>
    %23 = vector.broadcast %4 : vector<1x32xf32> to vector<4x32xf32>
    %24 = arith.addf %22, %23 : vector<4x32xf32>
    %25 = arith.truncf %24 : vector<4x32xf32> to vector<4x32xbf16>
    %c0_10 = arith.constant 0 : index
    %c0_11 = arith.constant 0 : index
    %26 = vector.load %arg4[%c0_10, %c0_11] : memref<32x96xbf16, #tpu.memory_space<vmem>>, vector<32x96xbf16>
    %cst_12 = arith.constant dense<0.000000e+00> : vector<4x96xf32>
    %27 = tpu.matmul %25, %26, %cst_12 {dimension_numbers = #tpu.dot_dimension_numbers<[1], [0], [0], [1], [0, 0, 1, 1], [], []>} : vector<4x32xbf16>, vector<32x96xbf16>, vector<4x96xf32> -> vector<4x96xf32>
    %c0_13 = arith.constant 0 : index
    %c0_14 = arith.constant 0 : index
    %28 = vector.load %arg5[%c0_13, %c0_14] : memref<1x96xf32, #tpu.memory_space<vmem>>, vector<1x96xf32>
    %29 = vector.broadcast %28 : vector<1x96xf32> to vector<4x96xf32>
    %30 = arith.addf %27, %29 : vector<4x96xf32>
    %31 = arith.truncf %30 : vector<4x96xf32> to vector<4x96xbf16>
    %c0_15 = arith.constant 0 : index
    %c0_16 = arith.constant 0 : index
    %32 = vector.load %arg6[%c0_15, %c0_16] : memref<32x32xbf16, #tpu.memory_space<vmem>>, vector<32x32xbf16>
    %c0_17 = arith.constant 0 : index
    %c0_18 = arith.constant 0 : index
    %33 = vector.load %arg7[%c0_17, %c0_18] : memref<1x32xf32, #tpu.memory_space<vmem>>, vector<1x32xf32>
    %34 = vector.extract_strided_slice %31 {offsets = [0, 0], sizes = [4, 8], strides = [1, 1]} : vector<4x96xbf16> to vector<4x8xbf16>
    %35 = vector.extract_strided_slice %31 {offsets = [0, 32], sizes = [4, 8], strides = [1, 1]} : vector<4x96xbf16> to vector<4x8xbf16>
    %36 = vector.extract_strided_slice %31 {offsets = [0, 64], sizes = [4, 8], strides = [1, 1]} : vector<4x96xbf16> to vector<4x8xbf16>
    %cst_19 = arith.constant dense<0.000000e+00> : vector<4x4xf32>
    %37 = tpu.matmul %34, %35, %cst_19 {dimension_numbers = #tpu.dot_dimension_numbers<[1], [1], [0], [0], [0, 0, 1, 0], [], []>} : vector<4x8xbf16>, vector<4x8xbf16>, vector<4x4xf32> -> vector<4x4xf32>
    %cst_20 = arith.constant 0.353553385 : f32
    %38 = vector.broadcast %cst_20 : f32 to vector<4x4xf32>
    %39 = arith.mulf %37, %38 : vector<4x4xf32>
    %cst_21 = arith.constant dense<0xFF800000> : vector<4xf32>
    %40 = vector.multi_reduction <maximumf>, %39, %cst_21 [1] : vector<4x4xf32> to vector<4xf32>
    %41 = vector.shape_cast %40 : vector<4xf32> to vector<4x1xf32>
    %42 = vector.broadcast %41 : vector<4x1xf32> to vector<4x4xf32>
    %43 = arith.subf %39, %42 : vector<4x4xf32>
    %44 = math.exp %43 : vector<4x4xf32>
    %cst_22 = arith.constant dense<0.000000e+00> : vector<4xf32>
    %45 = vector.multi_reduction <add>, %44, %cst_22 [1] : vector<4x4xf32> to vector<4xf32>
    %46 = vector.shape_cast %45 : vector<4xf32> to vector<4x1xf32>
    %47 = arith.truncf %44 : vector<4x4xf32> to vector<4x4xbf16>
    %cst_23 = arith.constant dense<0.000000e+00> : vector<4x8xf32>
    %48 = tpu.matmul %47, %36, %cst_23 {dimension_numbers = #tpu.dot_dimension_numbers<[1], [0], [0], [1], [0, 0, 1, 1], [], []>} : vector<4x4xbf16>, vector<4x8xbf16>, vector<4x8xf32> -> vector<4x8xf32>
    %49 = tpu.reciprocal %46 {approx = true} : vector<4x1xf32> -> vector<4x1xf32>
    %50 = vector.broadcast %49 : vector<4x1xf32> to vector<4x8xf32>
    %51 = arith.mulf %48, %50 : vector<4x8xf32>
    %52 = arith.truncf %51 : vector<4x8xf32> to vector<4x8xbf16>
    %53 = vector.extract_strided_slice %31 {offsets = [0, 8], sizes = [4, 8], strides = [1, 1]} : vector<4x96xbf16> to vector<4x8xbf16>
    %54 = vector.extract_strided_slice %31 {offsets = [0, 40], sizes = [4, 8], strides = [1, 1]} : vector<4x96xbf16> to vector<4x8xbf16>
    %55 = vector.extract_strided_slice %31 {offsets = [0, 72], sizes = [4, 8], strides = [1, 1]} : vector<4x96xbf16> to vector<4x8xbf16>
    %cst_24 = arith.constant dense<0.000000e+00> : vector<4x4xf32>
    %56 = tpu.matmul %53, %54, %cst_24 {dimension_numbers = #tpu.dot_dimension_numbers<[1], [1], [0], [0], [0, 0, 1, 0], [], []>} : vector<4x8xbf16>, vector<4x8xbf16>, vector<4x4xf32> -> vector<4x4xf32>
    %cst_25 = arith.constant 0.353553385 : f32
    %57 = vector.broadcast %cst_25 : f32 to vector<4x4xf32>
    %58 = arith.mulf %56, %57 : vector<4x4xf32>
    %cst_26 = arith.constant dense<0xFF800000> : vector<4xf32>
    %59 = vector.multi_reduction <maximumf>, %58, %cst_26 [1] : vector<4x4xf32> to vector<4xf32>
    %60 = vector.shape_cast %59 : vector<4xf32> to vector<4x1xf32>
    %61 = vector.broadcast %60 : vector<4x1xf32> to vector<4x4xf32>
    %62 = arith.subf %58, %61 : vector<4x4xf32>
    %63 = math.exp %62 : vector<4x4xf32>
    %cst_27 = arith.constant dense<0.000000e+00> : vector<4xf32>
    %64 = vector.multi_reduction <add>, %63, %cst_27 [1] : vector<4x4xf32> to vector<4xf32>
    %65 = vector.shape_cast %64 : vector<4xf32> to vector<4x1xf32>
    %66 = arith.truncf %63 : vector<4x4xf32> to vector<4x4xbf16>
    %cst_28 = arith.constant dense<0.000000e+00> : vector<4x8xf32>
    %67 = tpu.matmul %66, %55, %cst_28 {dimension_numbers = #tpu.dot_dimension_numbers<[1], [0], [0], [1], [0, 0, 1, 1], [], []>} : vector<4x4xbf16>, vector<4x8xbf16>, vector<4x8xf32> -> vector<4x8xf32>
    %68 = tpu.reciprocal %65 {approx = true} : vector<4x1xf32> -> vector<4x1xf32>
    %69 = vector.broadcast %68 : vector<4x1xf32> to vector<4x8xf32>
    %70 = arith.mulf %67, %69 : vector<4x8xf32>
    %71 = arith.truncf %70 : vector<4x8xf32> to vector<4x8xbf16>
    %72 = vector.extract_strided_slice %31 {offsets = [0, 16], sizes = [4, 8], strides = [1, 1]} : vector<4x96xbf16> to vector<4x8xbf16>
    %73 = vector.extract_strided_slice %31 {offsets = [0, 48], sizes = [4, 8], strides = [1, 1]} : vector<4x96xbf16> to vector<4x8xbf16>
    %74 = vector.extract_strided_slice %31 {offsets = [0, 80], sizes = [4, 8], strides = [1, 1]} : vector<4x96xbf16> to vector<4x8xbf16>
    %cst_29 = arith.constant dense<0.000000e+00> : vector<4x4xf32>
    %75 = tpu.matmul %72, %73, %cst_29 {dimension_numbers = #tpu.dot_dimension_numbers<[1], [1], [0], [0], [0, 0, 1, 0], [], []>} : vector<4x8xbf16>, vector<4x8xbf16>, vector<4x4xf32> -> vector<4x4xf32>
    %cst_30 = arith.constant 0.353553385 : f32
    %76 = vector.broadcast %cst_30 : f32 to vector<4x4xf32>
    %77 = arith.mulf %75, %76 : vector<4x4xf32>
    %cst_31 = arith.constant dense<0xFF800000> : vector<4xf32>
    %78 = vector.multi_reduction <maximumf>, %77, %cst_31 [1] : vector<4x4xf32> to vector<4xf32>
    %79 = vector.shape_cast %78 : vector<4xf32> to vector<4x1xf32>
    %80 = vector.broadcast %79 : vector<4x1xf32> to vector<4x4xf32>
    %81 = arith.subf %77, %80 : vector<4x4xf32>
    %82 = math.exp %81 : vector<4x4xf32>
    %cst_32 = arith.constant dense<0.000000e+00> : vector<4xf32>
    %83 = vector.multi_reduction <add>, %82, %cst_32 [1] : vector<4x4xf32> to vector<4xf32>
    %84 = vector.shape_cast %83 : vector<4xf32> to vector<4x1xf32>
    %85 = arith.truncf %82 : vector<4x4xf32> to vector<4x4xbf16>
    %cst_33 = arith.constant dense<0.000000e+00> : vector<4x8xf32>
    %86 = tpu.matmul %85, %74, %cst_33 {dimension_numbers = #tpu.dot_dimension_numbers<[1], [0], [0], [1], [0, 0, 1, 1], [], []>} : vector<4x4xbf16>, vector<4x8xbf16>, vector<4x8xf32> -> vector<4x8xf32>
    %87 = tpu.reciprocal %84 {approx = true} : vector<4x1xf32> -> vector<4x1xf32>
    %88 = vector.broadcast %87 : vector<4x1xf32> to vector<4x8xf32>
    %89 = arith.mulf %86, %88 : vector<4x8xf32>
    %90 = arith.truncf %89 : vector<4x8xf32> to vector<4x8xbf16>
    %91 = vector.extract_strided_slice %31 {offsets = [0, 24], sizes = [4, 8], strides = [1, 1]} : vector<4x96xbf16> to vector<4x8xbf16>
    %92 = vector.extract_strided_slice %31 {offsets = [0, 56], sizes = [4, 8], strides = [1, 1]} : vector<4x96xbf16> to vector<4x8xbf16>
    %93 = vector.extract_strided_slice %31 {offsets = [0, 88], sizes = [4, 8], strides = [1, 1]} : vector<4x96xbf16> to vector<4x8xbf16>
    %cst_34 = arith.constant dense<0.000000e+00> : vector<4x4xf32>
    %94 = tpu.matmul %91, %92, %cst_34 {dimension_numbers = #tpu.dot_dimension_numbers<[1], [1], [0], [0], [0, 0, 1, 0], [], []>} : vector<4x8xbf16>, vector<4x8xbf16>, vector<4x4xf32> -> vector<4x4xf32>
    %cst_35 = arith.constant 0.353553385 : f32
    %95 = vector.broadcast %cst_35 : f32 to vector<4x4xf32>
    %96 = arith.mulf %94, %95 : vector<4x4xf32>
    %cst_36 = arith.constant dense<0xFF800000> : vector<4xf32>
    %97 = vector.multi_reduction <maximumf>, %96, %cst_36 [1] : vector<4x4xf32> to vector<4xf32>
    %98 = vector.shape_cast %97 : vector<4xf32> to vector<4x1xf32>
    %99 = vector.broadcast %98 : vector<4x1xf32> to vector<4x4xf32>
    %100 = arith.subf %96, %99 : vector<4x4xf32>
    %101 = math.exp %100 : vector<4x4xf32>
    %cst_37 = arith.constant dense<0.000000e+00> : vector<4xf32>
    %102 = vector.multi_reduction <add>, %101, %cst_37 [1] : vector<4x4xf32> to vector<4xf32>
    %103 = vector.shape_cast %102 : vector<4xf32> to vector<4x1xf32>
    %104 = arith.truncf %101 : vector<4x4xf32> to vector<4x4xbf16>
    %cst_38 = arith.constant dense<0.000000e+00> : vector<4x8xf32>
    %105 = tpu.matmul %104, %93, %cst_38 {dimension_numbers = #tpu.dot_dimension_numbers<[1], [0], [0], [1], [0, 0, 1, 1], [], []>} : vector<4x4xbf16>, vector<4x8xbf16>, vector<4x8xf32> -> vector<4x8xf32>
    %106 = tpu.reciprocal %103 {approx = true} : vector<4x1xf32> -> vector<4x1xf32>
    %107 = vector.broadcast %106 : vector<4x1xf32> to vector<4x8xf32>
    %108 = arith.mulf %105, %107 : vector<4x8xf32>
    %109 = arith.truncf %108 : vector<4x8xf32> to vector<4x8xbf16>
    %110 = tpu.concatenate %52, %71, %90, %109 in 1 : vector<4x8xbf16>, vector<4x8xbf16>, vector<4x8xbf16>, vector<4x8xbf16> -> vector<4x32xbf16>
    %cst_39 = arith.constant dense<0.000000e+00> : vector<4x32xf32>
    %111 = tpu.matmul %110, %32, %cst_39 {dimension_numbers = #tpu.dot_dimension_numbers<[1], [0], [0], [1], [0, 0, 1, 1], [], []>} : vector<4x32xbf16>, vector<32x32xbf16>, vector<4x32xf32> -> vector<4x32xf32>
    %112 = vector.broadcast %33 : vector<1x32xf32> to vector<4x32xf32>
    %113 = arith.addf %111, %112 : vector<4x32xf32>
    %114 = arith.addf %2, %113 : vector<4x32xf32>
    %115 = arith.truncf %114 : vector<4x32xf32> to vector<4x32xbf16>
    %c0_40 = arith.constant 0 : index
    %c0_41 = arith.constant 0 : index
    %c0_42 = arith.constant 0 : index
    %116 = vector.load %arg8[%c0_40, %c0_41, %c0_42] : memref<1x4x32xbf16, #tpu.memory_space<vmem>>, vector<1x4x32xbf16>
    %117 = vector.shape_cast %116 : vector<1x4x32xbf16> to vector<4x32xbf16>
    %118 = vector.shape_cast %115 : vector<4x32xbf16> to vector<1x4x32xbf16>
    tpu.vector_store %arg8[%c0_40, %c0_41, %c0_42], %118 {strides = array<i32>} : memref<1x4x32xbf16, #tpu.memory_space<vmem>>, vector<1x4x32xbf16>,
    return
  }
  func.func @transform_0(%arg0: i32) -> (i32, i32, i32) {
    %c0_i32 = arith.constant 0 : i32
    %c0_i32_0 = arith.constant 0 : i32
    %c0_i32_1 = arith.constant 0 : i32
    return %arg0, %c0_i32, %c0_i32_0 : i32, i32, i32
  }
  func.func @transform_1(%arg0: i32) -> (i32, i32) {
    %c0_i32 = arith.constant 0 : i32
    %c0_i32_0 = arith.constant 0 : i32
    %c0_i32_1 = arith.constant 0 : i32
    return %c0_i32, %c0_i32_0 : i32, i32
  }
  func.func @transform_2(%arg0: i32) -> (i32, i32) {
    %c0_i32 = arith.constant 0 : i32
    %c0_i32_0 = arith.constant 0 : i32
    %c0_i32_1 = arith.constant 0 : i32
    return %c0_i32, %c0_i32_0 : i32, i32
  }
  func.func @transform_3(%arg0: i32) -> (i32, i32) {
    %c0_i32 = arith.constant 0 : i32
    %c0_i32_0 = arith.constant 0 : i32
    %c0_i32_1 = arith.constant 0 : i32
    return %c0_i32, %c0_i32_0 : i32, i32
  }
  func.func @transform_4(%arg0: i32) -> (i32, i32) {
    %c0_i32 = arith.constant 0 : i32
    %c0_i32_0 = arith.constant 0 : i32
    %c0_i32_1 = arith.constant 0 : i32
    return %c0_i32, %c0_i32_0 : i32, i32
  }
  func.func @transform_5(%arg0: i32) -> (i32, i32) {
    %c0_i32 = arith.constant 0 : i32
    %c0_i32_0 = arith.constant 0 : i32
    %c0_i32_1 = arith.constant 0 : i32
    return %c0_i32, %c0_i32_0 : i32, i32
  }
  func.func @transform_6(%arg0: i32) -> (i32, i32) {
    %c0_i32 = arith.constant 0 : i32
    %c0_i32_0 = arith.constant 0 : i32
    %c0_i32_1 = arith.constant 0 : i32
    return %c0_i32, %c0_i32_0 : i32, i32
  }
  func.func @transform_7(%arg0: i32) -> (i32, i32, i32) {
    %c0_i32 = arith.constant 0 : i32
    %c0_i32_0 = arith.constant 0 : i32
    %c0_i32_1 = arith.constant 0 : i32
    return %arg0, %c0_i32, %c0_i32_0 : i32, i32, i32
  }
}

module attributes {stable_mosaic.version = 11 : i64} {
  func.func @_patch_embed_kernel(%arg0: i32, %arg1: memref<1x4x192xbf16, #tpu.memory_space<vmem>>, %arg2: memref<192x32xbf16, #tpu.memory_space<vmem>>, %arg3: memref<1x32xf32, #tpu.memory_space<vmem>>, %arg4: memref<4x32xf32, #tpu.memory_space<vmem>>, %arg5: memref<1x4x32xbf16, #tpu.memory_space<vmem>>) attributes {dimension_semantics = [#tpu.dimension_semantics<parallel>], iteration_bounds = array<i64: 2>, scalar_prefetch = 0 : i64, scratch_operands = 0 : i64, tpu.core_type = #tpu.core_type<tc>, window_params = [{transform_indices = @transform_0, window_bounds = array<i64: 1, 4, 192>}, {pipeline_mode = #tpu.pipeline_mode<synchronous>, transform_indices = @transform_1, window_bounds = array<i64: 192, 32>}, {pipeline_mode = #tpu.pipeline_mode<synchronous>, transform_indices = @transform_2, window_bounds = array<i64: 1, 32>}, {pipeline_mode = #tpu.pipeline_mode<synchronous>, transform_indices = @transform_3, window_bounds = array<i64: 4, 32>}, {transform_indices = @transform_4, window_bounds = array<i64: 1, 4, 32>}]} {
    %c0 = arith.constant 0 : index
    %c0_0 = arith.constant 0 : index
    %c0_1 = arith.constant 0 : index
    %0 = vector.load %arg1[%c0, %c0_0, %c0_1] : memref<1x4x192xbf16, #tpu.memory_space<vmem>>, vector<1x4x192xbf16>
    %1 = vector.shape_cast %0 : vector<1x4x192xbf16> to vector<4x192xbf16>
    %c0_2 = arith.constant 0 : index
    %c0_3 = arith.constant 0 : index
    %2 = vector.load %arg2[%c0_2, %c0_3] : memref<192x32xbf16, #tpu.memory_space<vmem>>, vector<192x32xbf16>
    %cst = arith.constant dense<0.000000e+00> : vector<4x32xf32>
    %3 = tpu.matmul %1, %2, %cst {dimension_numbers = #tpu.dot_dimension_numbers<[1], [0], [0], [1], [0, 0, 1, 1], [], []>} : vector<4x192xbf16>, vector<192x32xbf16>, vector<4x32xf32> -> vector<4x32xf32>
    %c0_4 = arith.constant 0 : index
    %c0_5 = arith.constant 0 : index
    %4 = vector.load %arg3[%c0_4, %c0_5] : memref<1x32xf32, #tpu.memory_space<vmem>>, vector<1x32xf32>
    %5 = vector.broadcast %4 : vector<1x32xf32> to vector<4x32xf32>
    %6 = arith.addf %3, %5 : vector<4x32xf32>
    %c0_6 = arith.constant 0 : index
    %c0_7 = arith.constant 0 : index
    %7 = vector.load %arg4[%c0_6, %c0_7] : memref<4x32xf32, #tpu.memory_space<vmem>>, vector<4x32xf32>
    %8 = arith.addf %6, %7 : vector<4x32xf32>
    %9 = arith.truncf %8 : vector<4x32xf32> to vector<4x32xbf16>
    %c0_8 = arith.constant 0 : index
    %c0_9 = arith.constant 0 : index
    %c0_10 = arith.constant 0 : index
    %10 = vector.load %arg5[%c0_8, %c0_9, %c0_10] : memref<1x4x32xbf16, #tpu.memory_space<vmem>>, vector<1x4x32xbf16>
    %11 = vector.shape_cast %10 : vector<1x4x32xbf16> to vector<4x32xbf16>
    %12 = vector.shape_cast %9 : vector<4x32xbf16> to vector<1x4x32xbf16>
    tpu.vector_store %arg5[%c0_8, %c0_9, %c0_10], %12 {strides = array<i32>} : memref<1x4x32xbf16, #tpu.memory_space<vmem>>, vector<1x4x32xbf16>,
    return
  }
  func.func @transform_0(%arg0: i32) -> (i32, i32, i32) {
    %c0_i32 = arith.constant 0 : i32
    %c0_i32_0 = arith.constant 0 : i32
    %c0_i32_1 = arith.constant 0 : i32
    return %arg0, %c0_i32, %c0_i32_0 : i32, i32, i32
  }
  func.func @transform_1(%arg0: i32) -> (i32, i32) {
    %c0_i32 = arith.constant 0 : i32
    %c0_i32_0 = arith.constant 0 : i32
    %c0_i32_1 = arith.constant 0 : i32
    return %c0_i32, %c0_i32_0 : i32, i32
  }
  func.func @transform_2(%arg0: i32) -> (i32, i32) {
    %c0_i32 = arith.constant 0 : i32
    %c0_i32_0 = arith.constant 0 : i32
    %c0_i32_1 = arith.constant 0 : i32
    return %c0_i32, %c0_i32_0 : i32, i32
  }
  func.func @transform_3(%arg0: i32) -> (i32, i32) {
    %c0_i32 = arith.constant 0 : i32
    %c0_i32_0 = arith.constant 0 : i32
    %c0_i32_1 = arith.constant 0 : i32
    return %c0_i32, %c0_i32_0 : i32, i32
  }
  func.func @transform_4(%arg0: i32) -> (i32, i32, i32) {
    %c0_i32 = arith.constant 0 : i32
    %c0_i32_0 = arith.constant 0 : i32
    %c0_i32_1 = arith.constant 0 : i32
    return %arg0, %c0_i32, %c0_i32_0 : i32, i32, i32
  }
}

module attributes {stable_mosaic.version = 11 : i64} {
  func.func @_mlp_block_kernel(%arg0: i32, %arg1: memref<8x32xbf16, #tpu.memory_space<vmem>>, %arg2: memref<1x32xf32, #tpu.memory_space<vmem>>, %arg3: memref<1x32xf32, #tpu.memory_space<vmem>>, %arg4: memref<32x128xbf16, #tpu.memory_space<vmem>>, %arg5: memref<1x128xf32, #tpu.memory_space<vmem>>, %arg6: memref<128x32xbf16, #tpu.memory_space<vmem>>, %arg7: memref<1x32xf32, #tpu.memory_space<vmem>>, %arg8: memref<1x32xf32, #tpu.memory_space<vmem>>, %arg9: memref<1x32xf32, #tpu.memory_space<vmem>>, %arg10: memref<8x32xf32, #tpu.memory_space<vmem>>) attributes {dimension_semantics = [#tpu.dimension_semantics<parallel>], iteration_bounds = array<i64: 1>, scalar_prefetch = 0 : i64, scratch_operands = 0 : i64, tpu.core_type = #tpu.core_type<tc>, window_params = [{transform_indices = @transform_0, window_bounds = array<i64: 8, 32>}, {pipeline_mode = #tpu.pipeline_mode<synchronous>, transform_indices = @transform_1, window_bounds = array<i64: 1, 32>}, {pipeline_mode = #tpu.pipeline_mode<synchronous>, transform_indices = @transform_2, window_bounds = array<i64: 1, 32>}, {pipeline_mode = #tpu.pipeline_mode<synchronous>, transform_indices = @transform_3, window_bounds = array<i64: 32, 128>}, {pipeline_mode = #tpu.pipeline_mode<synchronous>, transform_indices = @transform_4, window_bounds = array<i64: 1, 128>}, {pipeline_mode = #tpu.pipeline_mode<synchronous>, transform_indices = @transform_5, window_bounds = array<i64: 128, 32>}, {pipeline_mode = #tpu.pipeline_mode<synchronous>, transform_indices = @transform_6, window_bounds = array<i64: 1, 32>}, {pipeline_mode = #tpu.pipeline_mode<synchronous>, transform_indices = @transform_7, window_bounds = array<i64: 1, 32>}, {pipeline_mode = #tpu.pipeline_mode<synchronous>, transform_indices = @transform_8, window_bounds = array<i64: 1, 32>}, {transform_indices = @transform_9, window_bounds = array<i64: 8, 32>}]} {
    %c0 = arith.constant 0 : index
    %c0_0 = arith.constant 0 : index
    %0 = vector.load %arg1[%c0, %c0_0] : memref<8x32xbf16, #tpu.memory_space<vmem>>, vector<8x32xbf16>
    %1 = arith.extf %0 : vector<8x32xbf16> to vector<8x32xf32>
    %c0_1 = arith.constant 0 : index
    %c0_2 = arith.constant 0 : index
    %2 = vector.load %arg2[%c0_1, %c0_2] : memref<1x32xf32, #tpu.memory_space<vmem>>, vector<1x32xf32>
    %c0_3 = arith.constant 0 : index
    %c0_4 = arith.constant 0 : index
    %3 = vector.load %arg3[%c0_3, %c0_4] : memref<1x32xf32, #tpu.memory_space<vmem>>, vector<1x32xf32>
    %cst = arith.constant dense<0.000000e+00> : vector<8xf32>
    %4 = vector.multi_reduction <add>, %1, %cst [1] : vector<8x32xf32> to vector<8xf32>
    %5 = vector.shape_cast %4 : vector<8xf32> to vector<8x1xf32>
    %cst_5 = arith.constant 3.200000e+01 : f32
    %6 = vector.broadcast %cst_5 : f32 to vector<8x1xf32>
    %7 = arith.divf %5, %6 : vector<8x1xf32>
    %8 = vector.broadcast %7 : vector<8x1xf32> to vector<8x32xf32>
    %9 = arith.subf %1, %8 : vector<8x32xf32>
    %10 = arith.mulf %9, %9 : vector<8x32xf32>
    %cst_6 = arith.constant dense<0.000000e+00> : vector<8xf32>
    %11 = vector.multi_reduction <add>, %10, %cst_6 [1] : vector<8x32xf32> to vector<8xf32>
    %12 = vector.shape_cast %11 : vector<8xf32> to vector<8x1xf32>
    %cst_7 = arith.constant 3.200000e+01 : f32
    %13 = vector.broadcast %cst_7 : f32 to vector<8x1xf32>
    %14 = arith.divf %12, %13 : vector<8x1xf32>
    %cst_8 = arith.constant 9.99999974E-6 : f32
    %15 = vector.broadcast %cst_8 : f32 to vector<8x1xf32>
    %16 = arith.addf %14, %15 : vector<8x1xf32>
    %17 = math.rsqrt %16 : vector<8x1xf32>
    %18 = vector.broadcast %17 : vector<8x1xf32> to vector<8x32xf32>
    %19 = arith.mulf %9, %18 : vector<8x32xf32>
    %20 = vector.broadcast %2 : vector<1x32xf32> to vector<8x32xf32>
    %21 = arith.mulf %19, %20 : vector<8x32xf32>
    %22 = vector.broadcast %3 : vector<1x32xf32> to vector<8x32xf32>
    %23 = arith.addf %21, %22 : vector<8x32xf32>
    %24 = arith.truncf %23 : vector<8x32xf32> to vector<8x32xbf16>
    %c0_9 = arith.constant 0 : index
    %c0_10 = arith.constant 0 : index
    %25 = vector.load %arg4[%c0_9, %c0_10] : memref<32x128xbf16, #tpu.memory_space<vmem>>, vector<32x128xbf16>
    %cst_11 = arith.constant dense<0.000000e+00> : vector<8x128xf32>
    %26 = tpu.matmul %24, %25, %cst_11 {dimension_numbers = #tpu.dot_dimension_numbers<[1], [0], [0], [1], [0, 0, 1, 1], [], []>} : vector<8x32xbf16>, vector<32x128xbf16>, vector<8x128xf32> -> vector<8x128xf32>
    %c0_12 = arith.constant 0 : index
    %c0_13 = arith.constant 0 : index
    %27 = vector.load %arg5[%c0_12, %c0_13] : memref<1x128xf32, #tpu.memory_space<vmem>>, vector<1x128xf32>
    %28 = vector.broadcast %27 : vector<1x128xf32> to vector<8x128xf32>
    %29 = arith.addf %26, %28 : vector<8x128xf32>
    %30 = arith.mulf %29, %29 : vector<8x128xf32>
    %31 = arith.mulf %29, %30 : vector<8x128xf32>
    %cst_14 = arith.constant 4.471500e-02 : f32
    %32 = vector.broadcast %cst_14 : f32 to vector<8x128xf32>
    %33 = arith.mulf %32, %31 : vector<8x128xf32>
    %34 = arith.addf %29, %33 : vector<8x128xf32>
    %cst_15 = arith.constant 0.797884583 : f32
    %35 = vector.broadcast %cst_15 : f32 to vector<8x128xf32>
    %36 = arith.mulf %35, %34 : vector<8x128xf32>
    %37 = math.tanh %36 : vector<8x128xf32>
    %cst_16 = arith.constant 1.000000e+00 : f32
    %38 = vector.broadcast %cst_16 : f32 to vector<8x128xf32>
    %39 = arith.addf %38, %37 : vector<8x128xf32>
    %cst_17 = arith.constant 5.000000e-01 : f32
    %40 = vector.broadcast %cst_17 : f32 to vector<8x128xf32>
    %41 = arith.mulf %40, %39 : vector<8x128xf32>
    %42 = arith.mulf %29, %41 : vector<8x128xf32>
    %43 = arith.truncf %42 : vector<8x128xf32> to vector<8x128xbf16>
    %c0_18 = arith.constant 0 : index
    %c0_19 = arith.constant 0 : index
    %44 = vector.load %arg6[%c0_18, %c0_19] : memref<128x32xbf16, #tpu.memory_space<vmem>>, vector<128x32xbf16>
    %cst_20 = arith.constant dense<0.000000e+00> : vector<8x32xf32>
    %45 = tpu.matmul %43, %44, %cst_20 {dimension_numbers = #tpu.dot_dimension_numbers<[1], [0], [0], [1], [0, 0, 1, 1], [], []>} : vector<8x128xbf16>, vector<128x32xbf16>, vector<8x32xf32> -> vector<8x32xf32>
    %c0_21 = arith.constant 0 : index
    %c0_22 = arith.constant 0 : index
    %46 = vector.load %arg7[%c0_21, %c0_22] : memref<1x32xf32, #tpu.memory_space<vmem>>, vector<1x32xf32>
    %47 = vector.broadcast %46 : vector<1x32xf32> to vector<8x32xf32>
    %48 = arith.addf %45, %47 : vector<8x32xf32>
    %49 = arith.addf %1, %48 : vector<8x32xf32>
    %c0_23 = arith.constant 0 : index
    %c0_24 = arith.constant 0 : index
    %50 = vector.load %arg8[%c0_23, %c0_24] : memref<1x32xf32, #tpu.memory_space<vmem>>, vector<1x32xf32>
    %c0_25 = arith.constant 0 : index
    %c0_26 = arith.constant 0 : index
    %51 = vector.load %arg9[%c0_25, %c0_26] : memref<1x32xf32, #tpu.memory_space<vmem>>, vector<1x32xf32>
    %cst_27 = arith.constant dense<0.000000e+00> : vector<8xf32>
    %52 = vector.multi_reduction <add>, %49, %cst_27 [1] : vector<8x32xf32> to vector<8xf32>
    %53 = vector.shape_cast %52 : vector<8xf32> to vector<8x1xf32>
    %cst_28 = arith.constant 3.200000e+01 : f32
    %54 = vector.broadcast %cst_28 : f32 to vector<8x1xf32>
    %55 = arith.divf %53, %54 : vector<8x1xf32>
    %56 = vector.broadcast %55 : vector<8x1xf32> to vector<8x32xf32>
    %57 = arith.subf %49, %56 : vector<8x32xf32>
    %58 = arith.mulf %57, %57 : vector<8x32xf32>
    %cst_29 = arith.constant dense<0.000000e+00> : vector<8xf32>
    %59 = vector.multi_reduction <add>, %58, %cst_29 [1] : vector<8x32xf32> to vector<8xf32>
    %60 = vector.shape_cast %59 : vector<8xf32> to vector<8x1xf32>
    %cst_30 = arith.constant 3.200000e+01 : f32
    %61 = vector.broadcast %cst_30 : f32 to vector<8x1xf32>
    %62 = arith.divf %60, %61 : vector<8x1xf32>
    %cst_31 = arith.constant 9.99999974E-6 : f32
    %63 = vector.broadcast %cst_31 : f32 to vector<8x1xf32>
    %64 = arith.addf %62, %63 : vector<8x1xf32>
    %65 = math.rsqrt %64 : vector<8x1xf32>
    %66 = vector.broadcast %65 : vector<8x1xf32> to vector<8x32xf32>
    %67 = arith.mulf %57, %66 : vector<8x32xf32>
    %68 = vector.broadcast %50 : vector<1x32xf32> to vector<8x32xf32>
    %69 = arith.mulf %67, %68 : vector<8x32xf32>
    %70 = vector.broadcast %51 : vector<1x32xf32> to vector<8x32xf32>
    %71 = arith.addf %69, %70 : vector<8x32xf32>
    %c0_32 = arith.constant 0 : index
    %c0_33 = arith.constant 0 : index
    %72 = vector.load %arg10[%c0_32, %c0_33] : memref<8x32xf32, #tpu.memory_space<vmem>>, vector<8x32xf32>
    tpu.vector_store %arg10[%c0_32, %c0_33], %71 {strides = array<i32>} : memref<8x32xf32, #tpu.memory_space<vmem>>, vector<8x32xf32>,
    return
  }
  func.func @transform_0(%arg0: i32) -> (i32, i32) {
    %c0_i32 = arith.constant 0 : i32
    %c0_i32_0 = arith.constant 0 : i32
    return %arg0, %c0_i32 : i32, i32
  }
  func.func @transform_1(%arg0: i32) -> (i32, i32) {
    %c0_i32 = arith.constant 0 : i32
    %c0_i32_0 = arith.constant 0 : i32
    %c0_i32_1 = arith.constant 0 : i32
    return %c0_i32, %c0_i32_0 : i32, i32
  }
  func.func @transform_2(%arg0: i32) -> (i32, i32) {
    %c0_i32 = arith.constant 0 : i32
    %c0_i32_0 = arith.constant 0 : i32
    %c0_i32_1 = arith.constant 0 : i32
    return %c0_i32, %c0_i32_0 : i32, i32
  }
  func.func @transform_3(%arg0: i32) -> (i32, i32) {
    %c0_i32 = arith.constant 0 : i32
    %c0_i32_0 = arith.constant 0 : i32
    %c0_i32_1 = arith.constant 0 : i32
    return %c0_i32, %c0_i32_0 : i32, i32
  }
  func.func @transform_4(%arg0: i32) -> (i32, i32) {
    %c0_i32 = arith.constant 0 : i32
    %c0_i32_0 = arith.constant 0 : i32
    %c0_i32_1 = arith.constant 0 : i32
    return %c0_i32, %c0_i32_0 : i32, i32
  }
  func.func @transform_5(%arg0: i32) -> (i32, i32) {
    %c0_i32 = arith.constant 0 : i32
    %c0_i32_0 = arith.constant 0 : i32
    %c0_i32_1 = arith.constant 0 : i32
    return %c0_i32, %c0_i32_0 : i32, i32
  }
  func.func @transform_6(%arg0: i32) -> (i32, i32) {
    %c0_i32 = arith.constant 0 : i32
    %c0_i32_0 = arith.constant 0 : i32
    %c0_i32_1 = arith.constant 0 : i32
    return %c0_i32, %c0_i32_0 : i32, i32
  }
  func.func @transform_7(%arg0: i32) -> (i32, i32) {
    %c0_i32 = arith.constant 0 : i32
    %c0_i32_0 = arith.constant 0 : i32
    %c0_i32_1 = arith.constant 0 : i32
    return %c0_i32, %c0_i32_0 : i32, i32
  }
  func.func @transform_8(%arg0: i32) -> (i32, i32) {
    %c0_i32 = arith.constant 0 : i32
    %c0_i32_0 = arith.constant 0 : i32
    %c0_i32_1 = arith.constant 0 : i32
    return %c0_i32, %c0_i32_0 : i32, i32
  }
  func.func @transform_9(%arg0: i32) -> (i32, i32) {
    %c0_i32 = arith.constant 0 : i32
    %c0_i32_0 = arith.constant 0 : i32
    return %arg0, %c0_i32 : i32, i32
  }
}

module attributes {stable_mosaic.version = 11 : i64} {
  func.func @_self_attn_block_kernel(%arg0: i32, %arg1: memref<1x8x32xbf16, #tpu.memory_space<vmem>>, %arg2: memref<1x32xf32, #tpu.memory_space<vmem>>, %arg3: memref<1x32xf32, #tpu.memory_space<vmem>>, %arg4: memref<32x96xbf16, #tpu.memory_space<vmem>>, %arg5: memref<1x96xf32, #tpu.memory_space<vmem>>, %arg6: memref<32x32xbf16, #tpu.memory_space<vmem>>, %arg7: memref<1x32xf32, #tpu.memory_space<vmem>>, %arg8: memref<1x8x32xbf16, #tpu.memory_space<vmem>>) attributes {dimension_semantics = [#tpu.dimension_semantics<parallel>], iteration_bounds = array<i64: 2>, scalar_prefetch = 0 : i64, scratch_operands = 0 : i64, tpu.core_type = #tpu.core_type<tc>, window_params = [{transform_indices = @transform_0, window_bounds = array<i64: 1, 8, 32>}, {pipeline_mode = #tpu.pipeline_mode<synchronous>, transform_indices = @transform_1, window_bounds = array<i64: 1, 32>}, {pipeline_mode = #tpu.pipeline_mode<synchronous>, transform_indices = @transform_2, window_bounds = array<i64: 1, 32>}, {pipeline_mode = #tpu.pipeline_mode<synchronous>, transform_indices = @transform_3, window_bounds = array<i64: 32, 96>}, {pipeline_mode = #tpu.pipeline_mode<synchronous>, transform_indices = @transform_4, window_bounds = array<i64: 1, 96>}, {pipeline_mode = #tpu.pipeline_mode<synchronous>, transform_indices = @transform_5, window_bounds = array<i64: 32, 32>}, {pipeline_mode = #tpu.pipeline_mode<synchronous>, transform_indices = @transform_6, window_bounds = array<i64: 1, 32>}, {transform_indices = @transform_7, window_bounds = array<i64: 1, 8, 32>}]} {
    %c0 = arith.constant 0 : index
    %c0_0 = arith.constant 0 : index
    %c0_1 = arith.constant 0 : index
    %0 = vector.load %arg1[%c0, %c0_0, %c0_1] : memref<1x8x32xbf16, #tpu.memory_space<vmem>>, vector<1x8x32xbf16>
    %1 = vector.shape_cast %0 : vector<1x8x32xbf16> to vector<8x32xbf16>
    %2 = arith.extf %1 : vector<8x32xbf16> to vector<8x32xf32>
    %c0_2 = arith.constant 0 : index
    %c0_3 = arith.constant 0 : index
    %3 = vector.load %arg2[%c0_2, %c0_3] : memref<1x32xf32, #tpu.memory_space<vmem>>, vector<1x32xf32>
    %c0_4 = arith.constant 0 : index
    %c0_5 = arith.constant 0 : index
    %4 = vector.load %arg3[%c0_4, %c0_5] : memref<1x32xf32, #tpu.memory_space<vmem>>, vector<1x32xf32>
    %cst = arith.constant dense<0.000000e+00> : vector<8xf32>
    %5 = vector.multi_reduction <add>, %2, %cst [1] : vector<8x32xf32> to vector<8xf32>
    %6 = vector.shape_cast %5 : vector<8xf32> to vector<8x1xf32>
    %cst_6 = arith.constant 3.200000e+01 : f32
    %7 = vector.broadcast %cst_6 : f32 to vector<8x1xf32>
    %8 = arith.divf %6, %7 : vector<8x1xf32>
    %9 = vector.broadcast %8 : vector<8x1xf32> to vector<8x32xf32>
    %10 = arith.subf %2, %9 : vector<8x32xf32>
    %11 = arith.mulf %10, %10 : vector<8x32xf32>
    %cst_7 = arith.constant dense<0.000000e+00> : vector<8xf32>
    %12 = vector.multi_reduction <add>, %11, %cst_7 [1] : vector<8x32xf32> to vector<8xf32>
    %13 = vector.shape_cast %12 : vector<8xf32> to vector<8x1xf32>
    %cst_8 = arith.constant 3.200000e+01 : f32
    %14 = vector.broadcast %cst_8 : f32 to vector<8x1xf32>
    %15 = arith.divf %13, %14 : vector<8x1xf32>
    %cst_9 = arith.constant 9.99999974E-6 : f32
    %16 = vector.broadcast %cst_9 : f32 to vector<8x1xf32>
    %17 = arith.addf %15, %16 : vector<8x1xf32>
    %18 = math.rsqrt %17 : vector<8x1xf32>
    %19 = vector.broadcast %18 : vector<8x1xf32> to vector<8x32xf32>
    %20 = arith.mulf %10, %19 : vector<8x32xf32>
    %21 = vector.broadcast %3 : vector<1x32xf32> to vector<8x32xf32>
    %22 = arith.mulf %20, %21 : vector<8x32xf32>
    %23 = vector.broadcast %4 : vector<1x32xf32> to vector<8x32xf32>
    %24 = arith.addf %22, %23 : vector<8x32xf32>
    %25 = arith.truncf %24 : vector<8x32xf32> to vector<8x32xbf16>
    %c0_10 = arith.constant 0 : index
    %c0_11 = arith.constant 0 : index
    %26 = vector.load %arg4[%c0_10, %c0_11] : memref<32x96xbf16, #tpu.memory_space<vmem>>, vector<32x96xbf16>
    %cst_12 = arith.constant dense<0.000000e+00> : vector<8x96xf32>
    %27 = tpu.matmul %25, %26, %cst_12 {dimension_numbers = #tpu.dot_dimension_numbers<[1], [0], [0], [1], [0, 0, 1, 1], [], []>} : vector<8x32xbf16>, vector<32x96xbf16>, vector<8x96xf32> -> vector<8x96xf32>
    %c0_13 = arith.constant 0 : index
    %c0_14 = arith.constant 0 : index
    %28 = vector.load %arg5[%c0_13, %c0_14] : memref<1x96xf32, #tpu.memory_space<vmem>>, vector<1x96xf32>
    %29 = vector.broadcast %28 : vector<1x96xf32> to vector<8x96xf32>
    %30 = arith.addf %27, %29 : vector<8x96xf32>
    %31 = arith.truncf %30 : vector<8x96xf32> to vector<8x96xbf16>
    %32 = tpu.iota {dimensions = array<i32: 0>} : vector<8x8xi32>
    %33 = tpu.iota {dimensions = array<i32: 1>} : vector<8x8xi32>
    %34 = arith.cmpi sle, %33, %32 : vector<8x8xi32>
    %cst_15 = arith.constant 0.000000e+00 : f32
    %cst_16 = arith.constant -1.000000e+30 : f32
    %35 = vector.broadcast %cst_15 : f32 to vector<8x8xf32>
    %36 = vector.broadcast %cst_16 : f32 to vector<8x8xf32>
    %37 = arith.select %34, %35, %36 : vector<8x8xi1>, vector<8x8xf32>
    %c0_17 = arith.constant 0 : index
    %c0_18 = arith.constant 0 : index
    %38 = vector.load %arg6[%c0_17, %c0_18] : memref<32x32xbf16, #tpu.memory_space<vmem>>, vector<32x32xbf16>
    %c0_19 = arith.constant 0 : index
    %c0_20 = arith.constant 0 : index
    %39 = vector.load %arg7[%c0_19, %c0_20] : memref<1x32xf32, #tpu.memory_space<vmem>>, vector<1x32xf32>
    %40 = vector.extract_strided_slice %31 {offsets = [0, 0], sizes = [8, 8], strides = [1, 1]} : vector<8x96xbf16> to vector<8x8xbf16>
    %41 = vector.extract_strided_slice %31 {offsets = [0, 32], sizes = [8, 8], strides = [1, 1]} : vector<8x96xbf16> to vector<8x8xbf16>
    %42 = vector.extract_strided_slice %31 {offsets = [0, 64], sizes = [8, 8], strides = [1, 1]} : vector<8x96xbf16> to vector<8x8xbf16>
    %cst_21 = arith.constant dense<0.000000e+00> : vector<8x8xf32>
    %43 = tpu.matmul %40, %41, %cst_21 {dimension_numbers = #tpu.dot_dimension_numbers<[1], [1], [0], [0], [0, 0, 1, 0], [], []>} : vector<8x8xbf16>, vector<8x8xbf16>, vector<8x8xf32> -> vector<8x8xf32>
    %cst_22 = arith.constant 0.353553385 : f32
    %44 = vector.broadcast %cst_22 : f32 to vector<8x8xf32>
    %45 = arith.mulf %43, %44 : vector<8x8xf32>
    %46 = arith.addf %45, %37 : vector<8x8xf32>
    %cst_23 = arith.constant dense<0xFF800000> : vector<8xf32>
    %47 = vector.multi_reduction <maximumf>, %46, %cst_23 [1] : vector<8x8xf32> to vector<8xf32>
    %48 = vector.shape_cast %47 : vector<8xf32> to vector<8x1xf32>
    %49 = vector.broadcast %48 : vector<8x1xf32> to vector<8x8xf32>
    %50 = arith.subf %46, %49 : vector<8x8xf32>
    %51 = math.exp %50 : vector<8x8xf32>
    %cst_24 = arith.constant dense<0.000000e+00> : vector<8xf32>
    %52 = vector.multi_reduction <add>, %51, %cst_24 [1] : vector<8x8xf32> to vector<8xf32>
    %53 = vector.shape_cast %52 : vector<8xf32> to vector<8x1xf32>
    %54 = arith.truncf %51 : vector<8x8xf32> to vector<8x8xbf16>
    %cst_25 = arith.constant dense<0.000000e+00> : vector<8x8xf32>
    %55 = tpu.matmul %54, %42, %cst_25 {dimension_numbers = #tpu.dot_dimension_numbers<[1], [0], [0], [1], [0, 0, 1, 1], [], []>} : vector<8x8xbf16>, vector<8x8xbf16>, vector<8x8xf32> -> vector<8x8xf32>
    %56 = tpu.reciprocal %53 {approx = true} : vector<8x1xf32> -> vector<8x1xf32>
    %57 = vector.broadcast %56 : vector<8x1xf32> to vector<8x8xf32>
    %58 = arith.mulf %55, %57 : vector<8x8xf32>
    %59 = arith.truncf %58 : vector<8x8xf32> to vector<8x8xbf16>
    %60 = vector.extract_strided_slice %31 {offsets = [0, 8], sizes = [8, 8], strides = [1, 1]} : vector<8x96xbf16> to vector<8x8xbf16>
    %61 = vector.extract_strided_slice %31 {offsets = [0, 40], sizes = [8, 8], strides = [1, 1]} : vector<8x96xbf16> to vector<8x8xbf16>
    %62 = vector.extract_strided_slice %31 {offsets = [0, 72], sizes = [8, 8], strides = [1, 1]} : vector<8x96xbf16> to vector<8x8xbf16>
    %cst_26 = arith.constant dense<0.000000e+00> : vector<8x8xf32>
    %63 = tpu.matmul %60, %61, %cst_26 {dimension_numbers = #tpu.dot_dimension_numbers<[1], [1], [0], [0], [0, 0, 1, 0], [], []>} : vector<8x8xbf16>, vector<8x8xbf16>, vector<8x8xf32> -> vector<8x8xf32>
    %cst_27 = arith.constant 0.353553385 : f32
    %64 = vector.broadcast %cst_27 : f32 to vector<8x8xf32>
    %65 = arith.mulf %63, %64 : vector<8x8xf32>
    %66 = arith.addf %65, %37 : vector<8x8xf32>
    %cst_28 = arith.constant dense<0xFF800000> : vector<8xf32>
    %67 = vector.multi_reduction <maximumf>, %66, %cst_28 [1] : vector<8x8xf32> to vector<8xf32>
    %68 = vector.shape_cast %67 : vector<8xf32> to vector<8x1xf32>
    %69 = vector.broadcast %68 : vector<8x1xf32> to vector<8x8xf32>
    %70 = arith.subf %66, %69 : vector<8x8xf32>
    %71 = math.exp %70 : vector<8x8xf32>
    %cst_29 = arith.constant dense<0.000000e+00> : vector<8xf32>
    %72 = vector.multi_reduction <add>, %71, %cst_29 [1] : vector<8x8xf32> to vector<8xf32>
    %73 = vector.shape_cast %72 : vector<8xf32> to vector<8x1xf32>
    %74 = arith.truncf %71 : vector<8x8xf32> to vector<8x8xbf16>
    %cst_30 = arith.constant dense<0.000000e+00> : vector<8x8xf32>
    %75 = tpu.matmul %74, %62, %cst_30 {dimension_numbers = #tpu.dot_dimension_numbers<[1], [0], [0], [1], [0, 0, 1, 1], [], []>} : vector<8x8xbf16>, vector<8x8xbf16>, vector<8x8xf32> -> vector<8x8xf32>
    %76 = tpu.reciprocal %73 {approx = true} : vector<8x1xf32> -> vector<8x1xf32>
    %77 = vector.broadcast %76 : vector<8x1xf32> to vector<8x8xf32>
    %78 = arith.mulf %75, %77 : vector<8x8xf32>
    %79 = arith.truncf %78 : vector<8x8xf32> to vector<8x8xbf16>
    %80 = vector.extract_strided_slice %31 {offsets = [0, 16], sizes = [8, 8], strides = [1, 1]} : vector<8x96xbf16> to vector<8x8xbf16>
    %81 = vector.extract_strided_slice %31 {offsets = [0, 48], sizes = [8, 8], strides = [1, 1]} : vector<8x96xbf16> to vector<8x8xbf16>
    %82 = vector.extract_strided_slice %31 {offsets = [0, 80], sizes = [8, 8], strides = [1, 1]} : vector<8x96xbf16> to vector<8x8xbf16>
    %cst_31 = arith.constant dense<0.000000e+00> : vector<8x8xf32>
    %83 = tpu.matmul %80, %81, %cst_31 {dimension_numbers = #tpu.dot_dimension_numbers<[1], [1], [0], [0], [0, 0, 1, 0], [], []>} : vector<8x8xbf16>, vector<8x8xbf16>, vector<8x8xf32> -> vector<8x8xf32>
    %cst_32 = arith.constant 0.353553385 : f32
    %84 = vector.broadcast %cst_32 : f32 to vector<8x8xf32>
    %85 = arith.mulf %83, %84 : vector<8x8xf32>
    %86 = arith.addf %85, %37 : vector<8x8xf32>
    %cst_33 = arith.constant dense<0xFF800000> : vector<8xf32>
    %87 = vector.multi_reduction <maximumf>, %86, %cst_33 [1] : vector<8x8xf32> to vector<8xf32>
    %88 = vector.shape_cast %87 : vector<8xf32> to vector<8x1xf32>
    %89 = vector.broadcast %88 : vector<8x1xf32> to vector<8x8xf32>
    %90 = arith.subf %86, %89 : vector<8x8xf32>
    %91 = math.exp %90 : vector<8x8xf32>
    %cst_34 = arith.constant dense<0.000000e+00> : vector<8xf32>
    %92 = vector.multi_reduction <add>, %91, %cst_34 [1] : vector<8x8xf32> to vector<8xf32>
    %93 = vector.shape_cast %92 : vector<8xf32> to vector<8x1xf32>
    %94 = arith.truncf %91 : vector<8x8xf32> to vector<8x8xbf16>
    %cst_35 = arith.constant dense<0.000000e+00> : vector<8x8xf32>
    %95 = tpu.matmul %94, %82, %cst_35 {dimension_numbers = #tpu.dot_dimension_numbers<[1], [0], [0], [1], [0, 0, 1, 1], [], []>} : vector<8x8xbf16>, vector<8x8xbf16>, vector<8x8xf32> -> vector<8x8xf32>
    %96 = tpu.reciprocal %93 {approx = true} : vector<8x1xf32> -> vector<8x1xf32>
    %97 = vector.broadcast %96 : vector<8x1xf32> to vector<8x8xf32>
    %98 = arith.mulf %95, %97 : vector<8x8xf32>
    %99 = arith.truncf %98 : vector<8x8xf32> to vector<8x8xbf16>
    %100 = vector.extract_strided_slice %31 {offsets = [0, 24], sizes = [8, 8], strides = [1, 1]} : vector<8x96xbf16> to vector<8x8xbf16>
    %101 = vector.extract_strided_slice %31 {offsets = [0, 56], sizes = [8, 8], strides = [1, 1]} : vector<8x96xbf16> to vector<8x8xbf16>
    %102 = vector.extract_strided_slice %31 {offsets = [0, 88], sizes = [8, 8], strides = [1, 1]} : vector<8x96xbf16> to vector<8x8xbf16>
    %cst_36 = arith.constant dense<0.000000e+00> : vector<8x8xf32>
    %103 = tpu.matmul %100, %101, %cst_36 {dimension_numbers = #tpu.dot_dimension_numbers<[1], [1], [0], [0], [0, 0, 1, 0], [], []>} : vector<8x8xbf16>, vector<8x8xbf16>, vector<8x8xf32> -> vector<8x8xf32>
    %cst_37 = arith.constant 0.353553385 : f32
    %104 = vector.broadcast %cst_37 : f32 to vector<8x8xf32>
    %105 = arith.mulf %103, %104 : vector<8x8xf32>
    %106 = arith.addf %105, %37 : vector<8x8xf32>
    %cst_38 = arith.constant dense<0xFF800000> : vector<8xf32>
    %107 = vector.multi_reduction <maximumf>, %106, %cst_38 [1] : vector<8x8xf32> to vector<8xf32>
    %108 = vector.shape_cast %107 : vector<8xf32> to vector<8x1xf32>
    %109 = vector.broadcast %108 : vector<8x1xf32> to vector<8x8xf32>
    %110 = arith.subf %106, %109 : vector<8x8xf32>
    %111 = math.exp %110 : vector<8x8xf32>
    %cst_39 = arith.constant dense<0.000000e+00> : vector<8xf32>
    %112 = vector.multi_reduction <add>, %111, %cst_39 [1] : vector<8x8xf32> to vector<8xf32>
    %113 = vector.shape_cast %112 : vector<8xf32> to vector<8x1xf32>
    %114 = arith.truncf %111 : vector<8x8xf32> to vector<8x8xbf16>
    %cst_40 = arith.constant dense<0.000000e+00> : vector<8x8xf32>
    %115 = tpu.matmul %114, %102, %cst_40 {dimension_numbers = #tpu.dot_dimension_numbers<[1], [0], [0], [1], [0, 0, 1, 1], [], []>} : vector<8x8xbf16>, vector<8x8xbf16>, vector<8x8xf32> -> vector<8x8xf32>
    %116 = tpu.reciprocal %113 {approx = true} : vector<8x1xf32> -> vector<8x1xf32>
    %117 = vector.broadcast %116 : vector<8x1xf32> to vector<8x8xf32>
    %118 = arith.mulf %115, %117 : vector<8x8xf32>
    %119 = arith.truncf %118 : vector<8x8xf32> to vector<8x8xbf16>
    %120 = tpu.concatenate %59, %79, %99, %119 in 1 : vector<8x8xbf16>, vector<8x8xbf16>, vector<8x8xbf16>, vector<8x8xbf16> -> vector<8x32xbf16>
    %cst_41 = arith.constant dense<0.000000e+00> : vector<8x32xf32>
    %121 = tpu.matmul %120, %38, %cst_41 {dimension_numbers = #tpu.dot_dimension_numbers<[1], [0], [0], [1], [0, 0, 1, 1], [], []>} : vector<8x32xbf16>, vector<32x32xbf16>, vector<8x32xf32> -> vector<8x32xf32>
    %122 = vector.broadcast %39 : vector<1x32xf32> to vector<8x32xf32>
    %123 = arith.addf %121, %122 : vector<8x32xf32>
    %124 = arith.addf %2, %123 : vector<8x32xf32>
    %125 = arith.truncf %124 : vector<8x32xf32> to vector<8x32xbf16>
    %c0_42 = arith.constant 0 : index
    %c0_43 = arith.constant 0 : index
    %c0_44 = arith.constant 0 : index
    %126 = vector.load %arg8[%c0_42, %c0_43, %c0_44] : memref<1x8x32xbf16, #tpu.memory_space<vmem>>, vector<1x8x32xbf16>
    %127 = vector.shape_cast %126 : vector<1x8x32xbf16> to vector<8x32xbf16>
    %128 = vector.shape_cast %125 : vector<8x32xbf16> to vector<1x8x32xbf16>
    tpu.vector_store %arg8[%c0_42, %c0_43, %c0_44], %128 {strides = array<i32>} : memref<1x8x32xbf16, #tpu.memory_space<vmem>>, vector<1x8x32xbf16>,
    return
  }
  func.func @transform_0(%arg0: i32) -> (i32, i32, i32) {
    %c0_i32 = arith.constant 0 : i32
    %c0_i32_0 = arith.constant 0 : i32
    %c0_i32_1 = arith.constant 0 : i32
    return %arg0, %c0_i32, %c0_i32_0 : i32, i32, i32
  }
  func.func @transform_1(%arg0: i32) -> (i32, i32) {
    %c0_i32 = arith.constant 0 : i32
    %c0_i32_0 = arith.constant 0 : i32
    %c0_i32_1 = arith.constant 0 : i32
    return %c0_i32, %c0_i32_0 : i32, i32
  }
  func.func @transform_2(%arg0: i32) -> (i32, i32) {
    %c0_i32 = arith.constant 0 : i32
    %c0_i32_0 = arith.constant 0 : i32
    %c0_i32_1 = arith.constant 0 : i32
    return %c0_i32, %c0_i32_0 : i32, i32
  }
  func.func @transform_3(%arg0: i32) -> (i32, i32) {
    %c0_i32 = arith.constant 0 : i32
    %c0_i32_0 = arith.constant 0 : i32
    %c0_i32_1 = arith.constant 0 : i32
    return %c0_i32, %c0_i32_0 : i32, i32
  }
  func.func @transform_4(%arg0: i32) -> (i32, i32) {
    %c0_i32 = arith.constant 0 : i32
    %c0_i32_0 = arith.constant 0 : i32
    %c0_i32_1 = arith.constant 0 : i32
    return %c0_i32, %c0_i32_0 : i32, i32
  }
  func.func @transform_5(%arg0: i32) -> (i32, i32) {
    %c0_i32 = arith.constant 0 : i32
    %c0_i32_0 = arith.constant 0 : i32
    %c0_i32_1 = arith.constant 0 : i32
    return %c0_i32, %c0_i32_0 : i32, i32
  }
  func.func @transform_6(%arg0: i32) -> (i32, i32) {
    %c0_i32 = arith.constant 0 : i32
    %c0_i32_0 = arith.constant 0 : i32
    %c0_i32_1 = arith.constant 0 : i32
    return %c0_i32, %c0_i32_0 : i32, i32
  }
  func.func @transform_7(%arg0: i32) -> (i32, i32, i32) {
    %c0_i32 = arith.constant 0 : i32
    %c0_i32_0 = arith.constant 0 : i32
    %c0_i32_1 = arith.constant 0 : i32
    return %arg0, %c0_i32, %c0_i32_0 : i32, i32, i32
  }
}

module attributes {stable_mosaic.version = 11 : i64} {
  func.func @_cross_attn_block_kernel(%arg0: i32, %arg1: memref<1x8x32xbf16, #tpu.memory_space<vmem>>, %arg2: memref<1x4x32xbf16, #tpu.memory_space<vmem>>, %arg3: memref<1x32xf32, #tpu.memory_space<vmem>>, %arg4: memref<1x32xf32, #tpu.memory_space<vmem>>, %arg5: memref<32x32xbf16, #tpu.memory_space<vmem>>, %arg6: memref<1x32xf32, #tpu.memory_space<vmem>>, %arg7: memref<32x64xbf16, #tpu.memory_space<vmem>>, %arg8: memref<1x64xf32, #tpu.memory_space<vmem>>, %arg9: memref<32x32xbf16, #tpu.memory_space<vmem>>, %arg10: memref<1x32xf32, #tpu.memory_space<vmem>>, %arg11: memref<1x8x32xbf16, #tpu.memory_space<vmem>>) attributes {dimension_semantics = [#tpu.dimension_semantics<parallel>], iteration_bounds = array<i64: 2>, scalar_prefetch = 0 : i64, scratch_operands = 0 : i64, tpu.core_type = #tpu.core_type<tc>, window_params = [{transform_indices = @transform_0, window_bounds = array<i64: 1, 8, 32>}, {transform_indices = @transform_1, window_bounds = array<i64: 1, 4, 32>}, {pipeline_mode = #tpu.pipeline_mode<synchronous>, transform_indices = @transform_2, window_bounds = array<i64: 1, 32>}, {pipeline_mode = #tpu.pipeline_mode<synchronous>, transform_indices = @transform_3, window_bounds = array<i64: 1, 32>}, {pipeline_mode = #tpu.pipeline_mode<synchronous>, transform_indices = @transform_4, window_bounds = array<i64: 32, 32>}, {pipeline_mode = #tpu.pipeline_mode<synchronous>, transform_indices = @transform_5, window_bounds = array<i64: 1, 32>}, {pipeline_mode = #tpu.pipeline_mode<synchronous>, transform_indices = @transform_6, window_bounds = array<i64: 32, 64>}, {pipeline_mode = #tpu.pipeline_mode<synchronous>, transform_indices = @transform_7, window_bounds = array<i64: 1, 64>}, {pipeline_mode = #tpu.pipeline_mode<synchronous>, transform_indices = @transform_8, window_bounds = array<i64: 32, 32>}, {pipeline_mode = #tpu.pipeline_mode<synchronous>, transform_indices = @transform_9, window_bounds = array<i64: 1, 32>}, {transform_indices = @transform_10, window_bounds = array<i64: 1, 8, 32>}]} {
    %c0 = arith.constant 0 : index
    %c0_0 = arith.constant 0 : index
    %c0_1 = arith.constant 0 : index
    %0 = vector.load %arg1[%c0, %c0_0, %c0_1] : memref<1x8x32xbf16, #tpu.memory_space<vmem>>, vector<1x8x32xbf16>
    %1 = vector.shape_cast %0 : vector<1x8x32xbf16> to vector<8x32xbf16>
    %2 = arith.extf %1 : vector<8x32xbf16> to vector<8x32xf32>
    %c0_2 = arith.constant 0 : index
    %c0_3 = arith.constant 0 : index
    %c0_4 = arith.constant 0 : index
    %3 = vector.load %arg2[%c0_2, %c0_3, %c0_4] : memref<1x4x32xbf16, #tpu.memory_space<vmem>>, vector<1x4x32xbf16>
    %4 = vector.shape_cast %3 : vector<1x4x32xbf16> to vector<4x32xbf16>
    %c0_5 = arith.constant 0 : index
    %c0_6 = arith.constant 0 : index
    %5 = vector.load %arg3[%c0_5, %c0_6] : memref<1x32xf32, #tpu.memory_space<vmem>>, vector<1x32xf32>
    %c0_7 = arith.constant 0 : index
    %c0_8 = arith.constant 0 : index
    %6 = vector.load %arg4[%c0_7, %c0_8] : memref<1x32xf32, #tpu.memory_space<vmem>>, vector<1x32xf32>
    %cst = arith.constant dense<0.000000e+00> : vector<8xf32>
    %7 = vector.multi_reduction <add>, %2, %cst [1] : vector<8x32xf32> to vector<8xf32>
    %8 = vector.shape_cast %7 : vector<8xf32> to vector<8x1xf32>
    %cst_9 = arith.constant 3.200000e+01 : f32
    %9 = vector.broadcast %cst_9 : f32 to vector<8x1xf32>
    %10 = arith.divf %8, %9 : vector<8x1xf32>
    %11 = vector.broadcast %10 : vector<8x1xf32> to vector<8x32xf32>
    %12 = arith.subf %2, %11 : vector<8x32xf32>
    %13 = arith.mulf %12, %12 : vector<8x32xf32>
    %cst_10 = arith.constant dense<0.000000e+00> : vector<8xf32>
    %14 = vector.multi_reduction <add>, %13, %cst_10 [1] : vector<8x32xf32> to vector<8xf32>
    %15 = vector.shape_cast %14 : vector<8xf32> to vector<8x1xf32>
    %cst_11 = arith.constant 3.200000e+01 : f32
    %16 = vector.broadcast %cst_11 : f32 to vector<8x1xf32>
    %17 = arith.divf %15, %16 : vector<8x1xf32>
    %cst_12 = arith.constant 9.99999974E-6 : f32
    %18 = vector.broadcast %cst_12 : f32 to vector<8x1xf32>
    %19 = arith.addf %17, %18 : vector<8x1xf32>
    %20 = math.rsqrt %19 : vector<8x1xf32>
    %21 = vector.broadcast %20 : vector<8x1xf32> to vector<8x32xf32>
    %22 = arith.mulf %12, %21 : vector<8x32xf32>
    %23 = vector.broadcast %5 : vector<1x32xf32> to vector<8x32xf32>
    %24 = arith.mulf %22, %23 : vector<8x32xf32>
    %25 = vector.broadcast %6 : vector<1x32xf32> to vector<8x32xf32>
    %26 = arith.addf %24, %25 : vector<8x32xf32>
    %27 = arith.truncf %26 : vector<8x32xf32> to vector<8x32xbf16>
    %c0_13 = arith.constant 0 : index
    %c0_14 = arith.constant 0 : index
    %28 = vector.load %arg5[%c0_13, %c0_14] : memref<32x32xbf16, #tpu.memory_space<vmem>>, vector<32x32xbf16>
    %cst_15 = arith.constant dense<0.000000e+00> : vector<8x32xf32>
    %29 = tpu.matmul %27, %28, %cst_15 {dimension_numbers = #tpu.dot_dimension_numbers<[1], [0], [0], [1], [0, 0, 1, 1], [], []>} : vector<8x32xbf16>, vector<32x32xbf16>, vector<8x32xf32> -> vector<8x32xf32>
    %c0_16 = arith.constant 0 : index
    %c0_17 = arith.constant 0 : index
    %30 = vector.load %arg6[%c0_16, %c0_17] : memref<1x32xf32, #tpu.memory_space<vmem>>, vector<1x32xf32>
    %31 = vector.broadcast %30 : vector<1x32xf32> to vector<8x32xf32>
    %32 = arith.addf %29, %31 : vector<8x32xf32>
    %c0_18 = arith.constant 0 : index
    %c0_19 = arith.constant 0 : index
    %33 = vector.load %arg7[%c0_18, %c0_19] : memref<32x64xbf16, #tpu.memory_space<vmem>>, vector<32x64xbf16>
    %cst_20 = arith.constant dense<0.000000e+00> : vector<4x64xf32>
    %34 = tpu.matmul %4, %33, %cst_20 {dimension_numbers = #tpu.dot_dimension_numbers<[1], [0], [0], [1], [0, 0, 1, 1], [], []>} : vector<4x32xbf16>, vector<32x64xbf16>, vector<4x64xf32> -> vector<4x64xf32>
    %c0_21 = arith.constant 0 : index
    %c0_22 = arith.constant 0 : index
    %35 = vector.load %arg8[%c0_21, %c0_22] : memref<1x64xf32, #tpu.memory_space<vmem>>, vector<1x64xf32>
    %36 = vector.broadcast %35 : vector<1x64xf32> to vector<4x64xf32>
    %37 = arith.addf %34, %36 : vector<4x64xf32>
    %38 = arith.truncf %32 : vector<8x32xf32> to vector<8x32xbf16>
    %39 = arith.truncf %37 : vector<4x64xf32> to vector<4x64xbf16>
    %c0_23 = arith.constant 0 : index
    %c0_24 = arith.constant 0 : index
    %40 = vector.load %arg9[%c0_23, %c0_24] : memref<32x32xbf16, #tpu.memory_space<vmem>>, vector<32x32xbf16>
    %41 = vector.extract_strided_slice %38 {offsets = [0, 0], sizes = [8, 8], strides = [1, 1]} : vector<8x32xbf16> to vector<8x8xbf16>
    %42 = vector.extract_strided_slice %39 {offsets = [0, 0], sizes = [4, 8], strides = [1, 1]} : vector<4x64xbf16> to vector<4x8xbf16>
    %43 = vector.extract_strided_slice %39 {offsets = [0, 32], sizes = [4, 8], strides = [1, 1]} : vector<4x64xbf16> to vector<4x8xbf16>
    %cst_25 = arith.constant dense<0.000000e+00> : vector<8x4xf32>
    %44 = tpu.matmul %41, %42, %cst_25 {dimension_numbers = #tpu.dot_dimension_numbers<[1], [1], [0], [0], [0, 0, 1, 0], [], []>} : vector<8x8xbf16>, vector<4x8xbf16>, vector<8x4xf32> -> vector<8x4xf32>
    %cst_26 = arith.constant 0.353553385 : f32
    %45 = vector.broadcast %cst_26 : f32 to vector<8x4xf32>
    %46 = arith.mulf %44, %45 : vector<8x4xf32>
    %cst_27 = arith.constant dense<0xFF800000> : vector<8xf32>
    %47 = vector.multi_reduction <maximumf>, %46, %cst_27 [1] : vector<8x4xf32> to vector<8xf32>
    %48 = vector.shape_cast %47 : vector<8xf32> to vector<8x1xf32>
    %49 = vector.broadcast %48 : vector<8x1xf32> to vector<8x4xf32>
    %50 = arith.subf %46, %49 : vector<8x4xf32>
    %51 = math.exp %50 : vector<8x4xf32>
    %cst_28 = arith.constant dense<0.000000e+00> : vector<8xf32>
    %52 = vector.multi_reduction <add>, %51, %cst_28 [1] : vector<8x4xf32> to vector<8xf32>
    %53 = vector.shape_cast %52 : vector<8xf32> to vector<8x1xf32>
    %54 = arith.truncf %51 : vector<8x4xf32> to vector<8x4xbf16>
    %cst_29 = arith.constant dense<0.000000e+00> : vector<8x8xf32>
    %55 = tpu.matmul %54, %43, %cst_29 {dimension_numbers = #tpu.dot_dimension_numbers<[1], [0], [0], [1], [0, 0, 1, 1], [], []>} : vector<8x4xbf16>, vector<4x8xbf16>, vector<8x8xf32> -> vector<8x8xf32>
    %56 = tpu.reciprocal %53 {approx = true} : vector<8x1xf32> -> vector<8x1xf32>
    %57 = vector.broadcast %56 : vector<8x1xf32> to vector<8x8xf32>
    %58 = arith.mulf %55, %57 : vector<8x8xf32>
    %59 = arith.truncf %58 : vector<8x8xf32> to vector<8x8xbf16>
    %60 = vector.extract_strided_slice %38 {offsets = [0, 8], sizes = [8, 8], strides = [1, 1]} : vector<8x32xbf16> to vector<8x8xbf16>
    %61 = vector.extract_strided_slice %39 {offsets = [0, 8], sizes = [4, 8], strides = [1, 1]} : vector<4x64xbf16> to vector<4x8xbf16>
    %62 = vector.extract_strided_slice %39 {offsets = [0, 40], sizes = [4, 8], strides = [1, 1]} : vector<4x64xbf16> to vector<4x8xbf16>
    %cst_30 = arith.constant dense<0.000000e+00> : vector<8x4xf32>
    %63 = tpu.matmul %60, %61, %cst_30 {dimension_numbers = #tpu.dot_dimension_numbers<[1], [1], [0], [0], [0, 0, 1, 0], [], []>} : vector<8x8xbf16>, vector<4x8xbf16>, vector<8x4xf32> -> vector<8x4xf32>
    %cst_31 = arith.constant 0.353553385 : f32
    %64 = vector.broadcast %cst_31 : f32 to vector<8x4xf32>
    %65 = arith.mulf %63, %64 : vector<8x4xf32>
    %cst_32 = arith.constant dense<0xFF800000> : vector<8xf32>
    %66 = vector.multi_reduction <maximumf>, %65, %cst_32 [1] : vector<8x4xf32> to vector<8xf32>
    %67 = vector.shape_cast %66 : vector<8xf32> to vector<8x1xf32>
    %68 = vector.broadcast %67 : vector<8x1xf32> to vector<8x4xf32>
    %69 = arith.subf %65, %68 : vector<8x4xf32>
    %70 = math.exp %69 : vector<8x4xf32>
    %cst_33 = arith.constant dense<0.000000e+00> : vector<8xf32>
    %71 = vector.multi_reduction <add>, %70, %cst_33 [1] : vector<8x4xf32> to vector<8xf32>
    %72 = vector.shape_cast %71 : vector<8xf32> to vector<8x1xf32>
    %73 = arith.truncf %70 : vector<8x4xf32> to vector<8x4xbf16>
    %cst_34 = arith.constant dense<0.000000e+00> : vector<8x8xf32>
    %74 = tpu.matmul %73, %62, %cst_34 {dimension_numbers = #tpu.dot_dimension_numbers<[1], [0], [0], [1], [0, 0, 1, 1], [], []>} : vector<8x4xbf16>, vector<4x8xbf16>, vector<8x8xf32> -> vector<8x8xf32>
    %75 = tpu.reciprocal %72 {approx = true} : vector<8x1xf32> -> vector<8x1xf32>
    %76 = vector.broadcast %75 : vector<8x1xf32> to vector<8x8xf32>
    %77 = arith.mulf %74, %76 : vector<8x8xf32>
    %78 = arith.truncf %77 : vector<8x8xf32> to vector<8x8xbf16>
    %79 = vector.extract_strided_slice %38 {offsets = [0, 16], sizes = [8, 8], strides = [1, 1]} : vector<8x32xbf16> to vector<8x8xbf16>
    %80 = vector.extract_strided_slice %39 {offsets = [0, 16], sizes = [4, 8], strides = [1, 1]} : vector<4x64xbf16> to vector<4x8xbf16>
    %81 = vector.extract_strided_slice %39 {offsets = [0, 48], sizes = [4, 8], strides = [1, 1]} : vector<4x64xbf16> to vector<4x8xbf16>
    %cst_35 = arith.constant dense<0.000000e+00> : vector<8x4xf32>
    %82 = tpu.matmul %79, %80, %cst_35 {dimension_numbers = #tpu.dot_dimension_numbers<[1], [1], [0], [0], [0, 0, 1, 0], [], []>} : vector<8x8xbf16>, vector<4x8xbf16>, vector<8x4xf32> -> vector<8x4xf32>
    %cst_36 = arith.constant 0.353553385 : f32
    %83 = vector.broadcast %cst_36 : f32 to vector<8x4xf32>
    %84 = arith.mulf %82, %83 : vector<8x4xf32>
    %cst_37 = arith.constant dense<0xFF800000> : vector<8xf32>
    %85 = vector.multi_reduction <maximumf>, %84, %cst_37 [1] : vector<8x4xf32> to vector<8xf32>
    %86 = vector.shape_cast %85 : vector<8xf32> to vector<8x1xf32>
    %87 = vector.broadcast %86 : vector<8x1xf32> to vector<8x4xf32>
    %88 = arith.subf %84, %87 : vector<8x4xf32>
    %89 = math.exp %88 : vector<8x4xf32>
    %cst_38 = arith.constant dense<0.000000e+00> : vector<8xf32>
    %90 = vector.multi_reduction <add>, %89, %cst_38 [1] : vector<8x4xf32> to vector<8xf32>
    %91 = vector.shape_cast %90 : vector<8xf32> to vector<8x1xf32>
    %92 = arith.truncf %89 : vector<8x4xf32> to vector<8x4xbf16>
    %cst_39 = arith.constant dense<0.000000e+00> : vector<8x8xf32>
    %93 = tpu.matmul %92, %81, %cst_39 {dimension_numbers = #tpu.dot_dimension_numbers<[1], [0], [0], [1], [0, 0, 1, 1], [], []>} : vector<8x4xbf16>, vector<4x8xbf16>, vector<8x8xf32> -> vector<8x8xf32>
    %94 = tpu.reciprocal %91 {approx = true} : vector<8x1xf32> -> vector<8x1xf32>
    %95 = vector.broadcast %94 : vector<8x1xf32> to vector<8x8xf32>
    %96 = arith.mulf %93, %95 : vector<8x8xf32>
    %97 = arith.truncf %96 : vector<8x8xf32> to vector<8x8xbf16>
    %98 = vector.extract_strided_slice %38 {offsets = [0, 24], sizes = [8, 8], strides = [1, 1]} : vector<8x32xbf16> to vector<8x8xbf16>
    %99 = vector.extract_strided_slice %39 {offsets = [0, 24], sizes = [4, 8], strides = [1, 1]} : vector<4x64xbf16> to vector<4x8xbf16>
    %100 = vector.extract_strided_slice %39 {offsets = [0, 56], sizes = [4, 8], strides = [1, 1]} : vector<4x64xbf16> to vector<4x8xbf16>
    %cst_40 = arith.constant dense<0.000000e+00> : vector<8x4xf32>
    %101 = tpu.matmul %98, %99, %cst_40 {dimension_numbers = #tpu.dot_dimension_numbers<[1], [1], [0], [0], [0, 0, 1, 0], [], []>} : vector<8x8xbf16>, vector<4x8xbf16>, vector<8x4xf32> -> vector<8x4xf32>
    %cst_41 = arith.constant 0.353553385 : f32
    %102 = vector.broadcast %cst_41 : f32 to vector<8x4xf32>
    %103 = arith.mulf %101, %102 : vector<8x4xf32>
    %cst_42 = arith.constant dense<0xFF800000> : vector<8xf32>
    %104 = vector.multi_reduction <maximumf>, %103, %cst_42 [1] : vector<8x4xf32> to vector<8xf32>
    %105 = vector.shape_cast %104 : vector<8xf32> to vector<8x1xf32>
    %106 = vector.broadcast %105 : vector<8x1xf32> to vector<8x4xf32>
    %107 = arith.subf %103, %106 : vector<8x4xf32>
    %108 = math.exp %107 : vector<8x4xf32>
    %cst_43 = arith.constant dense<0.000000e+00> : vector<8xf32>
    %109 = vector.multi_reduction <add>, %108, %cst_43 [1] : vector<8x4xf32> to vector<8xf32>
    %110 = vector.shape_cast %109 : vector<8xf32> to vector<8x1xf32>
    %111 = arith.truncf %108 : vector<8x4xf32> to vector<8x4xbf16>
    %cst_44 = arith.constant dense<0.000000e+00> : vector<8x8xf32>
    %112 = tpu.matmul %111, %100, %cst_44 {dimension_numbers = #tpu.dot_dimension_numbers<[1], [0], [0], [1], [0, 0, 1, 1], [], []>} : vector<8x4xbf16>, vector<4x8xbf16>, vector<8x8xf32> -> vector<8x8xf32>
    %113 = tpu.reciprocal %110 {approx = true} : vector<8x1xf32> -> vector<8x1xf32>
    %114 = vector.broadcast %113 : vector<8x1xf32> to vector<8x8xf32>
    %115 = arith.mulf %112, %114 : vector<8x8xf32>
    %116 = arith.truncf %115 : vector<8x8xf32> to vector<8x8xbf16>
    %117 = tpu.concatenate %59, %78, %97, %116 in 1 : vector<8x8xbf16>, vector<8x8xbf16>, vector<8x8xbf16>, vector<8x8xbf16> -> vector<8x32xbf16>
    %cst_45 = arith.constant dense<0.000000e+00> : vector<8x32xf32>
    %118 = tpu.matmul %117, %40, %cst_45 {dimension_numbers = #tpu.dot_dimension_numbers<[1], [0], [0], [1], [0, 0, 1, 1], [], []>} : vector<8x32xbf16>, vector<32x32xbf16>, vector<8x32xf32> -> vector<8x32xf32>
    %c0_46 = arith.constant 0 : index
    %c0_47 = arith.constant 0 : index
    %119 = vector.load %arg10[%c0_46, %c0_47] : memref<1x32xf32, #tpu.memory_space<vmem>>, vector<1x32xf32>
    %120 = vector.broadcast %119 : vector<1x32xf32> to vector<8x32xf32>
    %121 = arith.addf %118, %120 : vector<8x32xf32>
    %122 = arith.addf %2, %121 : vector<8x32xf32>
    %123 = arith.truncf %122 : vector<8x32xf32> to vector<8x32xbf16>
    %c0_48 = arith.constant 0 : index
    %c0_49 = arith.constant 0 : index
    %c0_50 = arith.constant 0 : index
    %124 = vector.load %arg11[%c0_48, %c0_49, %c0_50] : memref<1x8x32xbf16, #tpu.memory_space<vmem>>, vector<1x8x32xbf16>
    %125 = vector.shape_cast %124 : vector<1x8x32xbf16> to vector<8x32xbf16>
    %126 = vector.shape_cast %123 : vector<8x32xbf16> to vector<1x8x32xbf16>
    tpu.vector_store %arg11[%c0_48, %c0_49, %c0_50], %126 {strides = array<i32>} : memref<1x8x32xbf16, #tpu.memory_space<vmem>>, vector<1x8x32xbf16>,
    return
  }
  func.func @transform_0(%arg0: i32) -> (i32, i32, i32) {
    %c0_i32 = arith.constant 0 : i32
    %c0_i32_0 = arith.constant 0 : i32
    %c0_i32_1 = arith.constant 0 : i32
    return %arg0, %c0_i32, %c0_i32_0 : i32, i32, i32
  }
  func.func @transform_1(%arg0: i32) -> (i32, i32, i32) {
    %c0_i32 = arith.constant 0 : i32
    %c0_i32_0 = arith.constant 0 : i32
    %c0_i32_1 = arith.constant 0 : i32
    return %arg0, %c0_i32, %c0_i32_0 : i32, i32, i32
  }
  func.func @transform_2(%arg0: i32) -> (i32, i32) {
    %c0_i32 = arith.constant 0 : i32
    %c0_i32_0 = arith.constant 0 : i32
    %c0_i32_1 = arith.constant 0 : i32
    return %c0_i32, %c0_i32_0 : i32, i32
  }
  func.func @transform_3(%arg0: i32) -> (i32, i32) {
    %c0_i32 = arith.constant 0 : i32
    %c0_i32_0 = arith.constant 0 : i32
    %c0_i32_1 = arith.constant 0 : i32
    return %c0_i32, %c0_i32_0 : i32, i32
  }
  func.func @transform_4(%arg0: i32) -> (i32, i32) {
    %c0_i32 = arith.constant 0 : i32
    %c0_i32_0 = arith.constant 0 : i32
    %c0_i32_1 = arith.constant 0 : i32
    return %c0_i32, %c0_i32_0 : i32, i32
  }
  func.func @transform_5(%arg0: i32) -> (i32, i32) {
    %c0_i32 = arith.constant 0 : i32
    %c0_i32_0 = arith.constant 0 : i32
    %c0_i32_1 = arith.constant 0 : i32
    return %c0_i32, %c0_i32_0 : i32, i32
  }
  func.func @transform_6(%arg0: i32) -> (i32, i32) {
    %c0_i32 = arith.constant 0 : i32
    %c0_i32_0 = arith.constant 0 : i32
    %c0_i32_1 = arith.constant 0 : i32
    return %c0_i32, %c0_i32_0 : i32, i32
  }
  func.func @transform_7(%arg0: i32) -> (i32, i32) {
    %c0_i32 = arith.constant 0 : i32
    %c0_i32_0 = arith.constant 0 : i32
    %c0_i32_1 = arith.constant 0 : i32
    return %c0_i32, %c0_i32_0 : i32, i32
  }
  func.func @transform_8(%arg0: i32) -> (i32, i32) {
    %c0_i32 = arith.constant 0 : i32
    %c0_i32_0 = arith.constant 0 : i32
    %c0_i32_1 = arith.constant 0 : i32
    return %c0_i32, %c0_i32_0 : i32, i32
  }
  func.func @transform_9(%arg0: i32) -> (i32, i32) {
    %c0_i32 = arith.constant 0 : i32
    %c0_i32_0 = arith.constant 0 : i32
    %c0_i32_1 = arith.constant 0 : i32
    return %c0_i32, %c0_i32_0 : i32, i32
  }
  func.func @transform_10(%arg0: i32) -> (i32, i32, i32) {
    %c0_i32 = arith.constant 0 : i32
    %c0_i32_0 = arith.constant 0 : i32
    %c0_i32_1 = arith.constant 0 : i32
    return %arg0, %c0_i32, %c0_i32_0 : i32, i32, i32
  }
}

module attributes {stable_mosaic.version = 11 : i64} {
  func.func @_ln_lm_head_kernel(%arg0: i32, %arg1: i32, %arg2: memref<16x32xbf16, #tpu.memory_space<vmem>>, %arg3: memref<1x32xf32, #tpu.memory_space<vmem>>, %arg4: memref<1x32xf32, #tpu.memory_space<vmem>>, %arg5: memref<32x128xbf16, #tpu.memory_space<vmem>>, %arg6: memref<1x128xf32, #tpu.memory_space<vmem>>, %arg7: memref<16x128xf32, #tpu.memory_space<vmem>>, %arg8: memref<16x32xbf16, #tpu.memory_space<vmem>>) attributes {dimension_semantics = [#tpu.dimension_semantics<parallel>, #tpu.dimension_semantics<arbitrary>], iteration_bounds = array<i64: 1, 1>, scalar_prefetch = 0 : i64, scratch_operands = 1 : i64, tpu.core_type = #tpu.core_type<tc>, window_params = [{transform_indices = @transform_0, window_bounds = array<i64: 16, 32>}, {pipeline_mode = #tpu.pipeline_mode<synchronous>, transform_indices = @transform_1, window_bounds = array<i64: 1, 32>}, {pipeline_mode = #tpu.pipeline_mode<synchronous>, transform_indices = @transform_2, window_bounds = array<i64: 1, 32>}, {transform_indices = @transform_3, window_bounds = array<i64: 32, 128>}, {transform_indices = @transform_4, window_bounds = array<i64: 1, 128>}, {transform_indices = @transform_5, window_bounds = array<i64: 16, 128>}]} {
    %c0_i32 = arith.constant 0 : i32
    %0 = arith.cmpi eq, %arg1, %c0_i32 : i32
    %1 = arith.extui %0 : i1 to i32
    %c0_i32_0 = arith.constant 0 : i32
    %2 = arith.cmpi ne, %1, %c0_i32_0 : i32
    scf.if %2 {
      %c0_8 = arith.constant 0 : index
      %c0_9 = arith.constant 0 : index
      %10 = vector.load %arg2[%c0_8, %c0_9] : memref<16x32xbf16, #tpu.memory_space<vmem>>, vector<16x32xbf16>
      %11 = arith.extf %10 : vector<16x32xbf16> to vector<16x32xf32>
      %c0_10 = arith.constant 0 : index
      %c0_11 = arith.constant 0 : index
      %12 = vector.load %arg3[%c0_10, %c0_11] : memref<1x32xf32, #tpu.memory_space<vmem>>, vector<1x32xf32>
      %c0_12 = arith.constant 0 : index
      %c0_13 = arith.constant 0 : index
      %13 = vector.load %arg4[%c0_12, %c0_13] : memref<1x32xf32, #tpu.memory_space<vmem>>, vector<1x32xf32>
      %cst_14 = arith.constant dense<0.000000e+00> : vector<16xf32>
      %14 = vector.multi_reduction <add>, %11, %cst_14 [1] : vector<16x32xf32> to vector<16xf32>
      %15 = vector.shape_cast %14 : vector<16xf32> to vector<16x1xf32>
      %cst_15 = arith.constant 3.200000e+01 : f32
      %16 = vector.broadcast %cst_15 : f32 to vector<16x1xf32>
      %17 = arith.divf %15, %16 : vector<16x1xf32>
      %18 = vector.broadcast %17 : vector<16x1xf32> to vector<16x32xf32>
      %19 = arith.subf %11, %18 : vector<16x32xf32>
      %20 = arith.mulf %19, %19 : vector<16x32xf32>
      %cst_16 = arith.constant dense<0.000000e+00> : vector<16xf32>
      %21 = vector.multi_reduction <add>, %20, %cst_16 [1] : vector<16x32xf32> to vector<16xf32>
      %22 = vector.shape_cast %21 : vector<16xf32> to vector<16x1xf32>
      %cst_17 = arith.constant 3.200000e+01 : f32
      %23 = vector.broadcast %cst_17 : f32 to vector<16x1xf32>
      %24 = arith.divf %22, %23 : vector<16x1xf32>
      %cst_18 = arith.constant 9.99999974E-6 : f32
      %25 = vector.broadcast %cst_18 : f32 to vector<16x1xf32>
      %26 = arith.addf %24, %25 : vector<16x1xf32>
      %27 = math.rsqrt %26 : vector<16x1xf32>
      %28 = vector.broadcast %27 : vector<16x1xf32> to vector<16x32xf32>
      %29 = arith.mulf %19, %28 : vector<16x32xf32>
      %30 = vector.broadcast %12 : vector<1x32xf32> to vector<16x32xf32>
      %31 = arith.mulf %29, %30 : vector<16x32xf32>
      %32 = vector.broadcast %13 : vector<1x32xf32> to vector<16x32xf32>
      %33 = arith.addf %31, %32 : vector<16x32xf32>
      %34 = arith.truncf %33 : vector<16x32xf32> to vector<16x32xbf16>
      %c0_19 = arith.constant 0 : index
      %c0_20 = arith.constant 0 : index
      %35 = vector.load %arg8[%c0_19, %c0_20] : memref<16x32xbf16, #tpu.memory_space<vmem>>, vector<16x32xbf16>
      tpu.vector_store %arg8[%c0_19, %c0_20], %34 {strides = array<i32>} : memref<16x32xbf16, #tpu.memory_space<vmem>>, vector<16x32xbf16>,
    } else {
    }
    %c0 = arith.constant 0 : index
    %c0_1 = arith.constant 0 : index
    %3 = vector.load %arg8[%c0, %c0_1] : memref<16x32xbf16, #tpu.memory_space<vmem>>, vector<16x32xbf16>
    %c0_2 = arith.constant 0 : index
    %c0_3 = arith.constant 0 : index
    %4 = vector.load %arg5[%c0_2, %c0_3] : memref<32x128xbf16, #tpu.memory_space<vmem>>, vector<32x128xbf16>
    %cst = arith.constant dense<0.000000e+00> : vector<16x128xf32>
    %5 = tpu.matmul %3, %4, %cst {dimension_numbers = #tpu.dot_dimension_numbers<[1], [0], [0], [1], [0, 0, 1, 1], [], []>} : vector<16x32xbf16>, vector<32x128xbf16>, vector<16x128xf32> -> vector<16x128xf32>
    %c0_4 = arith.constant 0 : index
    %c0_5 = arith.constant 0 : index
    %6 = vector.load %arg6[%c0_4, %c0_5] : memref<1x128xf32, #tpu.memory_space<vmem>>, vector<1x128xf32>
    %7 = vector.broadcast %6 : vector<1x128xf32> to vector<16x128xf32>
    %8 = arith.addf %5, %7 : vector<16x128xf32>
    %c0_6 = arith.constant 0 : index
    %c0_7 = arith.constant 0 : index
    %9 = vector.load %arg7[%c0_6, %c0_7] : memref<16x128xf32, #tpu.memory_space<vmem>>, vector<16x128xf32>
    tpu.vector_store %arg7[%c0_6, %c0_7], %8 {strides = array<i32>} : memref<16x128xf32, #tpu.memory_space<vmem>>, vector<16x128xf32>,
    return
  }
  func.func @transform_0(%arg0: i32, %arg1: i32) -> (i32, i32) {
    %c0_i32 = arith.constant 0 : i32
    %c0_i32_0 = arith.constant 0 : i32
    return %arg0, %c0_i32 : i32, i32
  }
  func.func @transform_1(%arg0: i32, %arg1: i32) -> (i32, i32) {
    %c0_i32 = arith.constant 0 : i32
    %c0_i32_0 = arith.constant 0 : i32
    %c0_i32_1 = arith.constant 0 : i32
    return %c0_i32, %c0_i32_0 : i32, i32
  }
  func.func @transform_2(%arg0: i32, %arg1: i32) -> (i32, i32) {
    %c0_i32 = arith.constant 0 : i32
    %c0_i32_0 = arith.constant 0 : i32
    %c0_i32_1 = arith.constant 0 : i32
    return %c0_i32, %c0_i32_0 : i32, i32
  }
  func.func @transform_3(%arg0: i32, %arg1: i32) -> (i32, i32) {
    %c0_i32 = arith.constant 0 : i32
    %c0_i32_0 = arith.constant 0 : i32
    return %c0_i32, %arg1 : i32, i32
  }
  func.func @transform_4(%arg0: i32, %arg1: i32) -> (i32, i32) {
    %c0_i32 = arith.constant 0 : i32
    %c0_i32_0 = arith.constant 0 : i32
    return %c0_i32, %arg1 : i32, i32
  }
  func.func @transform_5(%arg0: i32, %arg1: i32) -> (i32, i32) {
    %c0_i32 = arith.constant 0 : i32
    return %arg0, %arg1 : i32, i32
  }
}

module attributes {stable_mosaic.version = 11 : i64} {
  func.func @_mlp_block_kernel(%arg0: i32, %arg1: memref<16x32xbf16, #tpu.memory_space<vmem>>, %arg2: memref<1x32xf32, #tpu.memory_space<vmem>>, %arg3: memref<1x32xf32, #tpu.memory_space<vmem>>, %arg4: memref<32x128xbf16, #tpu.memory_space<vmem>>, %arg5: memref<1x128xf32, #tpu.memory_space<vmem>>, %arg6: memref<128x32xbf16, #tpu.memory_space<vmem>>, %arg7: memref<1x32xf32, #tpu.memory_space<vmem>>, %arg8: memref<16x32xbf16, #tpu.memory_space<vmem>>) attributes {dimension_semantics = [#tpu.dimension_semantics<parallel>], iteration_bounds = array<i64: 1>, scalar_prefetch = 0 : i64, scratch_operands = 0 : i64, tpu.core_type = #tpu.core_type<tc>, window_params = [{transform_indices = @transform_0, window_bounds = array<i64: 16, 32>}, {pipeline_mode = #tpu.pipeline_mode<synchronous>, transform_indices = @transform_1, window_bounds = array<i64: 1, 32>}, {pipeline_mode = #tpu.pipeline_mode<synchronous>, transform_indices = @transform_2, window_bounds = array<i64: 1, 32>}, {pipeline_mode = #tpu.pipeline_mode<synchronous>, transform_indices = @transform_3, window_bounds = array<i64: 32, 128>}, {pipeline_mode = #tpu.pipeline_mode<synchronous>, transform_indices = @transform_4, window_bounds = array<i64: 1, 128>}, {pipeline_mode = #tpu.pipeline_mode<synchronous>, transform_indices = @transform_5, window_bounds = array<i64: 128, 32>}, {pipeline_mode = #tpu.pipeline_mode<synchronous>, transform_indices = @transform_6, window_bounds = array<i64: 1, 32>}, {transform_indices = @transform_7, window_bounds = array<i64: 16, 32>}]} {
    %c0 = arith.constant 0 : index
    %c0_0 = arith.constant 0 : index
    %0 = vector.load %arg1[%c0, %c0_0] : memref<16x32xbf16, #tpu.memory_space<vmem>>, vector<16x32xbf16>
    %1 = arith.extf %0 : vector<16x32xbf16> to vector<16x32xf32>
    %c0_1 = arith.constant 0 : index
    %c0_2 = arith.constant 0 : index
    %2 = vector.load %arg2[%c0_1, %c0_2] : memref<1x32xf32, #tpu.memory_space<vmem>>, vector<1x32xf32>
    %c0_3 = arith.constant 0 : index
    %c0_4 = arith.constant 0 : index
    %3 = vector.load %arg3[%c0_3, %c0_4] : memref<1x32xf32, #tpu.memory_space<vmem>>, vector<1x32xf32>
    %cst = arith.constant dense<0.000000e+00> : vector<16xf32>
    %4 = vector.multi_reduction <add>, %1, %cst [1] : vector<16x32xf32> to vector<16xf32>
    %5 = vector.shape_cast %4 : vector<16xf32> to vector<16x1xf32>
    %cst_5 = arith.constant 3.200000e+01 : f32
    %6 = vector.broadcast %cst_5 : f32 to vector<16x1xf32>
    %7 = arith.divf %5, %6 : vector<16x1xf32>
    %8 = vector.broadcast %7 : vector<16x1xf32> to vector<16x32xf32>
    %9 = arith.subf %1, %8 : vector<16x32xf32>
    %10 = arith.mulf %9, %9 : vector<16x32xf32>
    %cst_6 = arith.constant dense<0.000000e+00> : vector<16xf32>
    %11 = vector.multi_reduction <add>, %10, %cst_6 [1] : vector<16x32xf32> to vector<16xf32>
    %12 = vector.shape_cast %11 : vector<16xf32> to vector<16x1xf32>
    %cst_7 = arith.constant 3.200000e+01 : f32
    %13 = vector.broadcast %cst_7 : f32 to vector<16x1xf32>
    %14 = arith.divf %12, %13 : vector<16x1xf32>
    %cst_8 = arith.constant 9.99999974E-6 : f32
    %15 = vector.broadcast %cst_8 : f32 to vector<16x1xf32>
    %16 = arith.addf %14, %15 : vector<16x1xf32>
    %17 = math.rsqrt %16 : vector<16x1xf32>
    %18 = vector.broadcast %17 : vector<16x1xf32> to vector<16x32xf32>
    %19 = arith.mulf %9, %18 : vector<16x32xf32>
    %20 = vector.broadcast %2 : vector<1x32xf32> to vector<16x32xf32>
    %21 = arith.mulf %19, %20 : vector<16x32xf32>
    %22 = vector.broadcast %3 : vector<1x32xf32> to vector<16x32xf32>
    %23 = arith.addf %21, %22 : vector<16x32xf32>
    %24 = arith.truncf %23 : vector<16x32xf32> to vector<16x32xbf16>
    %c0_9 = arith.constant 0 : index
    %c0_10 = arith.constant 0 : index
    %25 = vector.load %arg4[%c0_9, %c0_10] : memref<32x128xbf16, #tpu.memory_space<vmem>>, vector<32x128xbf16>
    %cst_11 = arith.constant dense<0.000000e+00> : vector<16x128xf32>
    %26 = tpu.matmul %24, %25, %cst_11 {dimension_numbers = #tpu.dot_dimension_numbers<[1], [0], [0], [1], [0, 0, 1, 1], [], []>} : vector<16x32xbf16>, vector<32x128xbf16>, vector<16x128xf32> -> vector<16x128xf32>
    %c0_12 = arith.constant 0 : index
    %c0_13 = arith.constant 0 : index
    %27 = vector.load %arg5[%c0_12, %c0_13] : memref<1x128xf32, #tpu.memory_space<vmem>>, vector<1x128xf32>
    %28 = vector.broadcast %27 : vector<1x128xf32> to vector<16x128xf32>
    %29 = arith.addf %26, %28 : vector<16x128xf32>
    %30 = arith.mulf %29, %29 : vector<16x128xf32>
    %31 = arith.mulf %29, %30 : vector<16x128xf32>
    %cst_14 = arith.constant 4.471500e-02 : f32
    %32 = vector.broadcast %cst_14 : f32 to vector<16x128xf32>
    %33 = arith.mulf %32, %31 : vector<16x128xf32>
    %34 = arith.addf %29, %33 : vector<16x128xf32>
    %cst_15 = arith.constant 0.797884583 : f32
    %35 = vector.broadcast %cst_15 : f32 to vector<16x128xf32>
    %36 = arith.mulf %35, %34 : vector<16x128xf32>
    %37 = math.tanh %36 : vector<16x128xf32>
    %cst_16 = arith.constant 1.000000e+00 : f32
    %38 = vector.broadcast %cst_16 : f32 to vector<16x128xf32>
    %39 = arith.addf %38, %37 : vector<16x128xf32>
    %cst_17 = arith.constant 5.000000e-01 : f32
    %40 = vector.broadcast %cst_17 : f32 to vector<16x128xf32>
    %41 = arith.mulf %40, %39 : vector<16x128xf32>
    %42 = arith.mulf %29, %41 : vector<16x128xf32>
    %43 = arith.truncf %42 : vector<16x128xf32> to vector<16x128xbf16>
    %c0_18 = arith.constant 0 : index
    %c0_19 = arith.constant 0 : index
    %44 = vector.load %arg6[%c0_18, %c0_19] : memref<128x32xbf16, #tpu.memory_space<vmem>>, vector<128x32xbf16>
    %cst_20 = arith.constant dense<0.000000e+00> : vector<16x32xf32>
    %45 = tpu.matmul %43, %44, %cst_20 {dimension_numbers = #tpu.dot_dimension_numbers<[1], [0], [0], [1], [0, 0, 1, 1], [], []>} : vector<16x128xbf16>, vector<128x32xbf16>, vector<16x32xf32> -> vector<16x32xf32>
    %c0_21 = arith.constant 0 : index
    %c0_22 = arith.constant 0 : index
    %46 = vector.load %arg7[%c0_21, %c0_22] : memref<1x32xf32, #tpu.memory_space<vmem>>, vector<1x32xf32>
    %47 = vector.broadcast %46 : vector<1x32xf32> to vector<16x32xf32>
    %48 = arith.addf %45, %47 : vector<16x32xf32>
    %49 = arith.addf %1, %48 : vector<16x32xf32>
    %50 = arith.truncf %49 : vector<16x32xf32> to vector<16x32xbf16>
    %c0_23 = arith.constant 0 : index
    %c0_24 = arith.constant 0 : index
    %51 = vector.load %arg8[%c0_23, %c0_24] : memref<16x32xbf16, #tpu.memory_space<vmem>>, vector<16x32xbf16>
    tpu.vector_store %arg8[%c0_23, %c0_24], %50 {strides = array<i32>} : memref<16x32xbf16, #tpu.memory_space<vmem>>, vector<16x32xbf16>,
    return
  }
  func.func @transform_0(%arg0: i32) -> (i32, i32) {
    %c0_i32 = arith.constant 0 : i32
    %c0_i32_0 = arith.constant 0 : i32
    return %arg0, %c0_i32 : i32, i32
  }
  func.func @transform_1(%arg0: i32) -> (i32, i32) {
    %c0_i32 = arith.constant 0 : i32
    %c0_i32_0 = arith.constant 0 : i32
    %c0_i32_1 = arith.constant 0 : i32
    return %c0_i32, %c0_i32_0 : i32, i32
  }
  func.func @transform_2(%arg0: i32) -> (i32, i32) {
    %c0_i32 = arith.constant 0 : i32
    %c0_i32_0 = arith.constant 0 : i32
    %c0_i32_1 = arith.constant 0 : i32
    return %c0_i32, %c0_i32_0 : i32, i32
  }
  func.func @transform_3(%arg0: i32) -> (i32, i32) {
    %c0_i32 = arith.constant 0 : i32
    %c0_i32_0 = arith.constant 0 : i32
    %c0_i32_1 = arith.constant 0 : i32
    return %c0_i32, %c0_i32_0 : i32, i32
  }
  func.func @transform_4(%arg0: i32) -> (i32, i32) {
    %c0_i32 = arith.constant 0 : i32
    %c0_i32_0 = arith.constant 0 : i32
    %c0_i32_1 = arith.constant 0 : i32
    return %c0_i32, %c0_i32_0 : i32, i32
  }
  func.func @transform_5(%arg0: i32) -> (i32, i32) {
    %c0_i32 = arith.constant 0 : i32
    %c0_i32_0 = arith.constant 0 : i32
    %c0_i32_1 = arith.constant 0 : i32
    return %c0_i32, %c0_i32_0 : i32, i32
  }
  func.func @transform_6(%arg0: i32) -> (i32, i32) {
    %c0_i32 = arith.constant 0 : i32
    %c0_i32_0 = arith.constant 0 : i32
    %c0_i32_1 = arith.constant 0 : i32
    return %c0_i32, %c0_i32_0 : i32, i32
  }
  func.func @transform_7(%arg0: i32) -> (i32, i32) {
    %c0_i32 = arith.constant 0 : i32
    %c0_i32_0 = arith.constant 0 : i32
    return %arg0, %c0_i32 : i32, i32
  }
}

</mosaic_0001>

<bundles_post_ra>
// kernel: cruller_forward.12
= control target key start
LH: loop header
LB: loop body
LE: loop exit
PB: predicated region body
PF: predicated region fallthrough
CT: control target
= control target key end

     0   :  { %s504_s15 = smov 0   ;;  %s567_s0 = inlined_call_operand.vmem [shape: bf16[2,4,192], index: 0, kind: input, shape index: {}]   ;;  %s568_s1 = inlined_call_operand.vmem [shape: bf16[192,32], index: 1, kind: input, shape index: {}]   ;;  %s569_s2 = inlined_call_operand.vmem [shape: f32[1,32], index: 2, kind: input, shape index: {}]   ;;  %s570_s3 = inlined_call_operand.vmem [shape: f32[4,32], index: 3, kind: input, shape index: {}]   ;;  %s571_s4 = inlined_call_operand.vmem [shape: bf16[2,4,32], index: 4, kind: output, shape index: {}]  }
   0x1 LB: > { %s390_s16 = sadd.s32 4294967295, %s477_s15   ;;  %p394_p0 = scmp.ge.s32.totalorder %s477_s15, 1  ;;  %s477_s15 = sphi %s504_s15, %s14_s15  }
   0x2   : > { %p162_p1 = scmp.lt.s32.totalorder %s477_s15, 3 }
   0x4   : > { %p163_p2 = pnand %p394_p0, %p162_p1 }
   0x5   : > { %p187_p3 = scmp.lt.s32.totalorder (!%p163_p2), %s390_s16, 1 }
   0x6   : > { %166 = sbr.rel (%p163_p2) target bundleno = 178 (0xb2), region = 36 }
   0xb   : > { %v457_v0 = vld [vmem:[%s568_s1 + $0x38] sm:$0xff]  ;;  %v456_v2 = vld [vmem:[%s568_s1 + $0x30] sm:$0xff]  ;;  %s573_s16 = smov (!%p187_p3, %s390_s16), 1  ;;  %v455_v4 = vld [vmem:[%s568_s1 + $0x28] sm:$0xff]  ;;  %vm303_vm0 = vcmask 523264   ;;  %vm335_vm1 = vcmask 254976  }
   0xc   : > { %v461_v1 = vld [vmem:[%s568_s1 + $0x58] sm:$0xff]  ;;  %306 = vmatpush.bf16.msra.mxu0 %v457_v0  ;;  %v460_v3 = vld [vmem:[%s568_s1 + $0x50] sm:$0xff]  ;;  %s449_s25 = sshll.u32 %s573_s16, 2  ;;  %v459_v6 = vld [vmem:[%s568_s1 + $0x48] sm:$0xff] }
   0xd   : > { %323 = vmatpush.bf16.msra.mxu1 %v461_v1  ;;  %s191_s28 = scalar_lea.vmem %s567_s0, %s449_s25  ;;  %v454_v7 = vld [vmem:[%s568_s1 + $0x20] sm:$0xff]  ;;  %v453_v9 = vld [vmem:[%s568_s1 + $0x18] sm:$0xff]  ;;  %v452_v11 = vld [vmem:[%s568_s1 + $0x10] sm:$0xff]  ;;  %s397_s25 = sshll.u32 %s573_s16, 1 }
   0xe   : > { %v197_v5 = vld [vmem:[%s191_s28] sm:$0xf]  ;;  %v451_v12 = vld [vmem:[%s568_s1 + $0x8] sm:$0xff]  ;;  %s195_s28 = scalar_lea.vmem %s571_s4, %s397_s25 }
   0xf   : > { %227 = vst [vmem:[#allocation1] ss:$4 sm:$0xff] %v197_v5  ;;  %v458_v8 = vld [vmem:[%s568_s1 + $0x40] sm:$0xff] }
  0x10   : > { %307 = vmatpush.bf16.msra.mxu0 %v456_v2  ;;  %v450_v13 = vld [vmem:[%s568_s1] sm:$0xff] }
  0x11   : > { %324 = vmatpush.bf16.msra.mxu1 %v460_v3  ;;  %v470_v17 = vld [vmem:[%s569_s2] ss:$0 sm:$0xff] }
  0x12   : > { %v332_v20 = vld [vmem:[%s570_s3] sm:$0xf] }
  0x14   : > { %308 = vmatpush.bf16.msra.mxu0 %v455_v4 }
  0x15   : > { %325 = vmatpush.bf16.msra.mxu1 %v459_v6 }
  0x16   : > { %v229_v10 = vld.sshfl [vmem:[#allocation1 + $0x8] sm:$0xff pattern:$0x73625140]  ;;  %v228_v14 = vld.sshfl [vmem:[#allocation1] sm:$0xff pattern:$0x73625140] }
  0x18   : > { %309 = vmatpush.bf16.msra.mxu0 %v454_v7 }
  0x19   : > { %326 = vmatpush.bf16.msra.mxu1 %v458_v8 }
  0x1c   : > { %310 = vmatpush.bf16.msra.mxu0 %v453_v9  ;;  %446 = vmatmul.msk.bf16.vlgmr.msra.gmra.mxu1 %vm303_vm0, %v229_v10 }
  0x20   : > { %311 = vmatpush.bf16.msra.mxu0 %v452_v11 }
  0x24   : > { %312 = vmatpush.bf16.msra.mxu0 %v451_v12 }
  0x28   : > { %313 = vmatpush.bf16.msra.mxu0 %v450_v13 }
  0x2b   : > { %314 = vmatmul.bf16.vlgmr.msra.gmra.mxu0 %v228_v14 }
  0x99   : > { %v328_v15 = vpop.f32.mrf.mxu1 }
  0xa1   : > { %v330_v16 = vpop.f32.mrf.mxu1 }
  0xa8   : > { %v315_v18 = vpop.f32.mrf.mxu0 }
  0xa9   : > { %v316_v19 = vadd.f32 %v470_v17, %v315_v18 }
  0xab   : > { %v329_v21 = vadd.f32 %v328_v15, %v316_v19 }
  0xad   : > { %v333_v22 = vadd.f32 %v332_v20, %v329_v21 }
  0xaf   : > { %v334_v23 = vpack.c.bf16 %v333_v22, %v333_v22 }
  0xb0   : > { %v317_v24 = vpop.f32.mrf.mxu0 }
  0xb1   : > { %336 = vst.msk [vmem:[%s195_s28] sm:$0x3] %vm335_vm1, %v334_v23 }
  0xb2 PF: > { %s14_s15 = sadd.s32 1, %s477_s15  }
  0xb3   : > { %p11_p4 = scmp.ge.s32.totalorder %s14_s15, 4  }
  0xb5   :  { %13 = sbr.rel (!%p11_p4) target bundleno = 1 (0x1), region = 66 }

// kernel: cruller_forward.14
= control target key start
LH: loop header
LB: loop body
LE: loop exit
PB: predicated region body
PF: predicated region fallthrough
CT: control target
= control target key end

     0   :  { %vm31_vm0 = vcmask 261120   ;;  %v267_v3 = vmov 32.0   ;;  %vm199_vm5 = vcmask 257024   ;;  %s364_s0 = inlined_call_operand.vmem [shape: bf16[8,32], index: 0, kind: input, shape index: {}]   ;;  %s365_s1 = inlined_call_operand.vmem [shape: f32[1,32], index: 1, kind: input, shape index: {}]   ;;  %s366_s2 = inlined_call_operand.vmem [shape: f32[1,32], index: 2, kind: input, shape index: {}]   ;;  %s367_s4 = inlined_call_operand.vmem [shape: f32[1,128], index: 4, kind: input, shape index: {}]   ;;  %s368_s3 = inlined_call_operand.vmem [shape: bf16[32,128], index: 3, kind: input, shape index: {}]   ;;  %s369_s5 = inlined_call_operand.vmem [shape: bf16[128,32], index: 5, kind: input, shape index: {}]   ;;  %s370_s6 = inlined_call_operand.vmem [shape: f32[1,32], index: 6, kind: input, shape index: {}]   ;;  %s371_s7 = inlined_call_operand.vmem [shape: bf16[8,32], index: 7, kind: output, shape index: {}]  }
   0x1   :  { %v27_v0 = vld [vmem:[%s364_s0] sm:$0xf]  ;;  %261 = vrcp.f32 %v267_v3  ;;  %v247_v15 = vld [vmem:[%s368_s3 + $0x8] sm:$0xff]  ;;  %v255_v17 = vld [vmem:[%s369_s5 + $0x38] sm:$0xff] }
   0x2   :  { %v311_v1 = vunpack.c.l.bf16 %v27_v0  ;;  %99 = vmatpush.bf16.msra.mxu0 %v247_v15  ;;  %v246_v16 = vld [vmem:[%s368_s3] sm:$0xff]  ;;  %184 = vmatpush.bf16.msra.mxu1 %v255_v17  ;;  %v254_v34 = vld [vmem:[%s369_s5 + $0x30] sm:$0xff]  ;;  %v253_v35 = vld [vmem:[%s369_s5 + $0x28] sm:$0xff] }
   0x3   :  { %v257_v27 = vld [vmem:[%s365_s1] ss:$0 sm:$0xff]  ;;  %v251_v37 = vld [vmem:[%s369_s5 + $0x18] sm:$0xff]  ;;  %v250_v38 = vld [vmem:[%s369_s5 + $0x10] sm:$0xff] }
   0x4   :  { %v32_v2 = vsel %vm31_vm0, %v311_v1, 0.0  ;;  %v258_v30 = vld [vmem:[%s366_s2] ss:$0 sm:$0xff]  ;;  %v249_v39 = vld [vmem:[%s369_s5 + $0x8] sm:$0xff] }
   0x5   :  { %33 = vadd.xlane.f32.xlu0 %v32_v2  ;;  %v252_v36 = vld [vmem:[%s369_s5 + $0x20] sm:$0xff] }
   0x6   :  { %100 = vmatpush.bf16.msra.mxu0 %v246_v16  ;;  %185 = vmatpush.bf16.msra.mxu1 %v254_v34  ;;  %v248_v40 = vld [vmem:[%s369_s5] sm:$0xff] }
   0x7   :  { %v262_v4 = vpop.eup %261  ;;  %v259_v41 = vld [vmem:[%s367_s4] ss:$0 sm:$0xff] }
   0x8   :  { %v36_v5 = vmul.f32 32.0, %v262_v4  ;;  %vm40_vm1 = vweird.f32 %v262_v4  ;;  %v260_v55 = vld [vmem:[%s370_s6] ss:$0 sm:$0xff] }
   0xa   :  { %v37_v6 = vsub.f32 1.0, %v36_v5  ;;  %186 = vmatpush.bf16.msra.mxu1 %v253_v35 }
   0xc   :  { %v38_v7 = vmul.f32 %v262_v4, %v37_v6 }
   0xe   :  { %v39_v8 = vadd.f32 %v262_v4, %v38_v7  ;;  %187 = vmatpush.bf16.msra.mxu1 %v252_v36 }
  0x10   :  { %v41_v9 = vsel %vm40_vm1, %v262_v4, %v39_v8 }
  0x12   :  { %188 = vmatpush.bf16.msra.mxu1 %v251_v37 }
  0x16   :  { %189 = vmatpush.bf16.msra.mxu1 %v250_v38 }
  0x1a   :  { %190 = vmatpush.bf16.msra.mxu1 %v249_v39 }
  0x1e   :  { %191 = vmatpush.bf16.msra.mxu1 %v248_v40 }
  0x78   :  { %v34_v10 = vpop.xlane.xlu0 %33 }
  0x79   :  { %v42_v11 = vmul.f32 %v41_v9, %v34_v10 }
  0x7b   :  { %v43_v12 = vsub.f32 %v311_v1, %v42_v11 }
  0x7d   :  { %v44_v13 = vmul.f32 %v43_v12, %v43_v12 }
  0x7f   :  { %v45_v14 = vsel %vm31_vm0, %v44_v13, 0.0 }
  0x80   :  { %46 = vadd.xlane.f32.xlu0 %v45_v14 }
  0xf3   :  { %v47_v18 = vpop.xlane.xlu0 %46 }
  0xf4   :  { %v48_v19 = vmul.f32 %v47_v18, %v41_v9 }
  0xf6   :  { %v49_v20 = vadd.f32 1e-05, %v48_v19 }
  0xf8   :  { %263 = vrsqrt.f32 %v49_v20  ;;  %vm56_vm3 = vweird.f32 %v49_v20 }
  0xfe   :  { %v264_v21 = vpop.eup %263 }
  0xff   :  { %v51_v22 = vmul.f32 %v264_v21, %v49_v20  ;;  %vm57_vm2 = vweird.f32 %v264_v21 }
 0x100   :  { %vm58_vm4 = vmor %vm56_vm3, %vm57_vm2 }
 0x101   :  { %v52_v23 = vmul.f32 %v264_v21, %v51_v22 }
 0x103   :  { %v53_v24 = vmul.f32 0.5, %v52_v23 }
 0x105   :  { %v54_v25 = vsub.f32 1.5, %v53_v24 }
 0x107   :  { %v55_v26 = vmul.f32 %v264_v21, %v54_v25 }
 0x109   :  { %v59_v28 = vsel %vm58_vm4, %v264_v21, %v55_v26 }
 0x10a   :  { %v60_v29 = vmul.f32 %v59_v28, %v43_v12 }
 0x10c   :  { %v64_v31 = vmul.f32 %v257_v27, %v60_v29 }
 0x10e   :  { %v68_v32 = vadd.f32 %v258_v30, %v64_v31 }
 0x110   :  { %v69_v33 = vpack.c.bf16 %v68_v32, %v68_v32 }
 0x112   :  { %213 = vmatmul.msk.bf16.vlgmr.msra.gmra.mxu0 %vm31_vm0, %v69_v33 }
 0x18f   :  { %v102_v42 = vpop.f32.mrf.mxu0 }
 0x190   :  { %v103_v43 = vadd.f32 %v259_v41, %v102_v42 }
 0x192   :  { %v106_v44 = vmul.f32 %v103_v43, %v103_v43 }
 0x194   :  { %v107_v45 = vmul.f32 %v106_v44, %v103_v43 }
 0x196   :  { %v108_v46 = vmul.f32 0.044715, %v107_v45 }
 0x197   :  { %v104_v47 = vpop.f32.mrf.mxu0 }
 0x198   :  { %v109_v48 = vadd.f32 %v108_v46, %v103_v43 }
 0x19a   :  { %v110_v49 = vmul.f32 0.7978846, %v109_v48 }
 0x19c   :  { %265 = vtanh.f32 %v110_v49 }
 0x1a2   :  { %v266_v50 = vpop.eup %265 }
 0x1a3   :  { %v112_v51 = vadd.f32 1.0, %v266_v50 }
 0x1a5   :  { %v113_v52 = vmul.f32 0.5, %v112_v51 }
 0x1a7   :  { %v114_v53 = vmul.f32 %v113_v52, %v103_v43 }
 0x1a9   :  { %v115_v54 = vpack.c.bf16 %v114_v53, %v114_v53 }
 0x1ab   :  { %192 = vmatmul.bf16.vlgmr.msra.gmra.mxu1 %v115_v54 }
 0x228   :  { %v193_v56 = vpop.f32.mrf.mxu1 }
 0x229   :  { %v194_v57 = vadd.f32 %v260_v55, %v193_v56 }
 0x22b   :  { %v197_v58 = vadd.f32 %v194_v57, %v311_v1 }
 0x22d   :  { %v198_v59 = vpack.c.bf16 %v197_v58, %v197_v58 }
 0x22f   :  { %200 = vst.msk [vmem:[%s371_s7] sm:$0xf] %vm199_vm5, %v198_v59 }
 0x230   :  { %v195_v60 = vpop.f32.mrf.mxu1 }

// kernel: cruller_forward.13
= control target key start
LH: loop header
LB: loop body
LE: loop exit
PB: predicated region body
PF: predicated region fallthrough
CT: control target
= control target key end

     0   :  { %s858_s24 = smov 0   ;;  %s953_s0 = inlined_call_operand.vmem [shape: bf16[2,4,32], index: 0, kind: input, shape index: {}]   ;;  %s954_s1 = inlined_call_operand.vmem [shape: f32[1,32], index: 1, kind: input, shape index: {}]   ;;  %s955_s2 = inlined_call_operand.vmem [shape: f32[1,32], index: 2, kind: input, shape index: {}]   ;;  %s956_s3 = inlined_call_operand.vmem [shape: bf16[32,96], index: 3, kind: input, shape index: {}]   ;;  %s957_s4 = inlined_call_operand.vmem [shape: f32[1,96], index: 4, kind: input, shape index: {}]   ;;  %s958_s5 = inlined_call_operand.vmem [shape: bf16[32,32], index: 5, kind: input, shape index: {}]   ;;  %s959_s6 = inlined_call_operand.vmem [shape: f32[1,32], index: 6, kind: input, shape index: {}]   ;;  %s960_s7 = inlined_call_operand.vmem [shape: bf16[2,4,32], index: 7, kind: output, shape index: {}]  }
   0x1 LB: > { %s709_s25 = sadd.s32 4294967295, %s801_s24   ;;  %p713_p0 = scmp.ge.s32.totalorder %s801_s24, 1  ;;  %s801_s24 = sphi %s858_s24, %s17_s24  }
   0x2   : > { %p236_p1 = scmp.lt.s32.totalorder %s801_s24, 3 }
   0x4   : > { %p237_p2 = pnand %p713_p0, %p236_p1 }
   0x5   : > { %p266_p3 = scmp.lt.s32.totalorder (!%p237_p2), %s709_s25, 1  ;;  %s804_s17 = smov (!%p237_p2), 104  }
   0x6   : > { %240 = sbr.rel (%p237_p2) target bundleno = 1234 (0x4d2), region = 48  ;;  %s805_s18 = smov (!%p237_p2), 120  }
   0x7   : > { %s806_s19 = smov (!%p237_p2), 96   ;;  %s807_s20 = smov (!%p237_p2), 56  }
   0x8   : > { %s808_s21 = smov (!%p237_p2), 72   ;;  %s809_s22 = smov (!%p237_p2), 88  }
   0x9   : > { %s810_s23 = smov (!%p237_p2), 112   ;;  %s811_s27 = smov (!%p237_p2), 80  }
   0xa   : > { %s812_s28 = smov (!%p237_p2), 64   ;;  %s814_s30 = smov (!%p237_p2), 48  }
   0xb   : > { %s962_s25 = smov (!%p266_p3, %s709_s25), 1  ;;  %vm279_vm0 = vcmask 257024   ;;  %v803_v3 = vmov 32.0   ;;  %v745_v15 = vld [vmem:[%s956_s3 + $0x8] sm:$0xff]  ;;  %v744_v16 = vld [vmem:[%s956_s3] sm:$0xff]  ;;  %vm338_vm5 = vcmask 261120  }
   0xc   : > { %s714_s26 = sshll.u32 %s962_s25, 1  ;;  %775 = vrcp.f32 %v803_v3  ;;  %348 = vmatpush.bf16.msra.mxu0 %v745_v15  ;;  %v771_v26 = vld [vmem:[%s954_s1] ss:$0 sm:$0xff]  ;;  %vm404_vm6 = vcmask 1041408   ;;  %vm366_vm7 = vcmask 64512   ;;  %vm387_vm8 = vcmask 27648  }
   0xd   : > { %s269_s29 = scalar_lea.vmem %s953_s0, %s714_s26  ;;  %v772_v29 = vld [vmem:[%s955_s2] ss:$0 sm:$0xff]  ;;  %vm400_vm9 = vcmask 31744   ;;  %s815_s8 = smov 16   ;;  %vm616_vm10 = vcmask 130048   ;;  %vm619_vm11 = vcmask 195584  }
   0xe   : > { %v275_v0 = vld [vmem:[%s269_s29] sm:$0x3]  ;;  %s813_s29 = smov 40   ;;  %s816_s9 = smov 8   ;;  %vm654_vm12 = vcmask 254976  }
   0xf   : > { %v874_v1 = vunpack.c.l.bf16 %v275_v0  ;;  %v773_v33 = vld [vmem:[%s957_s4] ss:$0 sm:$0xff]  ;;  %s817_s10 = smov 24  }
  0x10   : > { %349 = vmatpush.bf16.msra.mxu0 %v744_v16 }
  0x11   : > { %v280_v2 = vsel %vm279_vm0, %v874_v1, 0.0 }
  0x12   : > { %281 = vadd.xlane.f32.xlu0 %v280_v2  ;;  %v776_v4 = vpop.eup %775 }
  0x13   : > { %v284_v5 = vmul.f32 32.0, %v776_v4  ;;  %vm288_vm1 = vweird.f32 %v776_v4 }
  0x15   : > { %v285_v6 = vsub.f32 1.0, %v284_v5 }
  0x17   : > { %v286_v7 = vmul.f32 %v776_v4, %v285_v6 }
  0x19   : > { %v287_v8 = vadd.f32 %v776_v4, %v286_v7 }
  0x1b   : > { %v289_v9 = vsel %vm288_vm1, %v776_v4, %v287_v8 }
  0x85   : > { %v282_v10 = vpop.xlane.xlu0 %281 }
  0x86   : > { %v290_v11 = vmul.f32 %v289_v9, %v282_v10 }
  0x88   : > { %v291_v12 = vsub.f32 %v874_v1, %v290_v11 }
  0x8a   : > { %v292_v13 = vmul.f32 %v291_v12, %v291_v12 }
  0x8c   : > { %v293_v14 = vsel %vm279_vm0, %v292_v13, 0.0 }
  0x8d   : > { %294 = vadd.xlane.f32.xlu0 %v293_v14 }
 0x100   : > { %v295_v17 = vpop.xlane.xlu0 %294 }
 0x101   : > { %v296_v18 = vmul.f32 %v295_v17, %v289_v9 }
 0x103   : > { %v297_v19 = vadd.f32 1e-05, %v296_v18 }
 0x105   : > { %777 = vrsqrt.f32 %v297_v19  ;;  %vm304_vm3 = vweird.f32 %v297_v19 }
 0x10b   : > { %v778_v20 = vpop.eup %777 }
 0x10c   : > { %v299_v21 = vmul.f32 %v778_v20, %v297_v19  ;;  %vm305_vm2 = vweird.f32 %v778_v20 }
 0x10d   : > { %vm306_vm4 = vmor %vm304_vm3, %vm305_vm2 }
 0x10e   : > { %v300_v22 = vmul.f32 %v778_v20, %v299_v21 }
 0x110   : > { %v301_v23 = vmul.f32 0.5, %v300_v22 }
 0x112   : > { %v302_v24 = vsub.f32 1.5, %v301_v23 }
 0x114   : > { %v303_v25 = vmul.f32 %v778_v20, %v302_v24 }
 0x116   : > { %v307_v27 = vsel %vm306_vm4, %v778_v20, %v303_v25 }
 0x117   : > { %v308_v28 = vmul.f32 %v307_v27, %v291_v12 }
 0x119   : > { %v312_v30 = vmul.f32 %v771_v26, %v308_v28 }
 0x11b   : > { %v316_v31 = vadd.f32 %v772_v29, %v312_v30 }
 0x11d   : > { %v317_v32 = vpack.c.bf16 %v316_v31, %v316_v31 }
 0x11f   : > { %724 = vmatmul.msk.bf16.vlgmr.msra.gmra.mxu0 %vm338_vm5, %v317_v32 }
 0x19c   : > { %v351_v34 = vpop.f32.mrf.mxu0 }
 0x19d   : > { %v352_v35 = vadd.f32 %v773_v33, %v351_v34 }
 0x19f   : > { %v355_v36 = vpack.c.bf16 %v352_v35, %v352_v35 }
 0x1a1   : > { %v362_v37 = vunpack.c.l.b16 %v355_v36 }
 0x1a3   : > { %v896_v38 = vpack.c.b16 %v362_v37, %v362_v37 }
 0x1a4   : > { %v353_v39 = vpop.f32.mrf.mxu0 }
 0x1a5   : > { %540 = vrot.lane.b32.xlu0 %v896_v38, %s804_s17  ;;  %424 = vrot.lane.b32.xlu2 %v896_v38, %s805_s18 }
 0x1a6   : > { %364 = vrot.lane.b32.xlu1 %v896_v38, %s806_s19  ;;  %s273_s19 = scalar_lea.vmem %s960_s7, %s714_s26 }
 0x1ad   : > { %458 = vrot.lane.b32.xlu0 %v896_v38, %s807_s20  ;;  %542 = vrot.lane.b32.xlu2 %v896_v38, %s808_s21 }
 0x1ae   : > { %426 = vrot.lane.b32.xlu1 %v896_v38, %s809_s22 }
 0x1b5   : > { %482 = vrot.lane.b32.xlu2 %v896_v38, %s810_s23 }
 0x1b6   : > { %484 = vrot.lane.b32.xlu1 %v896_v38, %s811_s27 }
 0x1bd   : > { %398 = vrot.lane.b32.xlu2 %v896_v38, %s812_s28 }
 0x1ff   : > { %v425_v40 = vpop.permute.xlu2 %424 }
 0x207   : > { %v543_v41 = vpop.permute.xlu2 %542 }
 0x208   : > { %v548_v52 = vsel %vm366_vm7, %v543_v41, 0 }
 0x20f   : > { %v483_v42 = vpop.permute.xlu2 %482 }
 0x217   : > { %v541_v43 = vpop.permute.xlu0 %540  ;;  %v399_v44 = vpop.permute.xlu2 %398 }
 0x218   : > { %v365_v45 = vpop.permute.xlu1 %364  ;;  %v406_v46 = vsel %vm404_vm6, %v399_v44, 0 }
 0x219   : > { %v371_v47 = vsel %vm366_vm7, %v365_v45, 0  ;;  %415 = vmatpush.bf16.msra.mxu2 %v406_v46 }
 0x21a   : > { %380 = vmatpush.bf16.xpose.msra.mxu1 %v371_v47 }
 0x21f   : > { %v459_v48 = vpop.permute.xlu0 %458 }
 0x220   : > { %v427_v49 = vpop.permute.xlu1 %426  ;;  %v464_v50 = vsel %vm404_vm6, %v459_v48, 0 }
 0x221   : > { %725 = vmatmul.msk.bf16.vlgmr.msra.gmra.mxu1 %vm366_vm7, %v355_v36  ;;  %v432_v51 = vsel %vm366_vm7, %v427_v49, 0  ;;  %473 = vmatpush.bf16.msrb.mxu2 %v464_v50 }
 0x222   : > { %441 = vmatpush.bf16.xpose.msra.mxu3 %v432_v51 }
 0x228   : > { %v485_v53 = vpop.permute.xlu1 %484 }
 0x229   : > { %727 = vmatmul.msk.bf16.vlgmr.msra.gmra.mxu3 %vm366_vm7, %v425_v40  ;;  %v490_v54 = vsel %vm366_vm7, %v485_v53, 0 }
 0x22a   : > { %557 = vmatpush.bf16.xpose.msrb.mxu3 %v548_v52  ;;  %499 = vmatpush.bf16.xpose.msrb.mxu0 %v490_v54 }
 0x231   : > { %729 = vmatmul.msk.bf16.vlgmr.msrb.gmra.mxu0 %vm366_vm7, %v483_v42 }
 0x239   : > { %731 = vmatmul.msk.bf16.vlgmr.msrb.gmra.mxu3 %vm366_vm7, %v541_v43 }
 0x29e   : > { %v382_v55 = vpop.f32.mrf.mxu1 }
 0x29f   : > { %v386_v56 = vmul.f32 0.35355338, %v382_v55 }
 0x2a1   : > { %v388_v57 = vsel %vm387_vm8, %v386_v56, -inf }
 0x2a2   : > { %389 = vmax.xlane.f32.xlu1 %v388_v57 }
 0x2a6   : > { %v384_v58 = vpop.f32.mrf.mxu1 }
 0x2ac   : > { %v443_v59 = vpop.f32.mrf.mxu3 }
 0x2ad   : > { %v447_v60 = vmul.f32 0.35355338, %v443_v59 }
 0x2ae   : > { %v501_v61 = vpop.f32.mrf.mxu0 }
 0x2af   : > { %v505_v62 = vmul.f32 0.35355338, %v501_v61  ;;  %v448_v63 = vsel %vm387_vm8, %v447_v60, -inf }
 0x2b0   : > { %449 = vmax.xlane.f32.xlu2 %v448_v63  ;;  %v746_v63 = vld [vmem:[%s958_s5] sm:$0xff] }
 0x2b1   : > { %v506_v0 = vsel %vm387_vm8, %v505_v62, -inf }
 0x2b2   : > { %507 = vmax.xlane.f32.xlu1 %v506_v0 }
 0x2b4   : > { %v445_v2 = vpop.f32.mrf.mxu3 }
 0x2b6   : > { %v503_v3 = vpop.f32.mrf.mxu0 }
 0x2bc   : > { %v559_v4 = vpop.f32.mrf.mxu3 }
 0x2bd   : > { %v563_v5 = vmul.f32 0.35355338, %v559_v4 }
 0x2bf   : > { %v564_v6 = vsel %vm387_vm8, %v563_v5, -inf }
 0x2c0   : > { %565 = vmax.xlane.f32.xlu0 %v564_v6 }
 0x2c4   : > { %v561_v7 = vpop.f32.mrf.mxu3 }
 0x2c8   : > { %574 = vrot.lane.b32.xlu2 %v896_v38, %s813_s29 }
 0x2cb   : > { %516 = vrot.lane.b32.xlu1 %v896_v38, %s814_s30 }
 0x315   : > { %v390_v8 = vpop.xlane.xlu1 %389 }
 0x316   : > { %v391_v9 = vsub.f32 %v386_v56, %v390_v8 }
 0x318   : > { %v392_v10 = vmul.f32 1.442695, %v391_v9 }
 0x31a   : > { %779 = vpow2.f32 %v392_v10 }
 0x320   : > { %v780_v11 = vpop.eup %779 }
 0x321   : > { %v394_v12 = vsel %vm387_vm8, %v780_v11, 0.0  ;;  %v397_v13 = vpack.c.bf16 %v780_v11, %v780_v11  ;;  %v774_v11 = vld [vmem:[%s959_s6] ss:$0 sm:$0xff] }
 0x322   : > { %395 = vadd.xlane.f32.xlu1 %v394_v12 }
 0x323   : > { %v450_v14 = vpop.xlane.xlu2 %449  ;;  %726 = vmatmul.msk.bf16.vlgmr.msra.gmra.mxu2 %vm400_vm9, %v397_v13 }
 0x324   : > { %v451_v15 = vsub.f32 %v447_v60, %v450_v14 }
 0x325   : > { %v508_v16 = vpop.xlane.xlu1 %507 }
 0x326   : > { %v452_v17 = vmul.f32 1.442695, %v451_v15  ;;  %v509_v18 = vsub.f32 %v505_v62, %v508_v16  ;;  %v747_v62 = vld [vmem:[%s958_s5 + $0x8] sm:$0xff] }
 0x327   : > { %645 = vmatpush.bf16.msra.mxu0 %v747_v62 }
 0x328   : > { %781 = vpow2.f32 %v452_v17  ;;  %v510_v19 = vmul.f32 1.442695, %v509_v18 }
 0x32a   : > { %783 = vpow2.f32 %v510_v19 }
 0x32b   : > { %v575_v20 = vpop.permute.xlu2 %574  ;;  %646 = vmatpush.bf16.msra.mxu0 %v746_v63 }
 0x32c   : > { %v580_v21 = vsel %vm404_vm6, %v575_v20, 0 }
 0x32d   : > { %589 = vmatpush.bf16.msra.mxu2 %v580_v21 }
 0x32e   : > { %v782_v22 = vpop.eup %781 }
 0x32f   : > { %v457_v25 = vpack.c.bf16 %v782_v22, %v782_v22  ;;  %v454_v29 = vsel %vm387_vm8, %v782_v22, 0.0 }
 0x330   : > { %v784_v23 = vpop.eup %783 }
 0x331   : > { %v512_v24 = vsel %vm387_vm8, %v784_v23, 0.0  ;;  %v515_v34 = vpack.c.bf16 %v784_v23, %v784_v23 }
 0x332   : > { %513 = vadd.xlane.f32.xlu0 %v512_v24 }
 0x333   : > { %v566_v26 = vpop.xlane.xlu0 %565  ;;  %728 = vmatmul.msk.bf16.vlgmr.msrb.gmra.mxu2 %vm400_vm9, %v457_v25 }
 0x334   : > { %v567_v27 = vsub.f32 %v563_v5, %v566_v26 }
 0x336   : > { %v568_v28 = vmul.f32 1.442695, %v567_v27 }
 0x338   : > { %785 = vpow2.f32 %v568_v28 }
 0x33a   : > { %455 = vadd.xlane.f32.xlu0 %v454_v29 }
 0x33d   : > { %v517_v30 = vpop.permute.xlu1 %516 }
 0x33e   : > { %v786_v31 = vpop.eup %785  ;;  %v522_v32 = vsel %vm404_vm6, %v517_v30, 0 }
 0x33f   : > { %531 = vmatpush.bf16.msrb.mxu1 %v522_v32  ;;  %v570_v33 = vsel %vm387_vm8, %v786_v31, 0.0  ;;  %v573_v35 = vpack.c.bf16 %v786_v31, %v786_v31 }
 0x340   : > { %571 = vadd.xlane.f32.xlu2 %v570_v33 }
 0x342   : > { %730 = vmatmul.msk.bf16.vlgmr.msrb.gmra.mxu1 %vm400_vm9, %v515_v34 }
 0x343   : > { %732 = vmatmul.msk.bf16.vlgmr.msra.gmra.mxu2 %vm400_vm9, %v573_v35 }
 0x395   : > { %v396_v0 = vpop.xlane.xlu1 %395 }
 0x3a5   : > { %v514_v37 = vpop.xlane.xlu0 %513 }
 0x3a6   : > { %v417_v36 = vpop.f32.mrf.mxu2  ;;  %787 = vrcp.f32 %v514_v37 }
 0x3ac   : > { %v788_v42 = vpop.eup %787 }
 0x3ad   : > { %v456_v40 = vpop.xlane.xlu0 %455 }
 0x3ae   : > { %v419_v38 = vpop.f32.mrf.mxu2  ;;  %789 = vrcp.f32 %v456_v40 }
 0x3b3   : > { %v572_v44 = vpop.xlane.xlu2 %571 }
 0x3b4   : > { %v790_v46 = vpop.eup %789  ;;  %791 = vrcp.f32 %v572_v44 }
 0x3b5   : > { %793 = vrcp.f32 %v396_v0 }
 0x3b6   : > { %v475_v39 = vpop.f32.mrf.mxu2 }
 0x3b7   : > { %v480_v47 = vmul.f32 %v790_v46, %v475_v39 }
 0x3b9   : > { %v481_v50 = vpack.c.bf16 %v480_v47, %v480_v47 }
 0x3ba   : > { %v792_v54 = vpop.eup %791 }
 0x3bb   : > { %v599_v55 = vunpack.c.l.b16 %v481_v50  ;;  %v794_v3 = vpop.eup %793 }
 0x3bc   : > { %v422_v4 = vmul.f32 %v794_v3, %v417_v36 }
 0x3bd   : > { %v600_v57 = vpack.c.b16 %v599_v55, %v599_v55 }
 0x3be   : > { %v477_v41 = vpop.f32.mrf.mxu2  ;;  %v423_v6 = vpack.c.bf16 %v422_v4, %v422_v4 }
 0x3bf   : > { %v533_v43 = vpop.f32.mrf.mxu1 }
 0x3c0   : > { %v538_v45 = vmul.f32 %v788_v42, %v533_v43 }
 0x3c2   : > { %v539_v48 = vpack.c.bf16 %v538_v45, %v538_v45 }
 0x3c4   : > { %v604_v49 = vunpack.c.l.b16 %v539_v48 }
 0x3c6   : > { %v605_v51 = vpack.c.b16 %v604_v49, %v604_v49  ;;  %v591_v52 = vpop.f32.mrf.mxu2 }
 0x3c7   : > { %v535_v53 = vpop.f32.mrf.mxu1  ;;  %v596_v56 = vmul.f32 %v792_v54, %v591_v52 }
 0x3c8   : > { %606 = vrot.lane.b32.xlu0 %v605_v51, %s815_s8 }
 0x3c9   : > { %v597_v58 = vpack.c.bf16 %v596_v56, %v596_v56 }
 0x3cb   : > { %v609_v60 = vunpack.c.l.b16 %v597_v58 }
 0x3cd   : > { %v610_v61 = vpack.c.b16 %v609_v60, %v609_v60 }
 0x3ce   : > { %v593_v59 = vpop.f32.mrf.mxu2 }
 0x3d0   : > { %601 = vrot.lane.b32.xlu0 %v600_v57, %s816_s9 }
 0x3d8   : > { %611 = vrot.lane.b32.xlu0 %v610_v61, %s817_s10 }
 0x43a   : > { %v607_v2 = vpop.permute.xlu0 %606 }
 0x442   : > { %v602_v5 = vpop.permute.xlu0 %601 }
 0x443   : > { %v615_v7 = vsel %vm366_vm7, %v423_v6, %v602_v5 }
 0x444   : > { %v618_v9 = vsel %vm616_vm10, %v615_v7, %v607_v2 }
 0x44a   : > { %v612_v8 = vpop.permute.xlu0 %611 }
 0x44b   : > { %v621_v10 = vsel %vm619_vm11, %v618_v9, %v612_v8 }
 0x44c   : > { %741 = vmatmul.msk.bf16.vlgmr.msra.gmra.mxu0 %vm338_vm5, %v621_v10 }
 0x4c9   : > { %v648_v12 = vpop.f32.mrf.mxu0 }
 0x4ca   : > { %v649_v13 = vadd.f32 %v774_v11, %v648_v12 }
 0x4cc   : > { %v652_v14 = vadd.f32 %v649_v13, %v874_v1 }
 0x4ce   : > { %v653_v15 = vpack.c.bf16 %v652_v14, %v652_v14 }
 0x4d0   : > { %655 = vst.msk [vmem:[%s273_s19] sm:$0x3] %vm654_vm12, %v653_v15 }
 0x4d1   : > { %v650_v16 = vpop.f32.mrf.mxu0 }
 0x4d2 PF: > { %s17_s24 = sadd.s32 1, %s801_s24  }
 0x4d3   : > { %p14_p4 = scmp.ge.s32.totalorder %s17_s24, 4  }
 0x4d5   :  { %16 = sbr.rel (!%p14_p4) target bundleno = 1 (0x1), region = 78 }

// kernel: cruller_forward.16
= control target key start
LH: loop header
LB: loop body
LE: loop exit
PB: predicated region body
PF: predicated region fallthrough
CT: control target
= control target key end

     0   :  { %vm37_vm0 = vcmask 261120   ;;  %v307_v3 = vmov 32.0   ;;  %s429_s0 = inlined_call_operand.vmem [shape: bf16[8,32], index: 0, kind: input, shape index: {}]   ;;  %s430_s1 = inlined_call_operand.vmem [shape: f32[1,32], index: 1, kind: input, shape index: {}]   ;;  %s431_s2 = inlined_call_operand.vmem [shape: f32[1,32], index: 2, kind: input, shape index: {}]   ;;  %s432_s4 = inlined_call_operand.vmem [shape: f32[1,128], index: 4, kind: input, shape index: {}]   ;;  %s433_s3 = inlined_call_operand.vmem [shape: bf16[32,128], index: 3, kind: input, shape index: {}]   ;;  %s434_s5 = inlined_call_operand.vmem [shape: bf16[128,32], index: 5, kind: input, shape index: {}]   ;;  %s435_s6 = inlined_call_operand.vmem [shape: f32[1,32], index: 6, kind: input, shape index: {}]   ;;  %s436_s7 = inlined_call_operand.vmem [shape: f32[1,32], index: 7, kind: input, shape index: {}]   ;;  %s437_s8 = inlined_call_operand.vmem [shape: f32[1,32], index: 8, kind: input, shape index: {}]   ;;  %s438_s9 = inlined_call_operand.vmem [shape: f32[8,32], index: 9, kind: output, shape index: {}]  }
   0x1   :  { %v33_v0 = vld [vmem:[%s429_s0] sm:$0xf]  ;;  %299 = vrcp.f32 %v307_v3  ;;  %v283_v15 = vld [vmem:[%s433_s3 + $0x8] sm:$0xff]  ;;  %v291_v17 = vld [vmem:[%s434_s5 + $0x38] sm:$0xff] }
   0x2   :  { %v361_v1 = vunpack.c.l.bf16 %v33_v0  ;;  %105 = vmatpush.bf16.msra.mxu0 %v283_v15  ;;  %v282_v16 = vld [vmem:[%s433_s3] sm:$0xff]  ;;  %190 = vmatpush.bf16.msra.mxu1 %v291_v17  ;;  %v290_v34 = vld [vmem:[%s434_s5 + $0x30] sm:$0xff]  ;;  %v289_v35 = vld [vmem:[%s434_s5 + $0x28] sm:$0xff] }
   0x3   :  { %v293_v27 = vld [vmem:[%s430_s1] ss:$0 sm:$0xff]  ;;  %v287_v37 = vld [vmem:[%s434_s5 + $0x18] sm:$0xff]  ;;  %v286_v38 = vld [vmem:[%s434_s5 + $0x10] sm:$0xff] }
   0x4   :  { %v38_v2 = vsel %vm37_vm0, %v361_v1, 0.0  ;;  %v294_v30 = vld [vmem:[%s431_s2] ss:$0 sm:$0xff]  ;;  %v285_v39 = vld [vmem:[%s434_s5 + $0x8] sm:$0xff] }
   0x5   :  { %39 = vadd.xlane.f32.xlu0 %v38_v2  ;;  %v288_v36 = vld [vmem:[%s434_s5 + $0x20] sm:$0xff] }
   0x6   :  { %106 = vmatpush.bf16.msra.mxu0 %v282_v16  ;;  %191 = vmatpush.bf16.msra.mxu1 %v290_v34  ;;  %v284_v40 = vld [vmem:[%s434_s5] sm:$0xff] }
   0x7   :  { %v300_v4 = vpop.eup %299  ;;  %v295_v41 = vld [vmem:[%s432_s4] ss:$0 sm:$0xff] }
   0x8   :  { %v42_v5 = vmul.f32 32.0, %v300_v4  ;;  %vm46_vm1 = vweird.f32 %v300_v4  ;;  %v296_v55 = vld [vmem:[%s435_s6] ss:$0 sm:$0xff] }
   0xa   :  { %v43_v6 = vsub.f32 1.0, %v42_v5  ;;  %192 = vmatpush.bf16.msra.mxu1 %v289_v35 }
   0xc   :  { %v44_v7 = vmul.f32 %v300_v4, %v43_v6 }
   0xe   :  { %v45_v8 = vadd.f32 %v300_v4, %v44_v7  ;;  %193 = vmatpush.bf16.msra.mxu1 %v288_v36 }
  0x10   :  { %v365_v9 = vsel %vm46_vm1, %v300_v4, %v45_v8 }
  0x12   :  { %194 = vmatpush.bf16.msra.mxu1 %v287_v37 }
  0x16   :  { %195 = vmatpush.bf16.msra.mxu1 %v286_v38 }
  0x1a   :  { %196 = vmatpush.bf16.msra.mxu1 %v285_v39 }
  0x1e   :  { %197 = vmatpush.bf16.msra.mxu1 %v284_v40 }
  0x78   :  { %v40_v10 = vpop.xlane.xlu0 %39 }
  0x79   :  { %v48_v11 = vmul.f32 %v365_v9, %v40_v10 }
  0x7b   :  { %v49_v12 = vsub.f32 %v361_v1, %v48_v11 }
  0x7d   :  { %v50_v13 = vmul.f32 %v49_v12, %v49_v12 }
  0x7f   :  { %v51_v14 = vsel %vm37_vm0, %v50_v13, 0.0 }
  0x80   :  { %52 = vadd.xlane.f32.xlu0 %v51_v14 }
  0xf3   :  { %v53_v18 = vpop.xlane.xlu0 %52 }
  0xf4   :  { %v54_v19 = vmul.f32 %v53_v18, %v365_v9 }
  0xf6   :  { %v55_v20 = vadd.f32 1e-05, %v54_v19 }
  0xf8   :  { %301 = vrsqrt.f32 %v55_v20  ;;  %vm62_vm3 = vweird.f32 %v55_v20 }
  0xfe   :  { %v302_v21 = vpop.eup %301 }
  0xff   :  { %v57_v22 = vmul.f32 %v302_v21, %v55_v20  ;;  %vm63_vm2 = vweird.f32 %v302_v21 }
 0x100   :  { %vm64_vm4 = vmor %vm62_vm3, %vm63_vm2 }
 0x101   :  { %v58_v23 = vmul.f32 %v302_v21, %v57_v22 }
 0x103   :  { %v59_v24 = vmul.f32 0.5, %v58_v23 }
 0x105   :  { %v60_v25 = vsub.f32 1.5, %v59_v24 }
 0x107   :  { %v61_v26 = vmul.f32 %v302_v21, %v60_v25 }
 0x109   :  { %v65_v28 = vsel %vm64_vm4, %v302_v21, %v61_v26 }
 0x10a   :  { %v66_v29 = vmul.f32 %v65_v28, %v49_v12  ;;  %v297_v12 = vld [vmem:[%s436_s7] ss:$0 sm:$0xff] }
 0x10c   :  { %v70_v31 = vmul.f32 %v293_v27, %v66_v29 }
 0x10e   :  { %v74_v32 = vadd.f32 %v294_v30, %v70_v31 }
 0x110   :  { %v75_v33 = vpack.c.bf16 %v74_v32, %v74_v32 }
 0x112   :  { %249 = vmatmul.msk.bf16.vlgmr.msra.gmra.mxu0 %vm37_vm0, %v75_v33 }
 0x18f   :  { %v108_v42 = vpop.f32.mrf.mxu0 }
 0x190   :  { %v109_v43 = vadd.f32 %v295_v41, %v108_v42 }
 0x192   :  { %v112_v44 = vmul.f32 %v109_v43, %v109_v43 }
 0x194   :  { %v113_v45 = vmul.f32 %v112_v44, %v109_v43 }
 0x196   :  { %v114_v46 = vmul.f32 0.044715, %v113_v45 }
 0x197   :  { %v110_v47 = vpop.f32.mrf.mxu0 }
 0x198   :  { %v115_v48 = vadd.f32 %v114_v46, %v109_v43 }
 0x19a   :  { %v116_v49 = vmul.f32 0.7978846, %v115_v48 }
 0x19c   :  { %303 = vtanh.f32 %v116_v49 }
 0x1a2   :  { %v304_v50 = vpop.eup %303 }
 0x1a3   :  { %v118_v51 = vadd.f32 1.0, %v304_v50 }
 0x1a5   :  { %v119_v52 = vmul.f32 0.5, %v118_v51 }
 0x1a7   :  { %v120_v53 = vmul.f32 %v119_v52, %v109_v43 }
 0x1a9   :  { %v121_v54 = vpack.c.bf16 %v120_v53, %v120_v53 }
 0x1ab   :  { %198 = vmatmul.bf16.vlgmr.msra.gmra.mxu1 %v121_v54 }
 0x228   :  { %v199_v56 = vpop.f32.mrf.mxu1 }
 0x229   :  { %v200_v57 = vadd.f32 %v296_v55, %v199_v56 }
 0x22b   :  { %v203_v58 = vadd.f32 %v200_v57, %v361_v1 }
 0x22d   :  { %v206_v59 = vsel %vm37_vm0, %v203_v58, 0.0 }
 0x22e   :  { %207 = vadd.xlane.f32.xlu1 %v206_v59 }
 0x230   :  { %v201_v60 = vpop.f32.mrf.mxu1 }
 0x2a1   :  { %v208_v61 = vpop.xlane.xlu1 %207 }
 0x2a2   :  { %v209_v62 = vmul.f32 %v208_v61, %v365_v9 }
 0x2a4   :  { %v210_v63 = vsub.f32 %v203_v58, %v209_v62 }
 0x2a6   :  { %v211_v0 = vmul.f32 %v210_v63, %v210_v63 }
 0x2a8   :  { %v212_v2 = vsel %vm37_vm0, %v211_v0, 0.0 }
 0x2a9   :  { %213 = vadd.xlane.f32.xlu1 %v212_v2 }
 0x31c   :  { %v214_v3 = vpop.xlane.xlu1 %213 }
 0x31d   :  { %v215_v4 = vmul.f32 %v214_v3, %v365_v9  ;;  %v298_v9 = vld [vmem:[%s437_s8] ss:$0 sm:$0xff] }
 0x31f   :  { %v216_v5 = vadd.f32 1e-05, %v215_v4 }
 0x321   :  { %305 = vrsqrt.f32 %v216_v5  ;;  %vm223_vm6 = vweird.f32 %v216_v5 }
 0x327   :  { %v306_v6 = vpop.eup %305 }
 0x328   :  { %v218_v7 = vmul.f32 %v306_v6, %v216_v5  ;;  %vm224_vm5 = vweird.f32 %v306_v6 }
 0x329   :  { %vm225_vm7 = vmor %vm223_vm6, %vm224_vm5 }
 0x32a   :  { %v219_v1 = vmul.f32 %v306_v6, %v218_v7 }
 0x32c   :  { %v220_v8 = vmul.f32 0.5, %v219_v1 }
 0x32e   :  { %v221_v10 = vsub.f32 1.5, %v220_v8 }
 0x330   :  { %v222_v11 = vmul.f32 %v306_v6, %v221_v10 }
 0x332   :  { %v226_v13 = vsel %vm225_vm7, %v306_v6, %v222_v11 }
 0x333   :  { %v227_v14 = vmul.f32 %v226_v13, %v210_v63 }
 0x335   :  { %v231_v15 = vmul.f32 %v297_v12, %v227_v14 }
 0x337   :  { %v235_v16 = vadd.f32 %v298_v9, %v231_v15 }
 0x339   :  { %236 = vst.msk [vmem:[%s438_s9] sm:$0xff] %vm37_vm0, %v235_v16 }

// kernel: cruller_forward.23
= control target key start
LH: loop header
LB: loop body
LE: loop exit
PB: predicated region body
PF: predicated region fallthrough
CT: control target
= control target key end

     0   :  { %vm31_vm0 = vcmask 261120   ;;  %v179_v5 = vmov 32.0   ;;  %vm95_vm6 = vcmask 257024   ;;  %s239_s0 = inlined_call_operand.vmem [shape: bf16[16,32], index: 0, kind: input, shape index: {}]   ;;  %s240_s1 = inlined_call_operand.vmem [shape: f32[1,32], index: 1, kind: input, shape index: {}]   ;;  %s241_s2 = inlined_call_operand.vmem [shape: f32[1,32], index: 2, kind: input, shape index: {}]   ;;  %s242_s4 = inlined_call_operand.vmem [shape: f32[1,128], index: 4, kind: input, shape index: {}]   ;;  %s243_s3 = inlined_call_operand.vmem [shape: bf16[32,128], index: 3, kind: input, shape index: {}]   ;;  %s244_s5 = inlined_call_operand.vmem [shape: f32[16,128], index: 5, kind: output, shape index: {}]  }
   0x1   :  { %v166_v0 = vld [vmem:[%s239_s0] sm:$0xff]   ;;  %173 = vrcp.f32 %v179_v5  ;;  %v164_v25 = vld [vmem:[%s243_s3 + $0x8] sm:$0xff] }
   0x2   :  { %v167_v1 = vunpack.c.l.bf16 %v166_v0  ;;  %v168_v3 = vunpack.c.h.bf16 %v166_v0  ;;  %135 = vmatpush.bf16.msra.mxu0 %v164_v25  ;;  %v163_v28 = vld [vmem:[%s243_s3] sm:$0xff] }
   0x3   :  { %v170_v38 = vld [vmem:[%s240_s1] ss:$0 sm:$0xff] }
   0x4   :  { %v32_v2 = vsel %vm31_vm0, %v167_v1, 0.0  ;;  %v35_v4 = vsel %vm31_vm0, %v168_v3, 0.0  ;;  %v171_v41 = vld [vmem:[%s241_s2] ss:$0 sm:$0xff] }
   0x5   :  { %33 = vadd.xlane.f32.xlu0 %v32_v2  ;;  %v172_v55 = vld [vmem:[%s242_s4] ss:$0 sm:$0xff] }
   0x6   :  { %136 = vmatpush.bf16.msra.mxu0 %v163_v28 }
   0x7   :  { %v174_v6 = vpop.eup %173 }
   0x8   :  { %v39_v7 = vmul.f32 32.0, %v174_v6  ;;  %vm43_vm1 = vweird.f32 %v174_v6 }
   0xa   :  { %v40_v8 = vsub.f32 1.0, %v39_v7 }
   0xc   :  { %v41_v9 = vmul.f32 %v174_v6, %v40_v8 }
   0xd   :  { %36 = vadd.xlane.f32.xlu0 %v35_v4 }
   0xe   :  { %v42_v10 = vadd.f32 %v174_v6, %v41_v9 }
  0x10   :  { %v44_v11 = vsel %vm43_vm1, %v174_v6, %v42_v10 }
  0x78   :  { %v34_v12 = vpop.xlane.xlu0 %33 }
  0x79   :  { %v45_v13 = vmul.f32 %v44_v11, %v34_v12 }
  0x7b   :  { %v47_v14 = vsub.f32 %v167_v1, %v45_v13 }
  0x7d   :  { %v49_v15 = vmul.f32 %v47_v14, %v47_v14 }
  0x7f   :  { %v51_v16 = vsel %vm31_vm0, %v49_v15, 0.0 }
  0x80   :  { %52 = vadd.xlane.f32.xlu1 %v51_v16  ;;  %v37_v17 = vpop.xlane.xlu0 %36 }
  0x81   :  { %v46_v18 = vmul.f32 %v44_v11, %v37_v17 }
  0x83   :  { %v48_v19 = vsub.f32 %v168_v3, %v46_v18 }
  0x85   :  { %v50_v20 = vmul.f32 %v48_v19, %v48_v19 }
  0x87   :  { %v54_v21 = vsel %vm31_vm0, %v50_v20, 0.0 }
  0x88   :  { %55 = vadd.xlane.f32.xlu1 %v54_v21 }
  0xf3   :  { %v53_v22 = vpop.xlane.xlu1 %52 }
  0xf4   :  { %v57_v23 = vmul.f32 %v53_v22, %v44_v11 }
  0xf6   :  { %v59_v24 = vadd.f32 1e-05, %v57_v23 }
  0xf8   :  { %175 = vrsqrt.f32 %v59_v24  ;;  %vm67_vm3 = vweird.f32 %v59_v24 }
  0xfb   :  { %v56_v26 = vpop.xlane.xlu1 %55 }
  0xfc   :  { %v58_v27 = vmul.f32 %v56_v26, %v44_v11 }
  0xfe   :  { %v176_v29 = vpop.eup %175  ;;  %v60_v30 = vadd.f32 1e-05, %v58_v27 }
  0xff   :  { %v62_v31 = vmul.f32 %v176_v29, %v59_v24  ;;  %vm68_vm2 = vweird.f32 %v176_v29 }
 0x100   :  { %177 = vrsqrt.f32 %v60_v30  ;;  %vm69_vm4 = vmor %vm67_vm3, %vm68_vm2  ;;  %vm77_vm7 = vweird.f32 %v60_v30 }
 0x101   :  { %v63_v32 = vmul.f32 %v176_v29, %v62_v31 }
 0x103   :  { %v64_v33 = vmul.f32 0.5, %v63_v32 }
 0x105   :  { %v65_v34 = vsub.f32 1.5, %v64_v33 }
 0x106   :  { %v178_v35 = vpop.eup %177 }
 0x107   :  { %v66_v36 = vmul.f32 %v176_v29, %v65_v34  ;;  %v72_v37 = vmul.f32 %v178_v35, %v60_v30  ;;  %vm78_vm5 = vweird.f32 %v178_v35 }
 0x108   :  { %vm79_vm8 = vmor %vm77_vm7, %vm78_vm5 }
 0x109   :  { %v70_v39 = vsel %vm69_vm4, %v176_v29, %v66_v36  ;;  %v73_v40 = vmul.f32 %v178_v35, %v72_v37 }
 0x10a   :  { %v81_v42 = vmul.f32 %v70_v39, %v47_v14 }
 0x10b   :  { %v74_v43 = vmul.f32 0.5, %v73_v40 }
 0x10c   :  { %v86_v44 = vmul.f32 %v170_v38, %v81_v42 }
 0x10d   :  { %v75_v45 = vsub.f32 1.5, %v74_v43 }
 0x10e   :  { %v91_v46 = vadd.f32 %v171_v41, %v86_v44 }
 0x10f   :  { %v76_v47 = vmul.f32 %v178_v35, %v75_v45 }
 0x110   :  { %v93_v48 = vpack.c.bf16 %v91_v46, %v91_v46 }
 0x111   :  { %v80_v49 = vsel %vm79_vm8, %v178_v35, %v76_v47 }
 0x112   :  { %96 = vst.msk [vmem:[#allocation2] sm:$0xf] %vm95_vm6, %v93_v48  ;;  %v82_v50 = vmul.f32 %v80_v49, %v48_v19 }
 0x114   :  { %v87_v51 = vmul.f32 %v170_v38, %v82_v50 }
 0x116   :  { %v92_v52 = vadd.f32 %v171_v41, %v87_v51 }
 0x118   :  { %v94_v53 = vpack.c.bf16 %v92_v52, %v92_v52 }
 0x11a   :  { %97 = vst.msk [vmem:[#allocation2 + $0x4] sm:$0xf] %vm95_vm6, %v94_v53 }
 0x121   :  { %v162_v54 = vld [vmem:[#allocation2] sm:$0xff] }
 0x122   :  { %161 = vmatmul.msk.bf16.vlgmr.msra.gmra.mxu0 %vm31_vm0, %v162_v54 }
 0x19f   :  { %v138_v56 = vpop.f32.mrf.mxu0 }
 0x1a0   :  { %v139_v57 = vadd.f32 %v172_v55, %v138_v56 }
 0x1a2   :  { %143 = vst [vmem:[%s244_s5] sm:$0xff] %v139_v57 }
 0x1a7   :  { %v140_v58 = vpop.f32.mrf.mxu0 }
 0x1a8   :  { %v141_v59 = vadd.f32 %v172_v55, %v140_v58 }
 0x1aa   :  { %144 = vst [vmem:[%s244_s5 + $0x8] sm:$0xff] %v141_v59 }

// kernel: cruller_forward.19
= control target key start
LH: loop header
LB: loop body
LE: loop exit
PB: predicated region body
PF: predicated region fallthrough
CT: control target
= control target key end

     0   :  { %vm33_vm0 = vcmask 261120   ;;  %v315_v5 = vmov 32.0   ;;  %vm238_vm8 = vcmask 257024   ;;  %s422_s0 = inlined_call_operand.vmem [shape: bf16[16,32], index: 0, kind: input, shape index: {}]   ;;  %s423_s1 = inlined_call_operand.vmem [shape: f32[1,32], index: 1, kind: input, shape index: {}]   ;;  %s424_s2 = inlined_call_operand.vmem [shape: f32[1,32], index: 2, kind: input, shape index: {}]   ;;  %s425_s4 = inlined_call_operand.vmem [shape: f32[1,128], index: 4, kind: input, shape index: {}]   ;;  %s426_s3 = inlined_call_operand.vmem [shape: bf16[32,128], index: 3, kind: input, shape index: {}]   ;;  %s427_s6 = inlined_call_operand.vmem [shape: f32[1,32], index: 6, kind: input, shape index: {}]   ;;  %s428_s5 = inlined_call_operand.vmem [shape: bf16[128,32], index: 5, kind: input, shape index: {}]   ;;  %s429_s7 = inlined_call_operand.vmem [shape: bf16[16,32], index: 7, kind: output, shape index: {}]  }
   0x1   :  { %v297_v0 = vld [vmem:[%s422_s0] sm:$0xff]   ;;  %305 = vrcp.f32 %v315_v5  ;;  %v287_v22 = vld [vmem:[%s426_s3 + $0x8] sm:$0xff]  ;;  %v295_v53 = vld [vmem:[%s428_s5 + $0x38] sm:$0xff] }
   0x2   :  { %v359_v1 = vunpack.c.l.bf16 %v297_v0  ;;  %v363_v3 = vunpack.c.h.bf16 %v297_v0  ;;  %125 = vmatpush.bf16.msra.mxu0 %v287_v22  ;;  %v286_v24 = vld [vmem:[%s426_s3] sm:$0xff]  ;;  %220 = vmatpush.bf16.msra.mxu1 %v295_v53  ;;  %v294_v54 = vld [vmem:[%s428_s5 + $0x30] sm:$0xff]  ;;  %v293_v55 = vld [vmem:[%s428_s5 + $0x28] sm:$0xff] }
   0x3   :  { %v301_v43 = vld [vmem:[%s423_s1] ss:$0 sm:$0xff]  ;;  %v291_v57 = vld [vmem:[%s428_s5 + $0x18] sm:$0xff]  ;;  %v290_v58 = vld [vmem:[%s428_s5 + $0x10] sm:$0xff] }
   0x4   :  { %v34_v2 = vsel %vm33_vm0, %v359_v1, 0.0  ;;  %v37_v4 = vsel %vm33_vm0, %v363_v3, 0.0  ;;  %v302_v48 = vld [vmem:[%s424_s2] ss:$0 sm:$0xff]  ;;  %v289_v59 = vld [vmem:[%s428_s5 + $0x8] sm:$0xff] }
   0x5   :  { %35 = vadd.xlane.f32.xlu0 %v34_v2  ;;  %v292_v56 = vld [vmem:[%s428_s5 + $0x20] sm:$0xff] }
   0x6   :  { %126 = vmatpush.bf16.msra.mxu0 %v286_v24  ;;  %221 = vmatpush.bf16.msra.mxu1 %v294_v54  ;;  %v303_v60 = vld [vmem:[%s425_s4] ss:$0 sm:$0xff] }
   0x7   :  { %v306_v6 = vpop.eup %305  ;;  %v288_v61 = vld [vmem:[%s428_s5] sm:$0xff] }
   0x8   :  { %v41_v7 = vmul.f32 32.0, %v306_v6  ;;  %vm45_vm1 = vweird.f32 %v306_v6 }
   0xa   :  { %v42_v8 = vsub.f32 1.0, %v41_v7  ;;  %222 = vmatpush.bf16.msra.mxu1 %v293_v55 }
   0xc   :  { %v43_v9 = vmul.f32 %v306_v6, %v42_v8 }
   0xd   :  { %38 = vadd.xlane.f32.xlu0 %v37_v4 }
   0xe   :  { %v44_v10 = vadd.f32 %v306_v6, %v43_v9  ;;  %223 = vmatpush.bf16.msra.mxu1 %v292_v56 }
  0x10   :  { %v46_v11 = vsel %vm45_vm1, %v306_v6, %v44_v10 }
  0x12   :  { %224 = vmatpush.bf16.msra.mxu1 %v291_v57 }
  0x16   :  { %225 = vmatpush.bf16.msra.mxu1 %v290_v58 }
  0x1a   :  { %226 = vmatpush.bf16.msra.mxu1 %v289_v59 }
  0x1e   :  { %227 = vmatpush.bf16.msra.mxu1 %v288_v61 }
  0x78   :  { %v36_v12 = vpop.xlane.xlu0 %35 }
  0x79   :  { %v47_v13 = vmul.f32 %v46_v11, %v36_v12 }
  0x7b   :  { %v49_v14 = vsub.f32 %v359_v1, %v47_v13 }
  0x7d   :  { %v51_v15 = vmul.f32 %v49_v14, %v49_v14 }
  0x7f   :  { %v53_v16 = vsel %vm33_vm0, %v51_v15, 0.0 }
  0x80   :  { %54 = vadd.xlane.f32.xlu1 %v53_v16  ;;  %v39_v17 = vpop.xlane.xlu0 %38 }
  0x81   :  { %v48_v18 = vmul.f32 %v46_v11, %v39_v17 }
  0x83   :  { %v50_v19 = vsub.f32 %v363_v3, %v48_v18 }
  0x85   :  { %v52_v20 = vmul.f32 %v50_v19, %v50_v19 }
  0x87   :  { %v56_v21 = vsel %vm33_vm0, %v52_v20, 0.0 }
  0x88   :  { %57 = vadd.xlane.f32.xlu1 %v56_v21 }
  0xf3   :  { %v55_v23 = vpop.xlane.xlu1 %54 }
  0xf4   :  { %v59_v25 = vmul.f32 %v55_v23, %v46_v11  ;;  %v304_v23 = vld [vmem:[%s427_s6] ss:$0 sm:$0xff] }
  0xf6   :  { %v61_v26 = vadd.f32 1e-05, %v59_v25 }
  0xf8   :  { %307 = vrsqrt.f32 %v61_v26  ;;  %vm69_vm3 = vweird.f32 %v61_v26 }
  0xfb   :  { %v58_v27 = vpop.xlane.xlu1 %57 }
  0xfc   :  { %v60_v28 = vmul.f32 %v58_v27, %v46_v11 }
  0xfe   :  { %v308_v29 = vpop.eup %307  ;;  %v62_v30 = vadd.f32 1e-05, %v60_v28 }
  0xff   :  { %v64_v31 = vmul.f32 %v308_v29, %v61_v26  ;;  %vm70_vm2 = vweird.f32 %v308_v29 }
 0x100   :  { %309 = vrsqrt.f32 %v62_v30  ;;  %vm71_vm4 = vmor %vm69_vm3, %vm70_vm2  ;;  %vm79_vm6 = vweird.f32 %v62_v30 }
 0x101   :  { %v65_v32 = vmul.f32 %v308_v29, %v64_v31 }
 0x103   :  { %v66_v33 = vmul.f32 0.5, %v65_v32 }
 0x105   :  { %v67_v34 = vsub.f32 1.5, %v66_v33 }
 0x106   :  { %v310_v35 = vpop.eup %309 }
 0x107   :  { %v68_v36 = vmul.f32 %v308_v29, %v67_v34  ;;  %v74_v37 = vmul.f32 %v310_v35, %v62_v30  ;;  %vm80_vm5 = vweird.f32 %v310_v35 }
 0x108   :  { %vm81_vm7 = vmor %vm79_vm6, %vm80_vm5 }
 0x109   :  { %v75_v38 = vmul.f32 %v310_v35, %v74_v37  ;;  %v72_v39 = vsel %vm71_vm4, %v308_v29, %v68_v36 }
 0x10a   :  { %v83_v42 = vmul.f32 %v72_v39, %v49_v14 }
 0x10b   :  { %v76_v40 = vmul.f32 0.5, %v75_v38 }
 0x10c   :  { %v88_v47 = vmul.f32 %v301_v43, %v83_v42 }
 0x10d   :  { %v77_v41 = vsub.f32 1.5, %v76_v40 }
 0x10e   :  { %v93_v50 = vadd.f32 %v302_v48, %v88_v47 }
 0x10f   :  { %v78_v44 = vmul.f32 %v310_v35, %v77_v41 }
 0x111   :  { %v82_v45 = vsel %vm81_vm7, %v310_v35, %v78_v44 }
 0x112   :  { %v84_v46 = vmul.f32 %v82_v45, %v50_v19 }
 0x114   :  { %v89_v49 = vmul.f32 %v301_v43, %v84_v46 }
 0x116   :  { %v94_v51 = vadd.f32 %v302_v48, %v89_v49 }
 0x118   :  { %v95_v52 = vpack.c.bf16 %v94_v51, %v93_v50 }
 0x11a   :  { %253 = vmatmul.msk.bf16.vlgmr.msra.gmra.mxu0 %vm33_vm0, %v95_v52 }
 0x197   :  { %v128_v62 = vpop.f32.mrf.mxu0 }
 0x198   :  { %v129_v63 = vadd.f32 %v303_v60, %v128_v62 }
 0x19a   :  { %v133_v0 = vmul.f32 %v129_v63, %v129_v63 }
 0x19c   :  { %v135_v2 = vmul.f32 %v133_v0, %v129_v63 }
 0x19e   :  { %v137_v4 = vmul.f32 0.044715, %v135_v2 }
 0x19f   :  { %v130_v5 = vpop.f32.mrf.mxu0 }
 0x1a0   :  { %v139_v6 = vadd.f32 %v137_v4, %v129_v63  ;;  %v131_v7 = vadd.f32 %v303_v60, %v130_v5 }
 0x1a2   :  { %v134_v8 = vmul.f32 %v131_v7, %v131_v7  ;;  %v141_v9 = vmul.f32 0.7978846, %v139_v6 }
 0x1a4   :  { %v136_v10 = vmul.f32 %v134_v8, %v131_v7  ;;  %311 = vtanh.f32 %v141_v9 }
 0x1a6   :  { %v138_v11 = vmul.f32 0.044715, %v136_v10 }
 0x1a8   :  { %v140_v12 = vadd.f32 %v138_v11, %v131_v7 }
 0x1aa   :  { %v142_v13 = vmul.f32 0.7978846, %v140_v12  ;;  %v312_v14 = vpop.eup %311 }
 0x1ab   :  { %v145_v15 = vadd.f32 1.0, %v312_v14 }
 0x1ac   :  { %313 = vtanh.f32 %v142_v13 }
 0x1ad   :  { %v147_v18 = vmul.f32 0.5, %v145_v15 }
 0x1af   :  { %v149_v20 = vmul.f32 %v147_v18, %v129_v63 }
 0x1b2   :  { %v314_v16 = vpop.eup %313 }
 0x1b3   :  { %v146_v17 = vadd.f32 1.0, %v314_v16 }
 0x1b5   :  { %v148_v19 = vmul.f32 0.5, %v146_v17 }
 0x1b7   :  { %v150_v21 = vmul.f32 %v148_v19, %v131_v7 }
 0x1b9   :  { %v151_v22 = vpack.c.bf16 %v150_v21, %v149_v20 }
 0x1bb   :  { %228 = vmatmul.bf16.vlgmr.msra.gmra.mxu1 %v151_v22 }
 0x238   :  { %v229_v24 = vpop.f32.mrf.mxu1 }
 0x239   :  { %v230_v25 = vadd.f32 %v304_v23, %v229_v24 }
 0x23b   :  { %v234_v26 = vadd.f32 %v359_v1, %v230_v25 }
 0x23d   :  { %v236_v27 = vpack.c.bf16 %v234_v26, %v234_v26 }
 0x23f   :  { %239 = vst.msk [vmem:[%s429_s7] sm:$0xf] %vm238_vm8, %v236_v27 }
 0x240   :  { %v231_v28 = vpop.f32.mrf.mxu1 }
 0x241   :  { %v232_v29 = vadd.f32 %v304_v23, %v231_v28 }
 0x243   :  { %v235_v30 = vadd.f32 %v363_v3, %v232_v29 }
 0x245   :  { %v237_v31 = vpack.c.bf16 %v235_v30, %v235_v30 }
 0x247   :  { %240 = vst.msk [vmem:[%s429_s7 + $0x4] sm:$0xf] %vm238_vm8, %v237_v31 }

// kernel: cruller_forward.17
= control target key start
LH: loop header
LB: loop body
LE: loop exit
PB: predicated region body
PF: predicated region fallthrough
CT: control target
= control target key end

     0   :  { %s867_s24 = smov 0   ;;  %s962_s0 = inlined_call_operand.vmem [shape: bf16[2,8,32], index: 0, kind: input, shape index: {}]   ;;  %s963_s1 = inlined_call_operand.vmem [shape: f32[1,32], index: 1, kind: input, shape index: {}]   ;;  %s964_s2 = inlined_call_operand.vmem [shape: f32[1,32], index: 2, kind: input, shape index: {}]   ;;  %s965_s3 = inlined_call_operand.vmem [shape: bf16[32,96], index: 3, kind: input, shape index: {}]   ;;  %s966_s4 = inlined_call_operand.vmem [shape: f32[1,96], index: 4, kind: input, shape index: {}]   ;;  %s967_s5 = inlined_call_operand.vmem [shape: bf16[32,32], index: 5, kind: input, shape index: {}]   ;;  %s968_s6 = inlined_call_operand.vmem [shape: f32[1,32], index: 6, kind: input, shape index: {}]   ;;  %s969_s7 = inlined_call_operand.vmem [shape: bf16[2,8,32], index: 7, kind: output, shape index: {}]  }
   0x1 LB: > { %s716_s25 = sadd.s32 4294967295, %s809_s24   ;;  %p720_p0 = scmp.ge.s32.totalorder %s809_s24, 1  ;;  %s809_s24 = sphi %s867_s24, %s17_s24  }
   0x2   : > { %p236_p1 = scmp.lt.s32.totalorder %s809_s24, 3 }
   0x4   : > { %p237_p2 = pnand %p720_p0, %p236_p1 }
   0x5   : > { %p266_p3 = scmp.lt.s32.totalorder (!%p237_p2), %s716_s25, 1  ;;  %s812_s17 = smov (!%p237_p2), 104  }
   0x6   : > { %240 = sbr.rel (%p237_p2) target bundleno = 1236 (0x4d4), region = 48  ;;  %s813_s18 = smov (!%p237_p2), 120  }
   0x7   : > { %s814_s19 = smov (!%p237_p2), 96   ;;  %s815_s20 = smov (!%p237_p2), 56  }
   0x8   : > { %s816_s21 = smov (!%p237_p2), 72   ;;  %s817_s22 = smov (!%p237_p2), 88  }
   0x9   : > { %s818_s23 = smov (!%p237_p2), 112   ;;  %s819_s27 = smov (!%p237_p2), 80  }
   0xa   : > { %s820_s28 = smov (!%p237_p2), 64   ;;  %s823_s30 = smov (!%p237_p2), 48  }
   0xb   : > { %s971_s25 = smov (!%p266_p3, %s716_s25), 1  ;;  %vm279_vm0 = vcmask 261120   ;;  %v811_v3 = vmov 32.0   ;;  %v752_v15 = vld [vmem:[%s965_s3 + $0x8] sm:$0xff]  ;;  %v751_v16 = vld [vmem:[%s965_s3] sm:$0xff]  ;;  %vm408_vm5 = vcmask 1043456   ;;  %v355_v55 = vlaneseq }
   0xc   : > { %s721_s26 = sshll.u32 %s971_s25, 2  ;;  %783 = vrcp.f32 %v811_v3  ;;  %347 = vmatpush.bf16.msra.mxu0 %v752_v15  ;;  %v779_v26 = vld [vmem:[%s963_s1] ss:$0 sm:$0xff]  ;;  %vm371_vm6 = vcmask 64512   ;;  %v821_v59 = vmov -1e+30  }
   0xd   : > { %s269_s29 = scalar_lea.vmem %s962_s0, %s721_s26  ;;  %v780_v29 = vld [vmem:[%s964_s2] ss:$0 sm:$0xff]  ;;  %v356_v56 = vshrl.u32 %v355_v55, 7  ;;  %v358_v57 = vand.u32 127, %v355_v55  ;;  %s824_s8 = smov 16   ;;  %vm623_vm8 = vcmask 130048  }
   0xe   : > { %v275_v0 = vld [vmem:[%s269_s29] sm:$0xf]  ;;  %s822_s29 = smov 40   ;;  %s825_s9 = smov 8   ;;  %vm626_vm9 = vcmask 195584   ;;  %vm661_vm10 = vcmask 257024  }
   0xf   : > { %v883_v1 = vunpack.c.l.bf16 %v275_v0  ;;  %v781_v33 = vld [vmem:[%s966_s4] ss:$0 sm:$0xff]  ;;  %vm359_vm7 = vcmp.le.s32.totalorder %v358_v57, %v356_v56  ;;  %s826_s10 = smov 24  }
  0x10   : > { %348 = vmatpush.bf16.msra.mxu0 %v751_v16  ;;  %v360_v60 = vsel %vm359_vm7, 0.0, %v821_v59 }
  0x11   : > { %v280_v2 = vsel %vm279_vm0, %v883_v1, 0.0 }
  0x12   : > { %281 = vadd.xlane.f32.xlu0 %v280_v2  ;;  %v784_v4 = vpop.eup %783 }
  0x13   : > { %v284_v5 = vmul.f32 32.0, %v784_v4  ;;  %vm288_vm1 = vweird.f32 %v784_v4 }
  0x15   : > { %v285_v6 = vsub.f32 1.0, %v284_v5 }
  0x17   : > { %v286_v7 = vmul.f32 %v784_v4, %v285_v6 }
  0x19   : > { %v287_v8 = vadd.f32 %v784_v4, %v286_v7 }
  0x1b   : > { %v289_v9 = vsel %vm288_vm1, %v784_v4, %v287_v8 }
  0x85   : > { %v282_v10 = vpop.xlane.xlu0 %281 }
  0x86   : > { %v290_v11 = vmul.f32 %v289_v9, %v282_v10 }
  0x88   : > { %v291_v12 = vsub.f32 %v883_v1, %v290_v11 }
  0x8a   : > { %v292_v13 = vmul.f32 %v291_v12, %v291_v12 }
  0x8c   : > { %v293_v14 = vsel %vm279_vm0, %v292_v13, 0.0 }
  0x8d   : > { %294 = vadd.xlane.f32.xlu0 %v293_v14 }
 0x100   : > { %v295_v17 = vpop.xlane.xlu0 %294 }
 0x101   : > { %v296_v18 = vmul.f32 %v295_v17, %v289_v9 }
 0x103   : > { %v297_v19 = vadd.f32 1e-05, %v296_v18 }
 0x105   : > { %785 = vrsqrt.f32 %v297_v19  ;;  %vm304_vm3 = vweird.f32 %v297_v19 }
 0x10b   : > { %v786_v20 = vpop.eup %785 }
 0x10c   : > { %v299_v21 = vmul.f32 %v786_v20, %v297_v19  ;;  %vm305_vm2 = vweird.f32 %v786_v20 }
 0x10d   : > { %vm306_vm4 = vmor %vm304_vm3, %vm305_vm2 }
 0x10e   : > { %v300_v22 = vmul.f32 %v786_v20, %v299_v21 }
 0x110   : > { %v301_v23 = vmul.f32 0.5, %v300_v22 }
 0x112   : > { %v302_v24 = vsub.f32 1.5, %v301_v23 }
 0x114   : > { %v303_v25 = vmul.f32 %v786_v20, %v302_v24 }
 0x116   : > { %v307_v27 = vsel %vm306_vm4, %v786_v20, %v303_v25 }
 0x117   : > { %v308_v28 = vmul.f32 %v307_v27, %v291_v12 }
 0x119   : > { %v312_v30 = vmul.f32 %v779_v26, %v308_v28 }
 0x11b   : > { %v316_v31 = vadd.f32 %v780_v29, %v312_v30 }
 0x11d   : > { %v317_v32 = vpack.c.bf16 %v316_v31, %v316_v31 }
 0x11f   : > { %731 = vmatmul.msk.bf16.vlgmr.msra.gmra.mxu0 %vm279_vm0, %v317_v32 }
 0x19c   : > { %v350_v34 = vpop.f32.mrf.mxu0 }
 0x19d   : > { %v351_v35 = vadd.f32 %v781_v33, %v350_v34 }
 0x19f   : > { %v354_v36 = vpack.c.bf16 %v351_v35, %v351_v35 }
 0x1a1   : > { %v367_v37 = vunpack.c.l.b16 %v354_v36 }
 0x1a3   : > { %v905_v38 = vpack.c.b16 %v367_v37, %v367_v37 }
 0x1a4   : > { %v352_v39 = vpop.f32.mrf.mxu0 }
 0x1a5   : > { %546 = vrot.lane.b32.xlu0 %v905_v38, %s812_s17  ;;  %428 = vrot.lane.b32.xlu2 %v905_v38, %s813_s18 }
 0x1a6   : > { %369 = vrot.lane.b32.xlu1 %v905_v38, %s814_s19  ;;  %s273_s19 = scalar_lea.vmem %s969_s7, %s721_s26 }
 0x1ad   : > { %463 = vrot.lane.b32.xlu0 %v905_v38, %s815_s20  ;;  %548 = vrot.lane.b32.xlu2 %v905_v38, %s816_s21 }
 0x1ae   : > { %430 = vrot.lane.b32.xlu1 %v905_v38, %s817_s22 }
 0x1b5   : > { %487 = vrot.lane.b32.xlu2 %v905_v38, %s818_s23 }
 0x1b6   : > { %489 = vrot.lane.b32.xlu1 %v905_v38, %s819_s27 }
 0x1bd   : > { %403 = vrot.lane.b32.xlu2 %v905_v38, %s820_s28 }
 0x1ff   : > { %v429_v40 = vpop.permute.xlu2 %428 }
 0x207   : > { %v549_v41 = vpop.permute.xlu2 %548 }
 0x208   : > { %v554_v52 = vsel %vm371_vm6, %v549_v41, 0 }
 0x20f   : > { %v488_v42 = vpop.permute.xlu2 %487 }
 0x217   : > { %v547_v43 = vpop.permute.xlu0 %546  ;;  %v404_v44 = vpop.permute.xlu2 %403 }
 0x218   : > { %v370_v45 = vpop.permute.xlu1 %369  ;;  %v410_v46 = vsel %vm408_vm5, %v404_v44, 0 }
 0x219   : > { %v376_v47 = vsel %vm371_vm6, %v370_v45, 0  ;;  %419 = vmatpush.bf16.msra.mxu2 %v410_v46 }
 0x21a   : > { %385 = vmatpush.bf16.xpose.msra.mxu1 %v376_v47 }
 0x21f   : > { %v464_v48 = vpop.permute.xlu0 %463 }
 0x220   : > { %v431_v49 = vpop.permute.xlu1 %430  ;;  %v469_v50 = vsel %vm408_vm5, %v464_v48, 0 }
 0x221   : > { %732 = vmatmul.msk.bf16.vlgmr.msra.gmra.mxu1 %vm371_vm6, %v354_v36  ;;  %v436_v51 = vsel %vm371_vm6, %v431_v49, 0  ;;  %478 = vmatpush.bf16.msrb.mxu2 %v469_v50 }
 0x222   : > { %445 = vmatpush.bf16.xpose.msra.mxu3 %v436_v51 }
 0x228   : > { %v490_v53 = vpop.permute.xlu1 %489 }
 0x229   : > { %734 = vmatmul.msk.bf16.vlgmr.msra.gmra.mxu3 %vm371_vm6, %v429_v40  ;;  %v495_v54 = vsel %vm371_vm6, %v490_v53, 0 }
 0x22a   : > { %563 = vmatpush.bf16.xpose.msrb.mxu3 %v554_v52  ;;  %504 = vmatpush.bf16.xpose.msrb.mxu0 %v495_v54 }
 0x231   : > { %736 = vmatmul.msk.bf16.vlgmr.msrb.gmra.mxu0 %vm371_vm6, %v488_v42 }
 0x239   : > { %738 = vmatmul.msk.bf16.vlgmr.msrb.gmra.mxu3 %vm371_vm6, %v547_v43 }
 0x29e   : > { %v387_v58 = vpop.f32.mrf.mxu1 }
 0x29f   : > { %v391_v61 = vmul.f32 0.35355338, %v387_v58 }
 0x2a1   : > { %v392_v62 = vadd.f32 %v391_v61, %v360_v60 }
 0x2a3   : > { %v393_v63 = vsel %vm371_vm6, %v392_v62, -inf }
 0x2a4   : > { %394 = vmax.xlane.f32.xlu1 %v393_v63 }
 0x2a6   : > { %v389_v0 = vpop.f32.mrf.mxu1 }
 0x2ac   : > { %v447_v2 = vpop.f32.mrf.mxu3 }
 0x2ad   : > { %v451_v3 = vmul.f32 0.35355338, %v447_v2 }
 0x2ae   : > { %v506_v4 = vpop.f32.mrf.mxu0 }
 0x2af   : > { %v510_v5 = vmul.f32 0.35355338, %v506_v4  ;;  %v452_v6 = vadd.f32 %v451_v3, %v360_v60 }
 0x2b1   : > { %v453_v7 = vsel %vm371_vm6, %v452_v6, -inf  ;;  %v511_v8 = vadd.f32 %v510_v5, %v360_v60 }
 0x2b2   : > { %454 = vmax.xlane.f32.xlu2 %v453_v7 }
 0x2b3   : > { %v512_v9 = vsel %vm371_vm6, %v511_v8, -inf }
 0x2b4   : > { %v449_v10 = vpop.f32.mrf.mxu3  ;;  %513 = vmax.xlane.f32.xlu1 %v512_v9  ;;  %v753_v9 = vld [vmem:[%s967_s5] sm:$0xff] }
 0x2b6   : > { %v508_v11 = vpop.f32.mrf.mxu0 }
 0x2bc   : > { %v565_v12 = vpop.f32.mrf.mxu3 }
 0x2bd   : > { %v569_v13 = vmul.f32 0.35355338, %v565_v12 }
 0x2bf   : > { %v570_v14 = vadd.f32 %v569_v13, %v360_v60 }
 0x2c1   : > { %v571_v15 = vsel %vm371_vm6, %v570_v14, -inf }
 0x2c2   : > { %572 = vmax.xlane.f32.xlu0 %v571_v15 }
 0x2c4   : > { %v567_v16 = vpop.f32.mrf.mxu3 }
 0x2ca   : > { %581 = vrot.lane.b32.xlu2 %v905_v38, %s822_s29 }
 0x2cd   : > { %522 = vrot.lane.b32.xlu1 %v905_v38, %s823_s30 }
 0x317   : > { %v395_v17 = vpop.xlane.xlu1 %394 }
 0x318   : > { %v396_v18 = vsub.f32 %v392_v62, %v395_v17 }
 0x31a   : > { %v397_v19 = vmul.f32 1.442695, %v396_v18 }
 0x31c   : > { %787 = vpow2.f32 %v397_v19 }
 0x322   : > { %v788_v20 = vpop.eup %787 }
 0x323   : > { %v399_v21 = vsel %vm371_vm6, %v788_v20, 0.0  ;;  %v402_v22 = vpack.c.bf16 %v788_v20, %v788_v20  ;;  %v782_v20 = vld [vmem:[%s968_s6] ss:$0 sm:$0xff] }
 0x324   : > { %400 = vadd.xlane.f32.xlu1 %v399_v21 }
 0x325   : > { %v455_v23 = vpop.xlane.xlu2 %454  ;;  %733 = vmatmul.msk.bf16.vlgmr.msra.gmra.mxu2 %vm371_vm6, %v402_v22 }
 0x326   : > { %v456_v24 = vsub.f32 %v452_v6, %v455_v23 }
 0x327   : > { %v514_v25 = vpop.xlane.xlu1 %513 }
 0x328   : > { %v457_v26 = vmul.f32 1.442695, %v456_v24  ;;  %v515_v27 = vsub.f32 %v511_v8, %v514_v25  ;;  %v754_v8 = vld [vmem:[%s967_s5 + $0x8] sm:$0xff] }
 0x329   : > { %652 = vmatpush.bf16.msra.mxu0 %v754_v8 }
 0x32a   : > { %789 = vpow2.f32 %v457_v26  ;;  %v516_v28 = vmul.f32 1.442695, %v515_v27 }
 0x32c   : > { %791 = vpow2.f32 %v516_v28 }
 0x32d   : > { %v582_v29 = vpop.permute.xlu2 %581  ;;  %653 = vmatpush.bf16.msra.mxu0 %v753_v9 }
 0x32e   : > { %v587_v30 = vsel %vm408_vm5, %v582_v29, 0 }
 0x32f   : > { %596 = vmatpush.bf16.msra.mxu2 %v587_v30 }
 0x330   : > { %v790_v31 = vpop.eup %789 }
 0x331   : > { %v462_v34 = vpack.c.bf16 %v790_v31, %v790_v31  ;;  %v459_v38 = vsel %vm371_vm6, %v790_v31, 0.0 }
 0x332   : > { %v792_v32 = vpop.eup %791 }
 0x333   : > { %v518_v33 = vsel %vm371_vm6, %v792_v32, 0.0  ;;  %v521_v43 = vpack.c.bf16 %v792_v32, %v792_v32 }
 0x334   : > { %519 = vadd.xlane.f32.xlu0 %v518_v33 }
 0x335   : > { %v573_v35 = vpop.xlane.xlu0 %572  ;;  %735 = vmatmul.msk.bf16.vlgmr.msrb.gmra.mxu2 %vm371_vm6, %v462_v34 }
 0x336   : > { %v574_v36 = vsub.f32 %v570_v14, %v573_v35 }
 0x338   : > { %v575_v37 = vmul.f32 1.442695, %v574_v36 }
 0x33a   : > { %793 = vpow2.f32 %v575_v37 }
 0x33c   : > { %460 = vadd.xlane.f32.xlu0 %v459_v38 }
 0x33f   : > { %v523_v39 = vpop.permute.xlu1 %522 }
 0x340   : > { %v794_v40 = vpop.eup %793  ;;  %v528_v41 = vsel %vm408_vm5, %v523_v39, 0 }
 0x341   : > { %537 = vmatpush.bf16.msrb.mxu1 %v528_v41  ;;  %v577_v42 = vsel %vm371_vm6, %v794_v40, 0.0  ;;  %v580_v44 = vpack.c.bf16 %v794_v40, %v794_v40 }
 0x342   : > { %578 = vadd.xlane.f32.xlu2 %v577_v42 }
 0x344   : > { %737 = vmatmul.msk.bf16.vlgmr.msrb.gmra.mxu1 %vm371_vm6, %v521_v43 }
 0x345   : > { %739 = vmatmul.msk.bf16.vlgmr.msra.gmra.mxu2 %vm371_vm6, %v580_v44 }
 0x397   : > { %v401_v10 = vpop.xlane.xlu1 %400 }
 0x3a7   : > { %v520_v46 = vpop.xlane.xlu0 %519 }
 0x3a8   : > { %v421_v45 = vpop.f32.mrf.mxu2  ;;  %795 = vrcp.f32 %v520_v46 }
 0x3ae   : > { %v796_v51 = vpop.eup %795 }
 0x3af   : > { %v461_v49 = vpop.xlane.xlu0 %460 }
 0x3b0   : > { %v423_v47 = vpop.f32.mrf.mxu2  ;;  %797 = vrcp.f32 %v461_v49 }
 0x3b5   : > { %v579_v53 = vpop.xlane.xlu2 %578 }
 0x3b6   : > { %v798_v55 = vpop.eup %797  ;;  %799 = vrcp.f32 %v579_v53 }
 0x3b7   : > { %801 = vrcp.f32 %v401_v10 }
 0x3b8   : > { %v480_v48 = vpop.f32.mrf.mxu2 }
 0x3b9   : > { %v485_v56 = vmul.f32 %v798_v55, %v480_v48 }
 0x3bb   : > { %v486_v59 = vpack.c.bf16 %v485_v56, %v485_v56 }
 0x3bc   : > { %v800_v63 = vpop.eup %799 }
 0x3bd   : > { %v606_v0 = vunpack.c.l.b16 %v486_v59  ;;  %v802_v12 = vpop.eup %801 }
 0x3be   : > { %v426_v13 = vmul.f32 %v802_v12, %v421_v45 }
 0x3bf   : > { %v607_v3 = vpack.c.b16 %v606_v0, %v606_v0 }
 0x3c0   : > { %v482_v50 = vpop.f32.mrf.mxu2  ;;  %v427_v15 = vpack.c.bf16 %v426_v13, %v426_v13 }
 0x3c1   : > { %v539_v52 = vpop.f32.mrf.mxu1 }
 0x3c2   : > { %v544_v54 = vmul.f32 %v796_v51, %v539_v52 }
 0x3c4   : > { %v545_v57 = vpack.c.bf16 %v544_v54, %v544_v54 }
 0x3c6   : > { %v611_v58 = vunpack.c.l.b16 %v545_v57 }
 0x3c8   : > { %v612_v60 = vpack.c.b16 %v611_v58, %v611_v58  ;;  %v598_v61 = vpop.f32.mrf.mxu2 }
 0x3c9   : > { %v541_v62 = vpop.f32.mrf.mxu1  ;;  %v603_v2 = vmul.f32 %v800_v63, %v598_v61 }
 0x3ca   : > { %613 = vrot.lane.b32.xlu0 %v612_v60, %s824_s8 }
 0x3cb   : > { %v604_v4 = vpack.c.bf16 %v603_v2, %v603_v2 }
 0x3cd   : > { %v616_v6 = vunpack.c.l.b16 %v604_v4 }
 0x3cf   : > { %v617_v7 = vpack.c.b16 %v616_v6, %v616_v6 }
 0x3d0   : > { %v600_v5 = vpop.f32.mrf.mxu2 }
 0x3d2   : > { %608 = vrot.lane.b32.xlu0 %v607_v3, %s825_s9 }
 0x3da   : > { %618 = vrot.lane.b32.xlu0 %v617_v7, %s826_s10 }
 0x43c   : > { %v614_v11 = vpop.permute.xlu0 %613 }
 0x444   : > { %v609_v14 = vpop.permute.xlu0 %608 }
 0x445   : > { %v622_v16 = vsel %vm371_vm6, %v427_v15, %v609_v14 }
 0x446   : > { %v625_v18 = vsel %vm623_vm8, %v622_v16, %v614_v11 }
 0x44c   : > { %v619_v17 = vpop.permute.xlu0 %618 }
 0x44d   : > { %v628_v19 = vsel %vm626_vm9, %v625_v18, %v619_v17 }
 0x44e   : > { %748 = vmatmul.msk.bf16.vlgmr.msra.gmra.mxu0 %vm279_vm0, %v628_v19 }
 0x4cb   : > { %v655_v21 = vpop.f32.mrf.mxu0 }
 0x4cc   : > { %v656_v22 = vadd.f32 %v782_v20, %v655_v21 }
 0x4ce   : > { %v659_v23 = vadd.f32 %v656_v22, %v883_v1 }
 0x4d0   : > { %v660_v24 = vpack.c.bf16 %v659_v23, %v659_v23 }
 0x4d2   : > { %662 = vst.msk [vmem:[%s273_s19] sm:$0xf] %vm661_vm10, %v660_v24 }
 0x4d3   : > { %v657_v25 = vpop.f32.mrf.mxu0 }
 0x4d4 PF: > { %s17_s24 = sadd.s32 1, %s809_s24  }
 0x4d5   : > { %p14_p4 = scmp.ge.s32.totalorder %s17_s24, 4  }
 0x4d7   :  { %16 = sbr.rel (!%p14_p4) target bundleno = 1 (0x1), region = 78 }

// kernel: cruller_forward.18
= control target key start
LH: loop header
LB: loop body
LE: loop exit
PB: predicated region body
PF: predicated region fallthrough
CT: control target
= control target key end

     0   :  { %s1025_s13 = smov 0   ;;  %s1133_s0 = inlined_call_operand.vmem [shape: bf16[2,8,32], index: 0, kind: input, shape index: {}]   ;;  %s1134_s1 = inlined_call_operand.vmem [shape: bf16[2,4,32], index: 1, kind: input, shape index: {}]   ;;  %s1135_s2 = inlined_call_operand.vmem [shape: f32[1,32], index: 2, kind: input, shape index: {}]   ;;  %s1136_s3 = inlined_call_operand.vmem [shape: f32[1,32], index: 3, kind: input, shape index: {}]   ;;  %s1137_s4 = inlined_call_operand.vmem [shape: bf16[32,32], index: 4, kind: input, shape index: {}]   ;;  %s1138_s5 = inlined_call_operand.vmem [shape: f32[1,32], index: 5, kind: input, shape index: {}]   ;;  %s1139_s6 = inlined_call_operand.vmem [shape: bf16[32,64], index: 6, kind: input, shape index: {}]   ;;  %s1140_s7 = inlined_call_operand.vmem [shape: f32[1,64], index: 7, kind: input, shape index: {}]   ;;  %s1141_s8 = inlined_call_operand.vmem [shape: bf16[32,32], index: 8, kind: input, shape index: {}]   ;;  %s1142_s9 = inlined_call_operand.vmem [shape: f32[1,32], index: 9, kind: input, shape index: {}]   ;;  %s1143_s10 = inlined_call_operand.vmem [shape: bf16[2,8,32], index: 10, kind: output, shape index: {}]  }
   0x1 LB: > { %s856_s14 = sadd.s32 4294967295, %s957_s13   ;;  %p860_p0 = scmp.ge.s32.totalorder %s957_s13, 1  ;;  %s957_s13 = sphi %s1025_s13, %s20_s13  }
   0x2   : > { %p320_p1 = scmp.lt.s32.totalorder %s957_s13, 3 }
   0x4   : > { %p321_p2 = pnand %p860_p0, %p320_p1 }
   0x5   : > { %p360_p3 = scmp.lt.s32.totalorder (!%p321_p2), %s856_s14, 1  ;;  %s960_s20 = smov (!%p321_p2), 112  }
   0x6   : > { %324 = sbr.rel (%p321_p2) target bundleno = 1373 (0x55d), region = 60  ;;  %s962_s24 = smov (!%p321_p2), 104  }
   0x7   : > { %s963_s25 = smov (!%p321_p2), 88   ;;  %s965_s27 = smov (!%p321_p2), 72  }
   0x8   : > { %s966_s28 = smov (!%p321_p2), 80   ;;  %s967_s29 = smov (!%p321_p2), 16  }
   0x9   : > { %s968_s30 = smov (!%p321_p2), 8   ;;  %s969_s11 = smov (!%p321_p2), 24  }
   0xb   : > { %s1145_s14 = smov (!%p360_p3, %s856_s14), 1  ;;  %vm378_vm0 = vcmask 261120   ;;  %v959_v3 = vmov 32.0   ;;  %v904_v15 = vld [vmem:[%s1139_s6 + $0x8] sm:$0xff]  ;;  %v903_v16 = vld [vmem:[%s1139_s6] sm:$0xff]  ;;  %vm495_vm5 = vcmask 64512  }
   0xc   : > { %s861_s15 = sshll.u32 %s1145_s14, 2  ;;  %931 = vrcp.f32 %v959_v3  ;;  %482 = vmatpush.bf16.msra.mxu1 %v904_v15  ;;  %s862_s21 = sshll.u32 %s1145_s14, 1  ;;  %v902_v18 = vld [vmem:[%s1137_s4 + $0x8] sm:$0xff]  ;;  %v901_v19 = vld [vmem:[%s1137_s4] sm:$0xff]  ;;  %vm535_vm6 = vcmask 1041408   ;;  %vm516_vm7 = vcmask 31744  }
   0xd   : > { %s363_s18 = scalar_lea.vmem %s1133_s0, %s861_s15  ;;  %s367_s26 = scalar_lea.vmem %s1134_s1, %s862_s21  ;;  %446 = vmatpush.bf16.msra.mxu0 %v902_v18  ;;  %v926_v29 = vld [vmem:[%s1135_s2] ss:$0 sm:$0xff]  ;;  %vm750_vm8 = vcmask 130048   ;;  %vm753_vm9 = vcmask 195584   ;;  %vm789_vm10 = vcmask 257024  }
   0xe   : > { %v373_v0 = vld [vmem:[%s363_s18] sm:$0xf]  ;;  %s961_s21 = smov 120   ;;  %s371_s23 = scalar_lea.vmem %s1143_s10, %s861_s15 }
   0xf   : > { %v1041_v1 = vunpack.c.l.bf16 %v373_v0  ;;  %v375_v17 = vld [vmem:[%s367_s26] sm:$0x3]  ;;  %s964_s26 = smov 96  }
  0x10   : > { %483 = vmatpush.bf16.msra.mxu1 %v903_v16  ;;  %v927_v32 = vld [vmem:[%s1136_s3] ss:$0 sm:$0xff] }
  0x11   : > { %v379_v2 = vsel %vm378_vm0, %v1041_v1, 0.0  ;;  %447 = vmatpush.bf16.msra.mxu0 %v901_v19  ;;  %v928_v36 = vld [vmem:[%s1140_s7] ss:$0 sm:$0xff] }
  0x12   : > { %380 = vadd.xlane.f32.xlu0 %v379_v2  ;;  %v932_v4 = vpop.eup %931  ;;  %v929_v44 = vld [vmem:[%s1138_s5] ss:$0 sm:$0xff] }
  0x13   : > { %v383_v5 = vmul.f32 32.0, %v932_v4  ;;  %vm387_vm1 = vweird.f32 %v932_v4  ;;  %881 = vmatmul.msk.bf16.vlgmr.msra.gmra.mxu1 %vm378_vm0, %v375_v17 }
  0x15   : > { %v384_v6 = vsub.f32 1.0, %v383_v5 }
  0x17   : > { %v385_v7 = vmul.f32 %v932_v4, %v384_v6 }
  0x19   : > { %v386_v8 = vadd.f32 %v932_v4, %v385_v7 }
  0x1b   : > { %v388_v9 = vsel %vm387_vm1, %v932_v4, %v386_v8 }
  0x85   : > { %v381_v10 = vpop.xlane.xlu0 %380 }
  0x86   : > { %v389_v11 = vmul.f32 %v388_v9, %v381_v10 }
  0x88   : > { %v390_v12 = vsub.f32 %v1041_v1, %v389_v11 }
  0x8a   : > { %v391_v13 = vmul.f32 %v390_v12, %v390_v12 }
  0x8c   : > { %v392_v14 = vsel %vm378_vm0, %v391_v13, 0.0 }
  0x8d   : > { %393 = vadd.xlane.f32.xlu0 %v392_v14 }
  0x90   : > { %v485_v37 = vpop.f32.mrf.mxu1 }
  0x91   : > { %v486_v38 = vadd.f32 %v928_v36, %v485_v37 }
  0x93   : > { %v490_v39 = vpack.c.bf16 %v486_v38, %v486_v38 }
  0x95   : > { %v528_v40 = vunpack.c.l.b16 %v490_v39  ;;  %v500_v41 = vsel %vm495_vm5, %v490_v39, 0 }
  0x96   : > { %509 = vmatpush.bf16.xpose.msra.mxu2 %v500_v41 }
  0x97   : > { %v1075_v42 = vpack.c.b16 %v528_v40, %v528_v40 }
  0x98   : > { %v487_v43 = vpop.f32.mrf.mxu1 }
  0x99   : > { %560 = vrot.lane.b32.xlu2 %v1075_v42, %s961_s21 }
  0xa1   : > { %618 = vrot.lane.b32.xlu0 %v1075_v42, %s960_s20 }
  0xf3   : > { %v561_v53 = vpop.permute.xlu2 %560 }
  0xf4   : > { %v566_v11 = vsel %vm495_vm5, %v561_v53, 0 }
 0x100   : > { %v394_v20 = vpop.xlane.xlu0 %393 }
 0x101   : > { %v395_v21 = vmul.f32 %v394_v20, %v388_v9 }
 0x103   : > { %v396_v22 = vadd.f32 1e-05, %v395_v21 }
 0x105   : > { %933 = vrsqrt.f32 %v396_v22  ;;  %vm403_vm3 = vweird.f32 %v396_v22 }
 0x10b   : > { %v934_v23 = vpop.eup %933 }
 0x10c   : > { %v398_v24 = vmul.f32 %v934_v23, %v396_v22  ;;  %vm404_vm2 = vweird.f32 %v934_v23 }
 0x10d   : > { %vm405_vm4 = vmor %vm403_vm3, %vm404_vm2 }
 0x10e   : > { %v399_v25 = vmul.f32 %v934_v23, %v398_v24 }
 0x110   : > { %v400_v26 = vmul.f32 0.5, %v399_v25 }
 0x112   : > { %v401_v27 = vsub.f32 1.5, %v400_v26 }
 0x113   : > { %v619_v51 = vpop.permute.xlu0 %618 }
 0x114   : > { %v402_v28 = vmul.f32 %v934_v23, %v401_v27  ;;  %v624_v52 = vsel %vm495_vm5, %v619_v51, 0 }
 0x115   : > { %633 = vmatpush.bf16.xpose.msrb.mxu1 %v624_v52 }
 0x116   : > { %v406_v30 = vsel %vm405_vm4, %v934_v23, %v402_v28 }
 0x117   : > { %v407_v31 = vmul.f32 %v406_v30, %v390_v12 }
 0x119   : > { %v411_v33 = vmul.f32 %v926_v29, %v407_v31 }
 0x11b   : > { %v415_v34 = vadd.f32 %v927_v32, %v411_v33 }
 0x11d   : > { %v416_v35 = vpack.c.bf16 %v415_v34, %v415_v34 }
 0x11f   : > { %872 = vmatmul.msk.bf16.vlgmr.msra.gmra.mxu0 %vm378_vm0, %v416_v35 }
 0x19c   : > { %v449_v45 = vpop.f32.mrf.mxu0 }
 0x19d   : > { %v450_v46 = vadd.f32 %v929_v44, %v449_v45 }
 0x19f   : > { %v489_v47 = vpack.c.bf16 %v450_v46, %v450_v46 }
 0x1a1   : > { %v556_v48 = vunpack.c.l.b16 %v489_v47  ;;  %882 = vmatmul.msk.bf16.vlgmr.msra.gmra.mxu2 %vm495_vm5, %v489_v47 }
 0x1a3   : > { %v557_v49 = vpack.c.b16 %v556_v48, %v556_v48 }
 0x1a4   : > { %v451_v50 = vpop.f32.mrf.mxu0 }
 0x1a5   : > { %558 = vrot.lane.b32.xlu2 %v557_v49, %s961_s21 }
 0x1ad   : > { %676 = vrot.lane.b32.xlu2 %v1075_v42, %s962_s24 }
 0x1b5   : > { %616 = vrot.lane.b32.xlu2 %v557_v49, %s960_s20 }
 0x1bd   : > { %674 = vrot.lane.b32.xlu2 %v557_v49, %s962_s24 }
 0x1c5   : > { %592 = vrot.lane.b32.xlu2 %v1075_v42, %s963_s25 }
 0x1ff   : > { %v559_v54 = vpop.permute.xlu2 %558 }
 0x207   : > { %v677_v55 = vpop.permute.xlu2 %676 }
 0x208   : > { %v682_v13 = vsel %vm495_vm5, %v677_v55, 0 }
 0x20f   : > { %v617_v56 = vpop.permute.xlu2 %616 }
 0x210   : > { %886 = vmatmul.msk.bf16.vlgmr.msrb.gmra.mxu1 %vm495_vm5, %v617_v56 }
 0x217   : > { %v675_v57 = vpop.permute.xlu2 %674 }
 0x21f   : > { %v593_v58 = vpop.permute.xlu2 %592 }
 0x220   : > { %v598_v59 = vsel %vm535_vm6, %v593_v58, 0 }
 0x221   : > { %607 = vmatpush.bf16.msrb.mxu0 %v598_v59 }
 0x224   : > { %v511_v60 = vpop.f32.mrf.mxu2 }
 0x225   : > { %v515_v61 = vmul.f32 0.35355338, %v511_v60 }
 0x227   : > { %v517_v62 = vsel %vm516_vm7, %v515_v61, -inf }
 0x228   : > { %518 = vmax.xlane.f32.xlu1 %v517_v62 }
 0x22c   : > { %v513_v63 = vpop.f32.mrf.mxu2 }
 0x241   : > { %530 = vrot.lane.b32.xlu1 %v1075_v42, %s964_s26 }
 0x28d   : > { %v635_v0 = vpop.f32.mrf.mxu1 }
 0x28e   : > { %v639_v2 = vmul.f32 0.35355338, %v635_v0 }
 0x290   : > { %v640_v3 = vsel %vm516_vm7, %v639_v2, -inf }
 0x291   : > { %641 = vmax.xlane.f32.xlu0 %v640_v3 }
 0x295   : > { %v637_v4 = vpop.f32.mrf.mxu1 }
 0x29b   : > { %v519_v5 = vpop.xlane.xlu1 %518 }
 0x29c   : > { %v520_v6 = vsub.f32 %v515_v61, %v519_v5 }
 0x29e   : > { %v521_v7 = vmul.f32 1.442695, %v520_v6 }
 0x2a0   : > { %935 = vpow2.f32 %v521_v7 }
 0x2a5   : > { %708 = vrot.lane.b32.xlu0 %v1075_v42, %s965_s27 }
 0x2a6   : > { %v936_v8 = vpop.eup %935 }
 0x2a7   : > { %v526_v12 = vpack.c.bf16 %v936_v8, %v936_v8  ;;  %v523_v31 = vsel %vm516_vm7, %v936_v8, 0.0  ;;  %v906_v8 = vld [vmem:[%s1141_s8 + $0x8] sm:$0xff] }
 0x2a8   : > { %780 = vmatpush.bf16.msra.mxu1 %v906_v8 }
 0x2b3   : > { %v531_v9 = vpop.permute.xlu1 %530 }
 0x2b4   : > { %v537_v10 = vsel %vm535_vm6, %v531_v9, 0  ;;  %v905_v9 = vld [vmem:[%s1141_s8] sm:$0xff] }
 0x2b5   : > { %546 = vmatpush.bf16.msra.mxu3 %v537_v10  ;;  %781 = vmatpush.bf16.msra.mxu1 %v905_v9 }
 0x2b8   : > { %883 = vmatmul.msk.bf16.vlgmr.msra.gmra.mxu3 %vm516_vm7, %v526_v12 }
 0x2b9   : > { %575 = vmatpush.bf16.xpose.msrb.mxu3 %v566_v11 }
 0x2c1   : > { %691 = vmatpush.bf16.xpose.msra.mxu3 %v682_v13 }
 0x2c8   : > { %884 = vmatmul.msk.bf16.vlgmr.msrb.gmra.mxu3 %vm495_vm5, %v559_v54 }
 0x2d8   : > { %888 = vmatmul.msk.bf16.vlgmr.msra.gmra.mxu3 %vm495_vm5, %v675_v57 }
 0x304   : > { %v642_v14 = vpop.xlane.xlu0 %641 }
 0x305   : > { %v643_v23 = vsub.f32 %v639_v2, %v642_v14 }
 0x307   : > { %v644_v24 = vmul.f32 1.442695, %v643_v23 }
 0x309   : > { %937 = vpow2.f32 %v644_v24 }
 0x30f   : > { %v938_v28 = vpop.eup %937 }
 0x310   : > { %v646_v30 = vsel %vm516_vm7, %v938_v28, 0.0  ;;  %v649_v44 = vpack.c.bf16 %v938_v28, %v938_v28 }
 0x317   : > { %v709_v15 = vpop.permute.xlu0 %708 }
 0x318   : > { %v714_v16 = vsel %vm535_vm6, %v709_v15, 0 }
 0x319   : > { %723 = vmatpush.bf16.msra.mxu0 %v714_v16 }
 0x33b   : > { %v1099_v17 = vpop.f32.mrf.mxu3 }
 0x343   : > { %v550_v18 = vpop.f32.mrf.mxu3 }
 0x34b   : > { %v577_v19 = vpop.f32.mrf.mxu3 }
 0x34c   : > { %v581_v20 = vmul.f32 0.35355338, %v577_v19 }
 0x34e   : > { %v582_v21 = vsel %vm516_vm7, %v581_v20, -inf }
 0x34f   : > { %583 = vmax.xlane.f32.xlu1 %v582_v21  ;;  %v930_v21 = vld [vmem:[%s1142_s9] ss:$0 sm:$0xff] }
 0x353   : > { %v579_v22 = vpop.f32.mrf.mxu3 }
 0x35b   : > { %v693_v25 = vpop.f32.mrf.mxu3 }
 0x35c   : > { %v697_v26 = vmul.f32 0.35355338, %v693_v25 }
 0x35e   : > { %v698_v27 = vsel %vm516_vm7, %v697_v26, -inf }
 0x35f   : > { %699 = vmax.xlane.f32.xlu2 %v698_v27 }
 0x363   : > { %v695_v29 = vpop.f32.mrf.mxu3 }
 0x367   : > { %647 = vadd.xlane.f32.xlu2 %v646_v30 }
 0x368   : > { %650 = vrot.lane.b32.xlu1 %v1075_v42, %s966_s28 }
 0x392   : > { %524 = vadd.xlane.f32.xlu1 %v523_v31 }
 0x3c2   : > { %v584_v32 = vpop.xlane.xlu1 %583 }
 0x3c3   : > { %v585_v33 = vsub.f32 %v581_v20, %v584_v32 }
 0x3c5   : > { %v586_v34 = vmul.f32 1.442695, %v585_v33 }
 0x3c7   : > { %939 = vpow2.f32 %v586_v34 }
 0x3cd   : > { %v940_v35 = vpop.eup %939 }
 0x3ce   : > { %v588_v36 = vsel %vm516_vm7, %v940_v35, 0.0  ;;  %v591_v37 = vpack.c.bf16 %v940_v35, %v940_v35 }
 0x3cf   : > { %589 = vadd.xlane.f32.xlu2 %v588_v36 }
 0x3d0   : > { %885 = vmatmul.msk.bf16.vlgmr.msrb.gmra.mxu0 %vm516_vm7, %v591_v37 }
 0x3d2   : > { %v700_v38 = vpop.xlane.xlu2 %699 }
 0x3d3   : > { %v701_v39 = vsub.f32 %v697_v26, %v700_v38 }
 0x3d5   : > { %v702_v40 = vmul.f32 1.442695, %v701_v39 }
 0x3d7   : > { %941 = vpow2.f32 %v702_v40 }
 0x3da   : > { %v651_v41 = vpop.permute.xlu1 %650  ;;  %v648_v48 = vpop.xlane.xlu2 %647 }
 0x3db   : > { %v656_v42 = vsel %vm535_vm6, %v651_v41, 0  ;;  %943 = vrcp.f32 %v648_v48 }
 0x3dc   : > { %665 = vmatpush.bf16.msrb.mxu2 %v656_v42 }
 0x3dd   : > { %v942_v43 = vpop.eup %941 }
 0x3de   : > { %v707_v45 = vpack.c.bf16 %v942_v43, %v942_v43  ;;  %v704_v46 = vsel %vm516_vm7, %v942_v43, 0.0 }
 0x3df   : > { %705 = vadd.xlane.f32.xlu0 %v704_v46  ;;  %887 = vmatmul.msk.bf16.vlgmr.msrb.gmra.mxu2 %vm516_vm7, %v649_v44 }
 0x3e0   : > { %889 = vmatmul.msk.bf16.vlgmr.msra.gmra.mxu0 %vm516_vm7, %v707_v45 }
 0x3e1   : > { %v944_v52 = vpop.eup %943 }
 0x405   : > { %v525_v10 = vpop.xlane.xlu1 %524 }
 0x442   : > { %v590_v50 = vpop.xlane.xlu2 %589 }
 0x443   : > { %945 = vrcp.f32 %v590_v50 }
 0x449   : > { %v946_v56 = vpop.eup %945 }
 0x44d   : > { %v609_v47 = vpop.f32.mrf.mxu0 }
 0x44e   : > { %v614_v57 = vmul.f32 %v946_v56, %v609_v47 }
 0x450   : > { %v615_v61 = vpack.c.bf16 %v614_v57, %v614_v57 }
 0x452   : > { %v706_v54 = vpop.xlane.xlu0 %705  ;;  %v733_v2 = vunpack.c.l.b16 %v615_v61 }
 0x453   : > { %947 = vrcp.f32 %v706_v54 }
 0x454   : > { %v734_v4 = vpack.c.b16 %v733_v2, %v733_v2  ;;  %949 = vrcp.f32 %v525_v10 }
 0x455   : > { %v611_v49 = vpop.f32.mrf.mxu0 }
 0x459   : > { %v948_v0 = vpop.eup %947 }
 0x45a   : > { %v950_v12 = vpop.eup %949 }
 0x45b   : > { %v553_v13 = vmul.f32 %v950_v12, %v1099_v17 }
 0x45d   : > { %v725_v51 = vpop.f32.mrf.mxu0  ;;  %v554_v15 = vpack.c.bf16 %v553_v13, %v553_v13 }
 0x45e   : > { %v730_v3 = vmul.f32 %v948_v0, %v725_v51 }
 0x460   : > { %v731_v5 = vpack.c.bf16 %v730_v3, %v730_v3 }
 0x462   : > { %v667_v53 = vpop.f32.mrf.mxu2  ;;  %v743_v6 = vunpack.c.l.b16 %v731_v5 }
 0x463   : > { %v672_v55 = vmul.f32 %v944_v52, %v667_v53 }
 0x464   : > { %v744_v7 = vpack.c.b16 %v743_v6, %v743_v6 }
 0x465   : > { %v673_v58 = vpack.c.bf16 %v672_v55, %v672_v55  ;;  %v727_v59 = vpop.f32.mrf.mxu0 }
 0x467   : > { %v738_v60 = vunpack.c.l.b16 %v673_v58 }
 0x469   : > { %v739_v62 = vpack.c.b16 %v738_v60, %v738_v60 }
 0x46a   : > { %v669_v63 = vpop.f32.mrf.mxu2 }
 0x46b   : > { %740 = vrot.lane.b32.xlu2 %v739_v62, %s967_s29 }
 0x473   : > { %735 = vrot.lane.b32.xlu2 %v734_v4, %s968_s30 }
 0x47b   : > { %745 = vrot.lane.b32.xlu2 %v744_v7, %s969_s11 }
 0x4c5   : > { %v741_v11 = vpop.permute.xlu2 %740 }
 0x4cd   : > { %v736_v14 = vpop.permute.xlu2 %735 }
 0x4ce   : > { %v749_v16 = vsel %vm495_vm5, %v554_v15, %v736_v14 }
 0x4cf   : > { %v752_v18 = vsel %vm750_vm8, %v749_v16, %v741_v11 }
 0x4d5   : > { %v746_v19 = vpop.permute.xlu2 %745 }
 0x4d6   : > { %v755_v20 = vsel %vm753_vm9, %v752_v18, %v746_v19 }
 0x4d7   : > { %898 = vmatmul.msk.bf16.vlgmr.msra.gmra.mxu1 %vm378_vm0, %v755_v20 }
 0x554   : > { %v783_v22 = vpop.f32.mrf.mxu1 }
 0x555   : > { %v784_v23 = vadd.f32 %v930_v21, %v783_v22 }
 0x557   : > { %v787_v24 = vadd.f32 %v784_v23, %v1041_v1 }
 0x559   : > { %v788_v17 = vpack.c.bf16 %v787_v24, %v787_v24 }
 0x55b   : > { %790 = vst.msk [vmem:[%s371_s23] sm:$0xf] %vm789_vm10, %v788_v17 }
 0x55c   : > { %v785_v25 = vpop.f32.mrf.mxu1 }
 0x55d PF: > { %s20_s13 = sadd.s32 1, %s957_s13  }
 0x55e   : > { %p17_p4 = scmp.ge.s32.totalorder %s20_s13, 4  }
 0x560   :  { %19 = sbr.rel (!%p17_p4) target bundleno = 1 (0x1), region = 93 }

</bundles_post_ra>
